<compile_context>
chip_gen: v6e
topology: v6e:2x2x1
jax: 0.10.0
libtpu: 0.0.40
codegen_flags: <defaults>
</compile_context>

<pallas_src>
import jax
import jax.numpy as jnp
from jax import lax
from jax.experimental import pallas as pl
from jax.experimental.pallas import tpu as pltpu

# ---- Module hyper-parameters (consistent with the PyTorch __init__) ----------
INPUT_SHAPE = 16                 # nn.AvgPool1d(kernel_size=input_shape) on concat
L = INPUT_SHAPE // 2             # each of X1 / X2 has length input_shape / 2 (= 8)
RF_SIZE = 16
N_CLASS = 4
H1, H2, H3 = 128, 256, 128

K1 = int(RF_SIZE / 2)            # 8
K2 = int(RF_SIZE * 5 / 16)       # 5
K3 = int(RF_SIZE * 3 / 16)       # 3
BN_EPS = 1e-5
OUT_PAD = 128                    # logits padded to a full 128-lane block

assert (L & (L - 1)) == 0, "in-kernel position mask assumes L is a power of two"


def _pads(k):
    return (k - 1) // 2, k // 2   # nn.ConstantPad1d((left, right), 0)


def _round_up(x, m):
    return (x + m - 1) // m * m


# ----------------------------- Pallas kernel ---------------------------------
def fcn_kernel(x_ref,
               w1_ref, sh1_ref,
               w2_ref, sh2_ref,
               w3_ref, sh3_ref,
               wfc_ref, bfc_ref,
               out_ref):
    tb = out_ref.shape[0]                    # samples per trunk in this tile
    m = x_ref.shape[0]                       # 2 * tb * L rows (both trunks stacked)

    # Within-sample position of every row (L is a power of two).
    t_pos = lax.broadcasted_iota(jnp.int32, (m, 1), 0) & (L - 1)

    # ---- Layer 1 (Cin = 1): im2col prebuilt in the wrapper, one bf16 matmul --
    y = jnp.dot(x_ref[...], w1_ref[...], preferred_element_type=jnp.float32)
    h = jnp.maximum(y + sh1_ref[...], 0.0)                      # (M, 128) f32

    # ---- Conv layers 2 & 3: per-tap-pair accumulating matmuls ----------------
    def conv_layer(h_f32, w_ref, sh_ref, k, cin):
        left = (k - 1) // 2

        def tap(j):
            s = j - left
            if s == 0:
                col = h_f32                                  # all positions valid
            else:
                rolled = pltpu.roll(h_f32, shift=(-s) % m, axis=0)   # XLU
                src = t_pos + s
                valid = jnp.logical_and(src >= 0, src < L)   # per-sample zero pad
                col = jnp.where(valid, rolled, 0.0)
            return col.astype(jnp.bfloat16)                  # (M, cin) bf16

        acc = None
        j = 0
        while j < k:                                         # static tap loop
            if j + 1 < k:                                    # pair taps -> K >= 256
                xcol = jnp.concatenate([tap(j), tap(j + 1)], axis=1)
                w_slab = w_ref[j * cin:(j + 2) * cin, :]
                j += 2
            else:
                xcol = tap(j)
                w_slab = w_ref[j * cin:(j + 1) * cin, :]
                j += 1
            y = jnp.dot(xcol, w_slab, preferred_element_type=jnp.float32)
            acc = y if acc is None else acc + y
        return jnp.maximum(acc + sh_ref[...], 0.0)

    h = conv_layer(h, w2_ref, sh2_ref, K2, H1)               # (M, 256)
    h = conv_layer(h, w3_ref, sh3_ref, K3, H2)               # (M, 128)

    # ---- AvgPool1d(2L) FIRST, then the FC matmul on only (tb, 128) rows ------
    # AvgPool over concat(X1_feat, X2_feat) == mean of the two per-trunk means;
    # FC is linear, so pooling before the FC is exact and ~16x cheaper.
    pooled = jnp.mean(h.reshape(2 * tb, L, H3), axis=1)      # (2*tb, 128)
    feat = 0.5 * (pooled[:tb] + pooled[tb:])                 # (tb, 128)
    logits = jnp.dot(feat.astype(jnp.bfloat16), wfc_ref[...],
                     preferred_element_type=jnp.float32)     # (tb, OUT_PAD)
    out_ref[...] = logits + bfc_ref[...]


# ------------------------------- Wrapper --------------------------------------
def _im2col_layer1(x):
    """x: (Bp, L) -> (Bp*L, K1) window matrix for the Cin=1 first conv."""
    left, right = _pads(K1)
    xp = jnp.pad(x, ((0, 0), (left, right)))                       # (Bp, L + K1 - 1)
    cols = jnp.stack([xp[:, t:t + K1] for t in range(L)], axis=1)  # (Bp, L, K1)
    return cols.reshape(-1, K1)


def fcn_forward(x1, x2, kp, block_b=256):
    """x1, x2: (B, 1, L) float32 (PyTorch NCW). Returns (B, N_CLASS) float32."""
    B = x1.shape[0]
    tb = _round_up(min(block_b, B), 8)        # samples/trunk/step, multiple of 8
    Bp = _round_up(B, tb)
    num_tiles = Bp // tb
    rows = 2 * tb * L                         # rows per grid step (both trunks)

    def prep(x):
        xs = x[:, 0, :]                       # (B, L) — drop singleton channel
        xs = jnp.pad(xs, ((0, Bp - B), (0, 0)))
        return _im2col_layer1(xs).reshape(num_tiles, tb * L, K1)

    # Pre-interleave the two trunks per batch tile: one contiguous block / step.
    xc = jnp.concatenate([prep(x1), prep(x2)], axis=1)       # (tiles, 2*tb*L, K1)
    xc = xc.reshape(num_tiles * rows, K1).astype(jnp.bfloat16)

    x_spec = pl.BlockSpec((rows, K1), lambda i: (i, 0))
    out_spec = pl.BlockSpec((tb, OUT_PAD), lambda i: (i, 0))

    # Weights use constant-index full-array blocks (small, ~0.6 MiB total in bf16).
    def full_spec(a):
        return pl.BlockSpec(a.shape, lambda i, _n=a.ndim: (0,) * _n)

    weights = (kp["w1"], kp["sh1"], kp["w2"], kp["sh2"],
               kp["w3"], kp["sh3"], kp["wfc"], kp["bfc"])

    out = pl.pallas_call(
        fcn_kernel,
        out_shape=jax.ShapeDtypeStruct((Bp, OUT_PAD), jnp.float32),
        grid_spec=pltpu.PrefetchScalarGridSpec(
            num_scalar_prefetch=0,
            grid=(num_tiles,),
            in_specs=[x_spec] + [full_spec(w) for w in weights],
            out_specs=out_spec),
        compiler_params=pltpu.CompilerParams(
            dimension_semantics=("parallel",),        # shards batch tiles across TCs
            vmem_limit_bytes=64 * 1024 * 1024),
    )(xc, *weights)
    return out[:B, :N_CLASS]


# --------------------------- Parameter construction ---------------------------
def make_params(key):
    ks = jax.random.split(key, 32)
    i = 0

    def nxt():
        nonlocal i
        k = ks[i]
        i += 1
        return k

    def conv_layer(cin, cout, ksz):
        fan = cin * ksz
        w = jax.random.normal(nxt(), (cout, cin, ksz), jnp.float32) / jnp.sqrt(fan)
        b = jax.random.normal(nxt(), (cout,), jnp.float32) * 0.05
        gamma = jax.random.uniform(nxt(), (cout,), jnp.float32, 0.8, 1.2)
        beta = jax.random.normal(nxt(), (cout,), jnp.float32) * 0.1
        mean = jax.random.normal(nxt(), (cout,), jnp.float32) * 0.1
        var = jax.random.uniform(nxt(), (cout,), jnp.float32, 0.5, 1.5)
        return dict(w=w, b=b, gamma=gamma, beta=beta, mean=mean, var=var)

    c1 = conv_layer(1, H1, K1)
    c2 = conv_layer(H1, H2, K2)
    c3 = conv_layer(H2, H3, K3)
    wfc = jax.random.normal(nxt(), (N_CLASS, H3), jnp.float32) / jnp.sqrt(H3)
    bfc = jax.random.normal(nxt(), (N_CLASS,), jnp.float32) * 0.05
    raw = dict(c1=c1, c2=c2, c3=c3, wfc=wfc, bfc=bfc)

    def fold(c):
        # eval-mode BN: scale folded INTO the conv weight columns (bf16 for MXU);
        # conv bias + BN offset folded into a per-channel f32 shift.
        scale = c["gamma"] / jnp.sqrt(c["var"] + BN_EPS)                 # (Cout,)
        shift = (c["b"] - c["mean"]) * scale + c["beta"]                 # (Cout,)
        cout, cin, k = c["w"].shape
        w_col = jnp.transpose(c["w"], (2, 1, 0)).reshape(k * cin, cout)  # (K*Cin, Cout)
        w_col = (w_col * scale[None, :]).astype(jnp.bfloat16)
        return w_col, shift[None, :].astype(jnp.float32)

    w1, sh1 = fold(c1)
    w2, sh2 = fold(c2)
    w3, sh3 = fold(c3)

    # FC weight/bias zero-padded to a full 128-lane output slab (dense store).
    wfc_pad = jnp.zeros((H3, OUT_PAD), jnp.float32).at[:, :N_CLASS].set(
        jnp.transpose(wfc)).astype(jnp.bfloat16)
    bfc_pad = jnp.zeros((1, OUT_PAD), jnp.float32).at[0, :N_CLASS].set(bfc)

    kernel_params = dict(
        w1=w1, sh1=sh1,
        w2=w2, sh2=sh2,
        w3=w3, sh3=sh3,
        wfc=wfc_pad, bfc=bfc_pad,
    )
    return raw, kernel_params


# ------------------------------ Pure-JAX reference ----------------------------
def reference_forward(x1, x2, raw):
    def conv_bn_relu(x, c, k):
        left, right = _pads(k)
        y = lax.conv_general_dilated(
            x, c["w"], window_strides=(1,), padding=[(left, right)],
            dimension_numbers=("NCH", "OIH", "NCH"))
        y = y + c["b"][None, :, None]
        y = (y - c["mean"][None, :, None]) / jnp.sqrt(c["var"][None, :, None] + BN_EPS)
        y = y * c["gamma"][None, :, None] + c["beta"][None, :, None]
        return jnp.maximum(y, 0.0)

    def trunk(x):
        x = conv_bn_relu(x, raw["c1"], K1)
        x = conv_bn_relu(x, raw["c2"], K2)
        x = conv_bn_relu(x, raw["c3"], K3)
        return x

    h = jnp.concatenate([trunk(x1), trunk(x2)], axis=2)      # (B, H3, 2L)
    pooled = jnp.mean(h, axis=2)                             # AvgPool1d(2L) + squeeze
    return pooled @ raw["wfc"].T + raw["bfc"]


# ----------------------------------- Main --------------------------------------
if __name__ == "__main__":
    key = jax.random.PRNGKey(0)
    kx1, kx2, kparam = jax.random.split(key, 3)
    raw, kernel_params = make_params(kparam)

    def check(x1, x2, block_b, tag):
        out = jax.block_until_ready(fcn_forward(x1, x2, kernel_params, block_b=block_b))
        ref = reference_forward(x1, x2, raw)
        # bf16 MXU matmuls vs. f32 reference -> slightly looser tolerance.
        if not jnp.allclose(out, ref, atol=2.5e-2, rtol=2.5e-2):
            raise AssertionError(f"{tag} mismatch:\npallas={out}\nref={ref}")

    # Small demo batch (B=2), default block_b, single grid step.
    B = 2
    x1 = jax.random.normal(kx1, (B, 1, L), jnp.float32)      # PyTorch NCW
    x2 = jax.random.normal(kx2, (B, 1, L), jnp.float32)
    check(x1, x2, block_b=256, tag="small-batch")

    # Larger batch exercising multiple parallel grid steps + batch padding.
    B2 = 20
    x1b = jax.random.normal(jax.random.PRNGKey(1), (B2, 1, L), jnp.float32)
    x2b = jax.random.normal(jax.random.PRNGKey(2), (B2, 1, L), jnp.float32)
    check(x1b, x2b, block_b=8, tag="multi-step")

    # Non-trivial tile size (tb=24) with batch padding (Bp=48, 2 grid steps).
    B3 = 40
    x1c = jax.random.normal(jax.random.PRNGKey(3), (B3, 1, L), jnp.float32)
    x2c = jax.random.normal(jax.random.PRNGKey(4), (B3, 1, L), jnp.float32)
    check(x1c, x2c, block_b=24, tag="tb24")

    print("KERNEL_OK")
</pallas_src>

<mosaic_0001>
module attributes {stable_mosaic.version = 11 : i64} {
  func.func @fcn_kernel(%arg0: i32, %arg1: memref<128x8xbf16, #tpu.memory_space<vmem>>, %arg2: memref<8x128xbf16, #tpu.memory_space<vmem>>, %arg3: memref<1x128xf32, #tpu.memory_space<vmem>>, %arg4: memref<640x256xbf16, #tpu.memory_space<vmem>>, %arg5: memref<1x256xf32, #tpu.memory_space<vmem>>, %arg6: memref<768x128xbf16, #tpu.memory_space<vmem>>, %arg7: memref<1x128xf32, #tpu.memory_space<vmem>>, %arg8: memref<128x128xbf16, #tpu.memory_space<vmem>>, %arg9: memref<1x128xf32, #tpu.memory_space<vmem>>, %arg10: memref<8x128xf32, #tpu.memory_space<vmem>>) attributes {dimension_semantics = [#tpu.dimension_semantics<parallel>], iteration_bounds = array<i64: 1>, scalar_prefetch = 0 : i64, scratch_operands = 0 : i64, tpu.core_type = #tpu.core_type<tc>, window_params = [{transform_indices = @transform_0, window_bounds = array<i64: 128, 8>}, {pipeline_mode = #tpu.pipeline_mode<synchronous>, transform_indices = @transform_1, window_bounds = array<i64: 8, 128>}, {pipeline_mode = #tpu.pipeline_mode<synchronous>, transform_indices = @transform_2, window_bounds = array<i64: 1, 128>}, {pipeline_mode = #tpu.pipeline_mode<synchronous>, transform_indices = @transform_3, window_bounds = array<i64: 640, 256>}, {pipeline_mode = #tpu.pipeline_mode<synchronous>, transform_indices = @transform_4, window_bounds = array<i64: 1, 256>}, {pipeline_mode = #tpu.pipeline_mode<synchronous>, transform_indices = @transform_5, window_bounds = array<i64: 768, 128>}, {pipeline_mode = #tpu.pipeline_mode<synchronous>, transform_indices = @transform_6, window_bounds = array<i64: 1, 128>}, {pipeline_mode = #tpu.pipeline_mode<synchronous>, transform_indices = @transform_7, window_bounds = array<i64: 128, 128>}, {pipeline_mode = #tpu.pipeline_mode<synchronous>, transform_indices = @transform_8, window_bounds = array<i64: 1, 128>}, {transform_indices = @transform_9, window_bounds = array<i64: 8, 128>}]} {
    %0 = tpu.iota {dimensions = array<i32: 0>} : vector<128x1xi32>
    %c7_i32 = arith.constant 7 : i32
    %1 = vector.broadcast %c7_i32 : i32 to vector<128x1xi32>
    %2 = arith.andi %0, %1 : vector<128x1xi32>
    %c0 = arith.constant 0 : index
    %c0_0 = arith.constant 0 : index
    %3 = vector.load %arg1[%c0, %c0_0] : memref<128x8xbf16, #tpu.memory_space<vmem>>, vector<128x8xbf16>
    %c0_1 = arith.constant 0 : index
    %c0_2 = arith.constant 0 : index
    %4 = vector.load %arg2[%c0_1, %c0_2] : memref<8x128xbf16, #tpu.memory_space<vmem>>, vector<8x128xbf16>
    %cst = arith.constant dense<0.000000e+00> : vector<128x128xf32>
    %5 = tpu.matmul %3, %4, %cst {dimension_numbers = #tpu.dot_dimension_numbers<[1], [0], [0], [1], [0, 0, 1, 1], [], []>} : vector<128x8xbf16>, vector<8x128xbf16>, vector<128x128xf32> -> vector<128x128xf32>
    %c0_3 = arith.constant 0 : index
    %c0_4 = arith.constant 0 : index
    %6 = vector.load %arg3[%c0_3, %c0_4] : memref<1x128xf32, #tpu.memory_space<vmem>>, vector<1x128xf32>
    %7 = vector.broadcast %6 : vector<1x128xf32> to vector<128x128xf32>
    %8 = arith.addf %5, %7 : vector<128x128xf32>
    %cst_5 = arith.constant 0.000000e+00 : f32
    %9 = vector.broadcast %cst_5 : f32 to vector<128x128xf32>
    %10 = arith.maximumf %8, %9 : vector<128x128xf32>
    %c2_i32 = arith.constant 2 : i32
    %11 = tpu.dynamic_rotate %10 by %c2_i32 dim 0 : vector<128x128xf32>, i32 -> vector<128x128xf32>
    %c-2_i32 = arith.constant -2 : i32
    %12 = vector.broadcast %c-2_i32 : i32 to vector<128x1xi32>
    %13 = arith.addi %2, %12 : vector<128x1xi32>
    %c0_i32 = arith.constant 0 : i32
    %14 = vector.broadcast %c0_i32 : i32 to vector<128x1xi32>
    %15 = arith.cmpi sge, %13, %14 : vector<128x1xi32>
    %c8_i32 = arith.constant 8 : i32
    %16 = vector.broadcast %c8_i32 : i32 to vector<128x1xi32>
    %17 = arith.cmpi slt, %13, %16 : vector<128x1xi32>
    %18 = arith.andi %15, %17 : vector<128x1xi1>
    %cst_6 = arith.constant 0.000000e+00 : f32
    %19 = vector.shape_cast %18 : vector<128x1xi1> to vector<128x1xi1>
    %20 = vector.broadcast %19 : vector<128x1xi1> to vector<128x128xi1>
    %21 = vector.broadcast %cst_6 : f32 to vector<128x128xf32>
    %22 = arith.select %20, %11, %21 : vector<128x128xi1>, vector<128x128xf32>
    %23 = arith.truncf %22 : vector<128x128xf32> to vector<128x128xbf16>
    %c1_i32 = arith.constant 1 : i32
    %24 = tpu.dynamic_rotate %10 by %c1_i32 dim 0 : vector<128x128xf32>, i32 -> vector<128x128xf32>
    %c-1_i32 = arith.constant -1 : i32
    %25 = vector.broadcast %c-1_i32 : i32 to vector<128x1xi32>
    %26 = arith.addi %2, %25 : vector<128x1xi32>
    %c0_i32_7 = arith.constant 0 : i32
    %27 = vector.broadcast %c0_i32_7 : i32 to vector<128x1xi32>
    %28 = arith.cmpi sge, %26, %27 : vector<128x1xi32>
    %c8_i32_8 = arith.constant 8 : i32
    %29 = vector.broadcast %c8_i32_8 : i32 to vector<128x1xi32>
    %30 = arith.cmpi slt, %26, %29 : vector<128x1xi32>
    %31 = arith.andi %28, %30 : vector<128x1xi1>
    %cst_9 = arith.constant 0.000000e+00 : f32
    %32 = vector.shape_cast %31 : vector<128x1xi1> to vector<128x1xi1>
    %33 = vector.broadcast %32 : vector<128x1xi1> to vector<128x128xi1>
    %34 = vector.broadcast %cst_9 : f32 to vector<128x128xf32>
    %35 = arith.select %33, %24, %34 : vector<128x128xi1>, vector<128x128xf32>
    %36 = arith.truncf %35 : vector<128x128xf32> to vector<128x128xbf16>
    %37 = tpu.concatenate %23, %36 in 1 : vector<128x128xbf16>, vector<128x128xbf16> -> vector<128x256xbf16>
    %c0_10 = arith.constant 0 : index
    %c0_11 = arith.constant 0 : index
    %38 = vector.load %arg4[%c0_10, %c0_11] : memref<640x256xbf16, #tpu.memory_space<vmem>>, vector<256x256xbf16>
    %cst_12 = arith.constant dense<0.000000e+00> : vector<128x256xf32>
    %39 = tpu.matmul %37, %38, %cst_12 {dimension_numbers = #tpu.dot_dimension_numbers<[1], [0], [0], [1], [0, 0, 1, 1], [], []>} : vector<128x256xbf16>, vector<256x256xbf16>, vector<128x256xf32> -> vector<128x256xf32>
    %40 = arith.truncf %10 : vector<128x128xf32> to vector<128x128xbf16>
    %c127_i32 = arith.constant 127 : i32
    %41 = tpu.dynamic_rotate %10 by %c127_i32 dim 0 : vector<128x128xf32>, i32 -> vector<128x128xf32>
    %c1_i32_13 = arith.constant 1 : i32
    %42 = vector.broadcast %c1_i32_13 : i32 to vector<128x1xi32>
    %43 = arith.addi %2, %42 : vector<128x1xi32>
    %c0_i32_14 = arith.constant 0 : i32
    %44 = vector.broadcast %c0_i32_14 : i32 to vector<128x1xi32>
    %45 = arith.cmpi sge, %43, %44 : vector<128x1xi32>
    %c8_i32_15 = arith.constant 8 : i32
    %46 = vector.broadcast %c8_i32_15 : i32 to vector<128x1xi32>
    %47 = arith.cmpi slt, %43, %46 : vector<128x1xi32>
    %48 = arith.andi %45, %47 : vector<128x1xi1>
    %cst_16 = arith.constant 0.000000e+00 : f32
    %49 = vector.shape_cast %48 : vector<128x1xi1> to vector<128x1xi1>
    %50 = vector.broadcast %49 : vector<128x1xi1> to vector<128x128xi1>
    %51 = vector.broadcast %cst_16 : f32 to vector<128x128xf32>
    %52 = arith.select %50, %41, %51 : vector<128x128xi1>, vector<128x128xf32>
    %53 = arith.truncf %52 : vector<128x128xf32> to vector<128x128xbf16>
    %54 = tpu.concatenate %40, %53 in 1 : vector<128x128xbf16>, vector<128x128xbf16> -> vector<128x256xbf16>
    %c256 = arith.constant 256 : index
    %c0_17 = arith.constant 0 : index
    %55 = vector.load %arg4[%c256, %c0_17] : memref<640x256xbf16, #tpu.memory_space<vmem>>, vector<256x256xbf16>
    %cst_18 = arith.constant dense<0.000000e+00> : vector<128x256xf32>
    %56 = tpu.matmul %54, %55, %cst_18 {dimension_numbers = #tpu.dot_dimension_numbers<[1], [0], [0], [1], [0, 0, 1, 1], [], []>} : vector<128x256xbf16>, vector<256x256xbf16>, vector<128x256xf32> -> vector<128x256xf32>
    %57 = arith.addf %39, %56 : vector<128x256xf32>
    %c126_i32 = arith.constant 126 : i32
    %58 = tpu.dynamic_rotate %10 by %c126_i32 dim 0 : vector<128x128xf32>, i32 -> vector<128x128xf32>
    %c2_i32_19 = arith.constant 2 : i32
    %59 = vector.broadcast %c2_i32_19 : i32 to vector<128x1xi32>
    %60 = arith.addi %2, %59 : vector<128x1xi32>
    %c0_i32_20 = arith.constant 0 : i32
    %61 = vector.broadcast %c0_i32_20 : i32 to vector<128x1xi32>
    %62 = arith.cmpi sge, %60, %61 : vector<128x1xi32>
    %c8_i32_21 = arith.constant 8 : i32
    %63 = vector.broadcast %c8_i32_21 : i32 to vector<128x1xi32>
    %64 = arith.cmpi slt, %60, %63 : vector<128x1xi32>
    %65 = arith.andi %62, %64 : vector<128x1xi1>
    %cst_22 = arith.constant 0.000000e+00 : f32
    %66 = vector.shape_cast %65 : vector<128x1xi1> to vector<128x1xi1>
    %67 = vector.broadcast %66 : vector<128x1xi1> to vector<128x128xi1>
    %68 = vector.broadcast %cst_22 : f32 to vector<128x128xf32>
    %69 = arith.select %67, %58, %68 : vector<128x128xi1>, vector<128x128xf32>
    %70 = arith.truncf %69 : vector<128x128xf32> to vector<128x128xbf16>
    %c512 = arith.constant 512 : index
    %c0_23 = arith.constant 0 : index
    %71 = vector.load %arg4[%c512, %c0_23] : memref<640x256xbf16, #tpu.memory_space<vmem>>, vector<128x256xbf16>
    %cst_24 = arith.constant dense<0.000000e+00> : vector<128x256xf32>
    %72 = tpu.matmul %70, %71, %cst_24 {dimension_numbers = #tpu.dot_dimension_numbers<[1], [0], [0], [1], [0, 0, 1, 1], [], []>} : vector<128x128xbf16>, vector<128x256xbf16>, vector<128x256xf32> -> vector<128x256xf32>
    %73 = arith.addf %57, %72 : vector<128x256xf32>
    %c0_25 = arith.constant 0 : index
    %c0_26 = arith.constant 0 : index
    %74 = vector.load %arg5[%c0_25, %c0_26] : memref<1x256xf32, #tpu.memory_space<vmem>>, vector<1x256xf32>
    %75 = vector.broadcast %74 : vector<1x256xf32> to vector<128x256xf32>
    %76 = arith.addf %73, %75 : vector<128x256xf32>
    %cst_27 = arith.constant 0.000000e+00 : f32
    %77 = vector.broadcast %cst_27 : f32 to vector<128x256xf32>
    %78 = arith.maximumf %76, %77 : vector<128x256xf32>
    %c1_i32_28 = arith.constant 1 : i32
    %79 = tpu.dynamic_rotate %78 by %c1_i32_28 dim 0 : vector<128x256xf32>, i32 -> vector<128x256xf32>
    %c-1_i32_29 = arith.constant -1 : i32
    %80 = vector.broadcast %c-1_i32_29 : i32 to vector<128x1xi32>
    %81 = arith.addi %2, %80 : vector<128x1xi32>
    %c0_i32_30 = arith.constant 0 : i32
    %82 = vector.broadcast %c0_i32_30 : i32 to vector<128x1xi32>
    %83 = arith.cmpi sge, %81, %82 : vector<128x1xi32>
    %c8_i32_31 = arith.constant 8 : i32
    %84 = vector.broadcast %c8_i32_31 : i32 to vector<128x1xi32>
    %85 = arith.cmpi slt, %81, %84 : vector<128x1xi32>
    %86 = arith.andi %83, %85 : vector<128x1xi1>
    %cst_32 = arith.constant 0.000000e+00 : f32
    %87 = vector.shape_cast %86 : vector<128x1xi1> to vector<128x1xi1>
    %88 = vector.broadcast %87 : vector<128x1xi1> to vector<128x256xi1>
    %89 = vector.broadcast %cst_32 : f32 to vector<128x256xf32>
    %90 = arith.select %88, %79, %89 : vector<128x256xi1>, vector<128x256xf32>
    %91 = arith.truncf %90 : vector<128x256xf32> to vector<128x256xbf16>
    %92 = arith.truncf %78 : vector<128x256xf32> to vector<128x256xbf16>
    %93 = tpu.concatenate %91, %92 in 1 : vector<128x256xbf16>, vector<128x256xbf16> -> vector<128x512xbf16>
    %c0_33 = arith.constant 0 : index
    %c0_34 = arith.constant 0 : index
    %94 = vector.load %arg6[%c0_33, %c0_34] : memref<768x128xbf16, #tpu.memory_space<vmem>>, vector<512x128xbf16>
    %cst_35 = arith.constant dense<0.000000e+00> : vector<128x128xf32>
    %95 = tpu.matmul %93, %94, %cst_35 {dimension_numbers = #tpu.dot_dimension_numbers<[1], [0], [0], [1], [0, 0, 1, 1], [], []>} : vector<128x512xbf16>, vector<512x128xbf16>, vector<128x128xf32> -> vector<128x128xf32>
    %c127_i32_36 = arith.constant 127 : i32
    %96 = tpu.dynamic_rotate %78 by %c127_i32_36 dim 0 : vector<128x256xf32>, i32 -> vector<128x256xf32>
    %c1_i32_37 = arith.constant 1 : i32
    %97 = vector.broadcast %c1_i32_37 : i32 to vector<128x1xi32>
    %98 = arith.addi %2, %97 : vector<128x1xi32>
    %c0_i32_38 = arith.constant 0 : i32
    %99 = vector.broadcast %c0_i32_38 : i32 to vector<128x1xi32>
    %100 = arith.cmpi sge, %98, %99 : vector<128x1xi32>
    %c8_i32_39 = arith.constant 8 : i32
    %101 = vector.broadcast %c8_i32_39 : i32 to vector<128x1xi32>
    %102 = arith.cmpi slt, %98, %101 : vector<128x1xi32>
    %103 = arith.andi %100, %102 : vector<128x1xi1>
    %cst_40 = arith.constant 0.000000e+00 : f32
    %104 = vector.shape_cast %103 : vector<128x1xi1> to vector<128x1xi1>
    %105 = vector.broadcast %104 : vector<128x1xi1> to vector<128x256xi1>
    %106 = vector.broadcast %cst_40 : f32 to vector<128x256xf32>
    %107 = arith.select %105, %96, %106 : vector<128x256xi1>, vector<128x256xf32>
    %108 = arith.truncf %107 : vector<128x256xf32> to vector<128x256xbf16>
    %c512_41 = arith.constant 512 : index
    %c0_42 = arith.constant 0 : index
    %109 = vector.load %arg6[%c512_41, %c0_42] : memref<768x128xbf16, #tpu.memory_space<vmem>>, vector<256x128xbf16>
    %cst_43 = arith.constant dense<0.000000e+00> : vector<128x128xf32>
    %110 = tpu.matmul %108, %109, %cst_43 {dimension_numbers = #tpu.dot_dimension_numbers<[1], [0], [0], [1], [0, 0, 1, 1], [], []>} : vector<128x256xbf16>, vector<256x128xbf16>, vector<128x128xf32> -> vector<128x128xf32>
    %111 = arith.addf %95, %110 : vector<128x128xf32>
    %c0_44 = arith.constant 0 : index
    %c0_45 = arith.constant 0 : index
    %112 = vector.load %arg7[%c0_44, %c0_45] : memref<1x128xf32, #tpu.memory_space<vmem>>, vector<1x128xf32>
    %113 = vector.broadcast %112 : vector<1x128xf32> to vector<128x128xf32>
    %114 = arith.addf %111, %113 : vector<128x128xf32>
    %cst_46 = arith.constant 0.000000e+00 : f32
    %115 = vector.broadcast %cst_46 : f32 to vector<128x128xf32>
    %116 = arith.maximumf %114, %115 : vector<128x128xf32>
    %117 = vector.shape_cast %116 : vector<128x128xf32> to vector<16x8x128xf32>
    %cst_47 = arith.constant dense<0.000000e+00> : vector<16x128xf32>
    %118 = vector.multi_reduction <add>, %117, %cst_47 [1] : vector<16x8x128xf32> to vector<16x128xf32>
    %cst_48 = arith.constant 8.000000e+00 : f32
    %119 = vector.broadcast %cst_48 : f32 to vector<16x128xf32>
    %120 = arith.divf %118, %119 : vector<16x128xf32>
    %121 = vector.extract_strided_slice %120 {offsets = [0, 0], sizes = [8, 128], strides = [1, 1]} : vector<16x128xf32> to vector<8x128xf32>
    %122 = vector.extract_strided_slice %120 {offsets = [8, 0], sizes = [8, 128], strides = [1, 1]} : vector<16x128xf32> to vector<8x128xf32>
    %123 = arith.addf %121, %122 : vector<8x128xf32>
    %cst_49 = arith.constant 5.000000e-01 : f32
    %124 = vector.broadcast %cst_49 : f32 to vector<8x128xf32>
    %125 = arith.mulf %124, %123 : vector<8x128xf32>
    %126 = arith.truncf %125 : vector<8x128xf32> to vector<8x128xbf16>
    %c0_50 = arith.constant 0 : index
    %c0_51 = arith.constant 0 : index
    %127 = vector.load %arg8[%c0_50, %c0_51] : memref<128x128xbf16, #tpu.memory_space<vmem>>, vector<128x128xbf16>
    %cst_52 = arith.constant dense<0.000000e+00> : vector<8x128xf32>
    %128 = tpu.matmul %126, %127, %cst_52 {dimension_numbers = #tpu.dot_dimension_numbers<[1], [0], [0], [1], [0, 0, 1, 1], [], []>} : vector<8x128xbf16>, vector<128x128xbf16>, vector<8x128xf32> -> vector<8x128xf32>
    %c0_53 = arith.constant 0 : index
    %c0_54 = arith.constant 0 : index
    %129 = vector.load %arg9[%c0_53, %c0_54] : memref<1x128xf32, #tpu.memory_space<vmem>>, vector<1x128xf32>
    %130 = vector.broadcast %129 : vector<1x128xf32> to vector<8x128xf32>
    %131 = arith.addf %128, %130 : vector<8x128xf32>
    %c0_55 = arith.constant 0 : index
    %c0_56 = arith.constant 0 : index
    %132 = vector.load %arg10[%c0_55, %c0_56] : memref<8x128xf32, #tpu.memory_space<vmem>>, vector<8x128xf32>
    tpu.vector_store %arg10[%c0_55, %c0_56], %131 {strides = array<i32>} : memref<8x128xf32, #tpu.memory_space<vmem>>, vector<8x128xf32>,
    return
  }
  func.func @transform_0(%arg0: i32) -> (i32, i32) {
    %c0_i32 = arith.constant 0 : i32
    %c0_i32_0 = arith.constant 0 : i32
    return %arg0, %c0_i32 : i32, i32
  }
  func.func @transform_1(%arg0: i32) -> (i32, i32) {
    %c0_i32 = arith.constant 0 : i32
    %c0_i32_0 = arith.constant 0 : i32
    %c0_i32_1 = arith.constant 0 : i32
    return %c0_i32, %c0_i32_0 : i32, i32
  }
  func.func @transform_2(%arg0: i32) -> (i32, i32) {
    %c0_i32 = arith.constant 0 : i32
    %c0_i32_0 = arith.constant 0 : i32
    %c0_i32_1 = arith.constant 0 : i32
    return %c0_i32, %c0_i32_0 : i32, i32
  }
  func.func @transform_3(%arg0: i32) -> (i32, i32) {
    %c0_i32 = arith.constant 0 : i32
    %c0_i32_0 = arith.constant 0 : i32
    %c0_i32_1 = arith.constant 0 : i32
    return %c0_i32, %c0_i32_0 : i32, i32
  }
  func.func @transform_4(%arg0: i32) -> (i32, i32) {
    %c0_i32 = arith.constant 0 : i32
    %c0_i32_0 = arith.constant 0 : i32
    %c0_i32_1 = arith.constant 0 : i32
    return %c0_i32, %c0_i32_0 : i32, i32
  }
  func.func @transform_5(%arg0: i32) -> (i32, i32) {
    %c0_i32 = arith.constant 0 : i32
    %c0_i32_0 = arith.constant 0 : i32
    %c0_i32_1 = arith.constant 0 : i32
    return %c0_i32, %c0_i32_0 : i32, i32
  }
  func.func @transform_6(%arg0: i32) -> (i32, i32) {
    %c0_i32 = arith.constant 0 : i32
    %c0_i32_0 = arith.constant 0 : i32
    %c0_i32_1 = arith.constant 0 : i32
    return %c0_i32, %c0_i32_0 : i32, i32
  }
  func.func @transform_7(%arg0: i32) -> (i32, i32) {
    %c0_i32 = arith.constant 0 : i32
    %c0_i32_0 = arith.constant 0 : i32
    %c0_i32_1 = arith.constant 0 : i32
    return %c0_i32, %c0_i32_0 : i32, i32
  }
  func.func @transform_8(%arg0: i32) -> (i32, i32) {
    %c0_i32 = arith.constant 0 : i32
    %c0_i32_0 = arith.constant 0 : i32
    %c0_i32_1 = arith.constant 0 : i32
    return %c0_i32, %c0_i32_0 : i32, i32
  }
  func.func @transform_9(%arg0: i32) -> (i32, i32) {
    %c0_i32 = arith.constant 0 : i32
    %c0_i32_0 = arith.constant 0 : i32
    return %arg0, %c0_i32 : i32, i32
  }
}

</mosaic_0001>

<bundles_post_ra>
// kernel: tpu_custom_call.1
= control target key start
LH: loop header
LB: loop body
LE: loop exit
PB: predicated region body
PF: predicated region fallthrough
CT: control target
= control target key end

     0   :  { %14 = vsyncpa [#allocation3], 0  ;;  %s5740_s0 = inlined_call_operand.vmem [shape: bf16[128,8], index: 0, kind: input, shape index: {}]   ;;  %s5741_s1 = inlined_call_operand.vmem [shape: bf16[8,128], index: 1, kind: input, shape index: {}]   ;;  %s5742_s2 = inlined_call_operand.vmem [shape: f32[1,128], index: 2, kind: input, shape index: {}]   ;;  %s5743_s3 = inlined_call_operand.hbm [shape: bf16[640,256], index: 3, kind: input, shape index: {}]   ;;  %s5744_s4 = inlined_call_operand.vmem [shape: f32[1,256], index: 4, kind: input, shape index: {}]   ;;  %s5745_s5 = inlined_call_operand.hbm [shape: bf16[768,128], index: 5, kind: input, shape index: {}]   ;;  %s5746_s6 = inlined_call_operand.vmem [shape: f32[1,128], index: 6, kind: input, shape index: {}]   ;;  %s5747_s7 = inlined_call_operand.vmem [shape: bf16[128,128], index: 7, kind: input, shape index: {}]   ;;  %s5748_s8 = inlined_call_operand.vmem [shape: f32[1,128], index: 8, kind: input, shape index: {}]   ;;  %s5749_s9 = inlined_call_operand.hbm [shape: f32[8,128], index: 9, kind: output, shape index: {}]  }
   0x1   :  { %15 = vsyncpa [#allocation6], 0 }
   0x2   :  { %16 = vsyncpa [#allocation4], 0  ;;  %s3955_s30 = smov [#allocation2]  }
   0x3   :  { %s28_s10 = sshll.u32 %s3955_s30, 4  ;;  %s29_s10 = int_to_ptr.vmem [resolvable:$true] %s28_s10 }
   0x4   :  { %s3897_s11 = scalar_lea.vmem %s29_s10, 10240  ;;  %p3902_p1 = scmp.lt.s32.totalorder %s29_s10, %s29_s10 }
   0x5   :  { %p3898_p0 = scmp.ne.s32.totalorder %s29_s10, %s3897_s11  ;;  %p3903_p2 = scmp.lt.s32.totalorder %s3897_s11, %s3897_s11 }
   0x7   :  { %p3904_p3 = por %p3903_p2, %p3902_p1 }
   0x9   :  { %p3905_p4 = pnand %p3904_p3, %p3898_p0 }
   0xb   :  { %3908 = shalt.err (!%p3905_p4)
}
   0xc   :  { %s3956_s12 = smov 128   ;;  %s3957_s13 = smov 8  }
   0xd   :  { %34 = dma.hbm_to_vmem [thread:$0]  %s5743_s3, 10240, %s29_s10, [#allocation3], %s3956_s12, %s3956_s12, %s3957_s13  }
   0xe   :  { %s3958_s16 = smov [#allocation5]  }
   0xf   :  { %s42_s17 = sshll.u32 %s3958_s16, 4  ;;  %s43_s17 = int_to_ptr.vmem [resolvable:$true] %s42_s17 }
  0x10   :  { %s3917_s18 = scalar_lea.vmem %s43_s17, 6144  ;;  %p3922_p6 = scmp.lt.s32.totalorder %s43_s17, %s43_s17 }
  0x11   :  { %p3918_p5 = scmp.ne.s32.totalorder %s43_s17, %s3917_s18  ;;  %p3923_p7 = scmp.lt.s32.totalorder %s3917_s18, %s3917_s18 }
  0x13   :  { %p3924_p8 = por %p3923_p7, %p3922_p6 }
  0x15   :  { %p3925_p9 = pnand %p3924_p8, %p3918_p5 }
  0x17   :  { %3928 = shalt.err (!%p3925_p9)
}
  0x18   :  { %s3959_s19 = smov 64   ;;  %s3960_s20 = smov 4  }
  0x19   :  { %48 = dma.hbm_to_vmem [thread:$0]  %s5745_s5, 6144, %s43_s17, [#allocation6], %s3959_s19, %s3959_s19, %s3960_s20  }
  0x1a   :  { %3949 = dma.done.wait [#allocation3], 10240  }
  0x1b   :  { %3950 = vsyncadd [#allocation3], 4294957056 }
  0x1c   :  { %3951 = dma.done.wait [#allocation6], 6144  }
  0x1d   :  { %3952 = vsyncadd [#allocation6], 4294961152  ;;  %vm184_vm0 = vcmask 1043456   ;;  %vm159_vm1 = vcmask 64512   ;;  %v111_v0 = vld [vmem:[%s5741_s1] sm:$0xf] }
  0x1e   :  { %3694 = vmatprep.subr.msk.bf16.mxu0 %vm184_vm0, %v111_v0  ;;  %v186_v1 = vsel %vm184_vm0, %v111_v0, 0  ;;  %v3705_v2 = vld [vmem:[%s5740_s0] sm:$0xff]   ;;  %v3706_v3 = vld [vmem:[%s5740_s0 + $0x8] sm:$0xff]   ;;  %v3707_v4 = vld [vmem:[%s5740_s0 + $0x10] sm:$0xff]   ;;  %s3964_s12 = smov [#allocation7]  }
  0x1f   :  { %3657 = vmatpush3.bf16.msra.mxu0 %v186_v1  ;;  %3658 = vmatprep.mubr.msk.bf16.mxu0 %vm159_vm1, %v3705_v2  ;;  %v3708_v5 = vld [vmem:[%s5740_s0 + $0x18] sm:$0xff]   ;;  %v3709_v8 = vld [vmem:[%s5740_s0 + $0x20] sm:$0xff]   ;;  %v3710_v12 = vld [vmem:[%s5740_s0 + $0x28] sm:$0xff]   ;;  %s3089_s13 = sshll.u32 %s3964_s12, 4  ;;  %s3090_s13 = int_to_ptr.vmem [resolvable:$true] %s3089_s13 }
  0x20   :  { %v3713_v6 = vld [vmem:[#allocation2 + $0x174] ss:$8 sps:$4 sm:$0xff]   ;;  %v3715_v7 = vld [vmem:[#allocation2 + $0x170] ss:$8 sps:$4 sm:$0xff]   ;;  %v3716_v9 = vld [vmem:[#allocation2 + $0x164] ss:$8 sps:$4 sm:$0xff]   ;;  %p3934_p11 = scmp.lt.s32.totalorder %s3090_s13, %s3090_s13 }
  0x21   :  { %992 = vmatprep.subr.bf16.mxu1 %v3713_v6  ;;  %v3718_v10 = vld [vmem:[#allocation2 + $0x160] ss:$8 sps:$4 sm:$0xff]   ;;  %v3719_v11 = vld [vmem:[#allocation2 + $0x154] ss:$8 sps:$4 sm:$0xff]   ;;  %v3721_v13 = vld [vmem:[#allocation2 + $0x150] ss:$8 sps:$4 sm:$0xff]  }
  0x22   :  { %3659 = vmatmul.mubr.msk.bf16.vlgmr.msra.gmra.mxu0 %vm159_vm1, %v3706_v3  ;;  %993 = vmatpush1.bf16.msra.mxu1 %v3715_v7  ;;  %v3722_v14 = vld [vmem:[#allocation2 + $0x144] ss:$8 sps:$4 sm:$0xff]   ;;  %v3731_v15 = vld [vmem:[#allocation2 + $0x70] ss:$8 sps:$4 sm:$0xff]   ;;  %v3733_v16 = vld [vmem:[#allocation2 + $0x74] ss:$8 sps:$4 sm:$0xff]  }
  0x23   :  { %3662 = vmatprep.mubr.msk.bf16.mxu0 %vm159_vm1, %v3707_v4  ;;  %994 = vmatprep.subr.bf16.mxu1 %v3716_v9  ;;  %v3711_v17 = vld [vmem:[%s5740_s0 + $0x30] sm:$0xff]   ;;  %v3724_v18 = vld [vmem:[#allocation2 + $0x140] ss:$8 sps:$4 sm:$0xff]   ;;  %v3739_v20 = vld [vmem:[#allocation2 + $0x64] ss:$8 sps:$4 sm:$0xff]   ;;  %s3929_s14 = scalar_lea.vmem %s3090_s13, 128 }
  0x24   :  { %1265 = vmatprep.subr.bf16.mxu0 %v3733_v16  ;;  %v3737_v19 = vld [vmem:[#allocation2 + $0x60] ss:$8 sps:$4 sm:$0xff]   ;;  %v3725_v21 = vld [vmem:[#allocation2 + $0x134] ss:$8 sps:$4 sm:$0xff]   ;;  %v3727_v23 = vld [vmem:[#allocation2 + $0x130] ss:$8 sps:$4 sm:$0xff]   ;;  %p3930_p10 = scmp.ne.s32.totalorder %s3090_s13, %s3929_s14  ;;  %p3935_p12 = scmp.lt.s32.totalorder %s3929_s14, %s3929_s14 }
  0x25   :  { %1266 = vmatpush1.bf16.msra.mxu0 %v3731_v15  ;;  %v3745_v22 = vld [vmem:[#allocation2 + $0x54] ss:$8 sps:$4 sm:$0xff]   ;;  %v3743_v24 = vld [vmem:[#allocation2 + $0x50] ss:$8 sps:$4 sm:$0xff]   ;;  %v3728_v26 = vld [vmem:[#allocation2 + $0x124] ss:$8 sps:$4 sm:$0xff]  }
  0x26   :  { %995 = vmatpush1.bf16.msra.mxu1 %v3718_v10  ;;  %1267 = vmatprep.subr.bf16.mxu0 %v3739_v20  ;;  %v3712_v25 = vld [vmem:[%s5740_s0 + $0x38] sm:$0xff]   ;;  %v3751_v27 = vld [vmem:[#allocation2 + $0x44] ss:$8 sps:$4 sm:$0xff]   ;;  %v3730_v28 = vld [vmem:[#allocation2 + $0x120] ss:$8 sps:$4 sm:$0xff]   ;;  %p3936_p13 = por %p3935_p12, %p3934_p11 }
  0x27   :  { %996 = vmatprep.subr.bf16.mxu1 %v3719_v11  ;;  %v3749_v29 = vld [vmem:[#allocation2 + $0x40] ss:$8 sps:$4 sm:$0xff]   ;;  %v3734_v30 = vld [vmem:[#allocation2 + $0x114] ss:$8 sps:$4 sm:$0xff]   ;;  %v3736_v32 = vld [vmem:[#allocation2 + $0x110] ss:$8 sps:$4 sm:$0xff]   ;;  %v62_v11 = vlaneseq }
  0x28   :  { %v3757_v31 = vld [vmem:[#allocation2 + $0x34] ss:$8 sps:$4 sm:$0xff]   ;;  %v3755_v33 = vld [vmem:[#allocation2 + $0x30] ss:$8 sps:$4 sm:$0xff]   ;;  %v3740_v34 = vld [vmem:[#allocation2 + $0x104] ss:$8 sps:$4 sm:$0xff]   ;;  %p3937_p0 = pnand %p3936_p13, %p3930_p10 }
  0x29   :  { %1268 = vmatpush1.bf16.msra.mxu0 %v3737_v19  ;;  %v3763_v35 = vld [vmem:[#allocation2 + $0x24] ss:$8 sps:$4 sm:$0xff]   ;;  %v3742_v36 = vld [vmem:[#allocation2 + $0x100] ss:$8 sps:$4 sm:$0xff]   ;;  %v3746_v38 = vld [vmem:[#allocation2 + $0x1f4] ss:$8 sps:$4 sm:$0xff]  }
  0x2a   :  { %3663 = vmatmul.mubr.msk.bf16.gmra.mxu0 %vm159_vm1, %v3708_v5  ;;  %997 = vmatpush1.bf16.msra.mxu1 %v3721_v13  ;;  %v3761_v37 = vld [vmem:[#allocation2 + $0x20] ss:$8 sps:$4 sm:$0xff]   ;;  %v3769_v39 = vld [vmem:[#allocation2 + $0x14] ss:$8 sps:$4 sm:$0xff]   ;;  %v3748_v40 = vld [vmem:[#allocation2 + $0x1f0] ss:$8 sps:$4 sm:$0xff]  }
  0x2b   :  { %3666 = vmatprep.mubr.msk.bf16.mxu0 %vm159_vm1, %v3709_v8  ;;  %998 = vmatprep.subr.bf16.mxu1 %v3722_v14  ;;  %v3767_v41 = vld [vmem:[#allocation2 + $0x10] ss:$8 sps:$4 sm:$0xff]   ;;  %v3752_v42 = vld [vmem:[#allocation2 + $0x1e4] ss:$8 sps:$4 sm:$0xff]   ;;  %v3754_v43 = vld [vmem:[#allocation2 + $0x1e0] ss:$8 sps:$4 sm:$0xff]  }
  0x2c   :  { %1269 = vmatprep.subr.bf16.mxu0 %v3745_v22  ;;  %v3758_v44 = vld [vmem:[#allocation2 + $0x1d4] ss:$8 sps:$4 sm:$0xff]   ;;  %v3760_v45 = vld [vmem:[#allocation2 + $0x1d0] ss:$8 sps:$4 sm:$0xff]   ;;  %v3764_v46 = vld [vmem:[#allocation2 + $0x1c4] ss:$8 sps:$4 sm:$0xff]  }
  0x2d   :  { %1270 = vmatpush1.bf16.msra.mxu0 %v3743_v24  ;;  %v3766_v47 = vld [vmem:[#allocation2 + $0x1c0] ss:$8 sps:$4 sm:$0xff]   ;;  %v3770_v48 = vld [vmem:[#allocation2 + $0x1b4] ss:$8 sps:$4 sm:$0xff]   ;;  %v3772_v49 = vld [vmem:[#allocation2 + $0x1b0] ss:$8 sps:$4 sm:$0xff]  }
  0x2e   :  { %999 = vmatpush1.bf16.msra.mxu1 %v3724_v18  ;;  %1271 = vmatprep.subr.bf16.mxu0 %v3751_v27  ;;  %v3775_v50 = vld [vmem:[#allocation2 + $0x4] ss:$8 sps:$4 sm:$0xff]   ;;  %v3773_v51 = vld [vmem:[#allocation2] ss:$8 sps:$4 sm:$0xff]   ;;  %v3781_v54 = vld [vmem:[#allocation2 + $0xf4] ss:$8 sps:$4 sm:$0xff]  }
  0x2f   :  { %1000 = vmatprep.subr.bf16.mxu1 %v3725_v21  ;;  %v3776_v52 = vld [vmem:[#allocation2 + $0x1a4] ss:$8 sps:$4 sm:$0xff]   ;;  %v3778_v53 = vld [vmem:[#allocation2 + $0x1a0] ss:$8 sps:$4 sm:$0xff]   ;;  %v3779_v55 = vld [vmem:[#allocation2 + $0xf0] ss:$8 sps:$4 sm:$0xff]  }
  0x30   :  { %v3782_v56 = vld [vmem:[#allocation2 + $0x194] ss:$8 sps:$4 sm:$0xff]   ;;  %v3784_v57 = vld [vmem:[#allocation2 + $0x190] ss:$8 sps:$4 sm:$0xff]   ;;  %v3787_v58 = vld [vmem:[#allocation2 + $0xe4] ss:$8 sps:$4 sm:$0xff]  }
  0x31   :  { %1272 = vmatpush1.bf16.msra.mxu0 %v3749_v29  ;;  %v3785_v59 = vld [vmem:[#allocation2 + $0xe0] ss:$8 sps:$4 sm:$0xff]   ;;  %v3788_v60 = vld [vmem:[#allocation2 + $0x184] ss:$8 sps:$4 sm:$0xff]   ;;  %v3793_v62 = vld [vmem:[#allocation2 + $0xd4] ss:$8 sps:$4 sm:$0xff]  }
  0x32   :  { %3667 = vmatmul.mubr.msk.bf16.gmra.mxu0 %vm159_vm1, %v3710_v12  ;;  %1001 = vmatpush1.bf16.msra.mxu1 %v3727_v23  ;;  %v3790_v61 = vld [vmem:[#allocation2 + $0x180] ss:$8 sps:$4 sm:$0xff]   ;;  %v3791_v63 = vld [vmem:[#allocation2 + $0xd0] ss:$8 sps:$4 sm:$0xff]   ;;  %v3799_v0 = vld [vmem:[#allocation2 + $0xc4] ss:$8 sps:$4 sm:$0xff]  }
  0x33   :  { %3670 = vmatprep.mubr.msk.bf16.mxu0 %vm159_vm1, %v3711_v17  ;;  %1002 = vmatprep.subr.bf16.mxu1 %v3728_v26  ;;  %v3796_v1 = vld [vmem:[#allocation2 + $0x274] ss:$8 sps:$4 sm:$0xff]   ;;  %v3797_v2 = vld [vmem:[#allocation2 + $0xc0] ss:$8 sps:$4 sm:$0xff]   ;;  %v3800_v4 = vld [vmem:[#allocation2 + $0xb0] ss:$8 sps:$4 sm:$0xff]  }
  0x34   :  { %1273 = vmatprep.subr.bf16.mxu0 %v3757_v31  ;;  %v3802_v3 = vld [vmem:[#allocation2 + $0xb4] ss:$8 sps:$4 sm:$0xff]   ;;  %v3808_v5 = vld [vmem:[#allocation2 + $0xa4] ss:$8 sps:$4 sm:$0xff]   ;;  %v3806_v6 = vld [vmem:[#allocation2 + $0xa0] ss:$8 sps:$4 sm:$0xff]  }
  0x35   :  { %1274 = vmatpush1.bf16.msra.mxu0 %v3755_v33  ;;  %v3811_v7 = vld [vmem:[#allocation2 + $0x94] ss:$8 sps:$4 sm:$0xff]   ;;  %v3809_v8 = vld [vmem:[#allocation2 + $0x90] ss:$8 sps:$4 sm:$0xff]   ;;  %v3817_v9 = vld [vmem:[#allocation2 + $0x84] ss:$8 sps:$4 sm:$0xff]  }
  0x36   :  { %1003 = vmatpush1.bf16.msra.mxu1 %v3730_v28  ;;  %1275 = vmatprep.subr.bf16.mxu0 %v3763_v35  ;;  %v3815_v10 = vld [vmem:[#allocation2 + $0x80] ss:$8 sps:$4 sm:$0xff]   ;;  %v4056_v12 = vshrl.u32 %v62_v11, 7  ;;  %v5859_v21 = vmov 0  ;;  %v5864_v28 = vmov 0 }
  0x37   :  { %1004 = vmatprep.subr.bf16.mxu1 %v3734_v30 }
  0x38   :  { %v71_v13 = vadd.s32 64, %v4056_v12  ;;  %v72_v14 = vadd.s32 72, %v4056_v12  ;;  %v73_v19 = vadd.s32 80, %v4056_v12  ;;  %v74_v20 = vadd.s32 88, %v4056_v12 }
  0x39   :  { %1276 = vmatpush1.bf16.msra.mxu0 %v3761_v37  ;;  %v75_v26 = vadd.s32 96, %v4056_v12  ;;  %v76_v27 = vadd.s32 104, %v4056_v12  ;;  %v64_v33 = vadd.s32 8, %v4056_v12  ;;  %v66_v35 = vadd.s32 24, %v4056_v12 }
  0x3a   :  { %3671 = vmatmul.mubr.msk.bf16.gmra.mxu0 %vm159_vm1, %v3712_v25  ;;  %1005 = vmatpush1.bf16.msra.mxu1 %v3736_v32  ;;  %v4060_v15 = vand.u32 7, %v71_v13  ;;  %v4062_v16 = vand.u32 7, %v72_v14  ;;  %v4072_v22 = vand.u32 7, %v73_v19  ;;  %v4074_v23 = vand.u32 7, %v74_v20 }
  0x3b   :  { %1006 = vmatprep.subr.bf16.mxu1 %v3740_v34  ;;  %1277 = vmatprep.subr.bf16.mxu0 %v3769_v39  ;;  %v4084_v29 = vand.u32 7, %v75_v26  ;;  %v4086_v30 = vand.u32 7, %v76_v27  ;;  %v65_v34 = vadd.s32 16, %v4056_v12  ;;  %v78_v37 = vadd.s32 120, %v4056_v12 }
  0x3c   :  { %v1419_v17 = vadd.s32 2, %v4060_v15  ;;  %v1420_v18 = vadd.s32 2, %v4062_v16  ;;  %5862 = vst [vmem:[#allocation12_spill] sm:$0xff] %v4072_v22  ;;  %5863 = vst [vmem:[#allocation13_spill] sm:$0xff] %v4074_v23  ;;  %v1421_v24 = vadd.s32 2, %v4072_v22  ;;  %v1422_v25 = vadd.s32 2, %v4074_v23 }
  0x3d   :  { %1278 = vmatpush1.bf16.msra.mxu0 %v3767_v41  ;;  %5867 = vst [vmem:[#allocation15_spill] sm:$0xff] %v4084_v29  ;;  %5868 = vst [vmem:[#allocation16_spill] sm:$0xff] %v4086_v30  ;;  %v1423_v31 = vadd.s32 2, %v4084_v29  ;;  %v1424_v32 = vadd.s32 2, %v4086_v30  ;;  %v4105_v41 = vand.u32 7, %v4056_v12  ;;  %vm5750_vm14 = vcmp.lt.s32.totalorder %v4056_v12, 6 }
  0x3e   :  { %1007 = vmatpush1.bf16.msra.mxu1 %v3742_v36  ;;  %1279 = vmatprep.subr.bf16.mxu0 %v3775_v50  ;;  %vm1451_vm2 = vcmp.lt.s32.totalorder %v1419_v17, 8  ;;  %vm1452_vm3 = vcmp.lt.s32.totalorder %v1420_v18, 8  ;;  %vm1453_vm5 = vcmp.lt.s32.totalorder %v1421_v24, 8  ;;  %vm1454_vm6 = vcmp.lt.s32.totalorder %v1422_v25, 8 }
  0x3f   :  { %1008 = vmatprep.subr.bf16.mxu1 %v3746_v38  ;;  %vm4068_vm4 = vmpackc.low %vm1452_vm3, %vm1451_vm2  ;;  %v77_v36 = vadd.s32 112, %v4056_v12  ;;  %vm1455_vm8 = vcmp.lt.s32.totalorder %v1423_v31, 8  ;;  %vm1456_vm9 = vcmp.lt.s32.totalorder %v1424_v32, 8  ;;  %v5869_v38 = vmov 0  ;;  %5872 = vst [vmem:[#allocation18_spill] sm:$0xff] %v4105_v41 }
  0x40   :  { %v5860_v21 = vsel %vm4068_vm4, 4294967295, %v5859_v21  ;;  %vm4080_vm7 = vmpackc.low %vm1454_vm6, %vm1453_vm5  ;;  %vm5781_vm15 = vcmp.lt.s32.totalorder %v4056_v12, 7 }
  0x41   :  { %1280 = vmatpush1.bf16.msra.mxu0 %v3773_v51  ;;  %5861 = vst [vmem:[#allocation11_spill] sm:$0xff] %v5860_v21  ;;  %v5865_v28 = vsel %vm4080_vm7, 4294967295, %v5864_v28  ;;  %vm4095_vm10 = vmpackc.low %vm1456_vm9, %vm1455_vm8 }
  0x42   :  { %1009 = vmatpush2.bf16.msra.mxu1 %v3748_v40  ;;  %1281 = vmatprep.subr.bf16.mxu0 %v3781_v54  ;;  %5866 = vst [vmem:[#allocation14_spill] sm:$0xff] %v5865_v28  ;;  %v5870_v38 = vsel %vm4095_vm10, 4294967295, %v5869_v38  ;;  %v4102_v40 = vld [vmem:[%s5742_s2] ss:$0 sm:$0xff] }
  0x43   :  { %1010 = vmatprep.subr.bf16.mxu1 %v3752_v42  ;;  %5871 = vst [vmem:[#allocation17_spill] sm:$0xff] %v5870_v38  ;;  %v4107_v42 = vand.u32 7, %v64_v33 }
  0x45   :  { %1282 = vmatpush2.bf16.msra.mxu0 %v3779_v55  ;;  %5873 = vst [vmem:[#allocation19_spill] sm:$0xff] %v4107_v42  ;;  %v681_v54 = vadd.s32 1, %v4107_v42 }
  0x46   :  { %1011 = vmatpush2.bf16.msra.mxu1 %v3754_v43  ;;  %1283 = vmatprep.subr.bf16.mxu0 %v3787_v58  ;;  %v4109_v43 = vand.u32 7, %v65_v34  ;;  %v5881_v34 = vmov 0 }
  0x47   :  { %1012 = vmatprep.subr.bf16.mxu1 %v3758_v44  ;;  %v4111_v44 = vand.u32 7, %v66_v35  ;;  %vm713_vm1 = vcmp.lt.s32.totalorder %v681_v54, 8 }
  0x48   :  { %5874 = vst [vmem:[#allocation20_spill] sm:$0xff] %v4109_v43 }
  0x49   :  { %1284 = vmatpush2.bf16.msra.mxu0 %v3785_v59  ;;  %5875 = vst [vmem:[#allocation21_spill] sm:$0xff] %v4111_v44  ;;  %v67_v59 = vadd.s32 32, %v4056_v12 }
  0x4a   :  { %1013 = vmatpush2.bf16.msra.mxu1 %v3760_v45  ;;  %1285 = vmatprep.subr.bf16.mxu0 %v3793_v62  ;;  %v4113_v45 = vand.u32 7, %v77_v36 }
  0x4b   :  { %1014 = vmatprep.subr.bf16.mxu1 %v3764_v46  ;;  %v4115_v46 = vand.u32 7, %v78_v37 }
  0x4c   :  { %v1425_v50 = vadd.s32 2, %v4113_v45 }
  0x4d   :  { %1286 = vmatpush2.bf16.msra.mxu0 %v3791_v63  ;;  %v1426_v51 = vadd.s32 2, %v4115_v46 }
  0x4e   :  { %1015 = vmatpush2.bf16.msra.mxu1 %v3766_v47  ;;  %1287 = vmatprep.subr.bf16.mxu0 %v3799_v0  ;;  %vm1457_vm11 = vcmp.lt.s32.totalorder %v1425_v50, 8  ;;  %v5876_v0 = vmov 0 }
  0x4f   :  { %1016 = vmatprep.subr.bf16.mxu1 %v3770_v48  ;;  %vm1458_vm12 = vcmp.lt.s32.totalorder %v1426_v51, 8 }
  0x50   :  { %vm4133_vm13 = vmpackc.low %vm1458_vm12, %vm1457_vm11 }
  0x51   :  { %1288 = vmatpush2.bf16.msra.mxu0 %v3797_v2  ;;  %v5877_v0 = vsel %vm4133_vm13, 4294967295, %v5876_v0 }
  0x52   :  { %1017 = vmatpush2.bf16.msra.mxu1 %v3772_v49  ;;  %1289 = vmatprep.subr.bf16.mxu0 %v3802_v3  ;;  %5878 = vst [vmem:[#allocation22_spill] sm:$0xff] %v5877_v0 }
  0x53   :  { %1018 = vmatprep.subr.bf16.mxu1 %v3776_v52 }
  0x55   :  { %1290 = vmatpush2.bf16.msra.mxu0 %v3800_v4 }
  0x56   :  { %1019 = vmatpush2.bf16.msra.mxu1 %v3778_v53  ;;  %1291 = vmatprep.subr.bf16.mxu0 %v3808_v5  ;;  %v680_v53 = vadd.s32 1, %v4105_v41  ;;  %v4143_v5 = vand.u32 7, %v67_v59  ;;  %v5886_v59 = vmov 0 }
  0x57   :  { %1020 = vmatprep.subr.bf16.mxu1 %v3782_v56  ;;  %v682_v56 = vadd.s32 1, %v4109_v43 }
  0x58   :  { %vm712_vm0 = vcmp.lt.s32.totalorder %v680_v53, 8  ;;  %5879 = vst [vmem:[#allocation23_spill] sm:$0xff] %v4143_v5  ;;  %v684_v35 = vadd.s32 1, %v4143_v5  ;;  %v3805_v53 = vld [vmem:[#allocation2 + $0x264] ss:$8 sps:$4 sm:$0xff]  }
  0x59   :  { %1292 = vmatpush2.bf16.msra.mxu0 %v3806_v6  ;;  %vm714_vm2 = vcmp.lt.s32.totalorder %v682_v56, 8  ;;  %vm4180_vm5 = vmpackc.low %vm713_vm1, %vm712_vm0 }
  0x5a   :  { %1021 = vmatpush2.bf16.msra.mxu1 %v3784_v57  ;;  %1293 = vmatprep.subr.bf16.mxu0 %v3811_v7  ;;  %v683_v57 = vadd.s32 1, %v4111_v44  ;;  %v69_v7 = vadd.s32 48, %v4056_v12  ;;  %v5882_v34 = vsel %vm4180_vm5, 4294967295, %v5881_v34  ;;  %vm716_vm8 = vcmp.lt.s32.totalorder %v684_v35, 8 }
  0x5b   :  { %1022 = vmatprep.subr.bf16.mxu1 %v3788_v60  ;;  %v68_v60 = vadd.s32 40, %v4056_v12  ;;  %5883 = vst [vmem:[#allocation25_spill] sm:$0xff] %v5882_v34 }
  0x5c   :  { %vm715_vm3 = vcmp.lt.s32.totalorder %v683_v57, 8  ;;  %v4185_v36 = vand.u32 7, %v69_v7  ;;  %v3803_v7 = vld [vmem:[#allocation2 + $0x260] ss:$8 sps:$4 sm:$0xff]  }
  0x5d   :  { %1294 = vmatpush2.bf16.msra.mxu0 %v3809_v8  ;;  %v4145_v6 = vand.u32 7, %v68_v60  ;;  %v70_v8 = vadd.s32 56, %v4056_v12  ;;  %vm4205_vm6 = vmpackc.low %vm715_vm3, %vm714_vm2  ;;  %vm5784_vm3 = vcmp.lt.s32.totalorder %v4056_v12, 2 }
  0x5e   :  { %1023 = vmatpush2.bf16.msra.mxu1 %v3790_v61  ;;  %1295 = vmatprep.subr.bf16.mxu0 %v3817_v9  ;;  %5884 = vst [vmem:[#allocation26_spill] sm:$0xff] %v4185_v36  ;;  %v5887_v59 = vsel %vm4205_vm6, 4294967295, %v5886_v59 }
  0x5f   :  { %1627 = vmatprep.subr.bf16.mxu1 %v3796_v1  ;;  %5880 = vst [vmem:[#allocation24_spill] sm:$0xff] %v4145_v6  ;;  %5888 = vst [vmem:[#allocation28_spill] sm:$0xff] %v5887_v59  ;;  %v685_v60 = vadd.s32 1, %v4145_v6 }
  0x61   :  { %1296 = vmatpush2.bf16.msra.mxu0 %v3815_v10  ;;  %vm717_vm9 = vcmp.lt.s32.totalorder %v685_v60, 8  ;;  %v4280_v60 = vadd.s32 1, %v4062_v16 }
  0x62   :  { %vm4263_vm0 = vmpackc.low %vm717_vm9, %vm716_vm8  ;;  %vm5785_vm8 = vcmp.lt.s32.totalorder %v4056_v12, 1 }
  0xe2   :  { %v3660_v39 = vpop.f32.mrf.mxu0 }
  0xe3   :  { %v231_v48 = vadd.f32 %v3660_v39, %v4102_v40 }
  0xe4   :  { %v222_v47 = vpop.f32.mrf.mxu0 }
  0xe5   :  { %v223_v49 = vadd.f32 %v4102_v40, %v222_v47  ;;  %v4128_v61 = vmax.f32 %v231_v48, 0.0  ;;  %v3794_v47 = vld [vmem:[#allocation2 + $0x270] ss:$8 sps:$4 sm:$0xff]  }
  0xe6   :  { %v3661_v52 = vpop.f32.mrf.mxu0 }
  0xe7   :  { %v234_v55 = vadd.f32 %v3661_v52, %v4102_v40  ;;  %v4130_v62 = vmax.f32 %v223_v49, 0.0  ;;  %v5753_v9 = vrot.slane %v4128_v61, 2  ;;  %v649_v20 = vrot.slane %v4128_v61, 1 }
  0xe8   :  { %v225_v58 = vpop.f32.mrf.mxu0  ;;  %v4189_v49 = vand.u32 7, %v70_v8  ;;  %v456_v21 = vrot.slane %v4128_v61, 7 }
  0xe9   :  { %v226_v63 = vadd.f32 %v4102_v40, %v225_v58  ;;  %v4139_v2 = vmax.f32 %v234_v55, 0.0  ;;  %v5752_v10 = vrot.slane %v4130_v62, 2  ;;  %v5751_v18 = vrot.slane %v4130_v62, 1 }
  0xea   :  { %v3664_v1 = vpop.f32.mrf.mxu0  ;;  %5885 = vst [vmem:[#allocation27_spill] sm:$0xff] %v4189_v49  ;;  %v4216_v56 = vadd.s32 1, %v4189_v49  ;;  %v4310_v59 = vadd.s32 4294967295, %v4189_v49  ;;  %v4318_v38 = vadd.s32 4294967294, %v4189_v49 }
  0xeb   :  { %v4141_v3 = vmax.f32 %v226_v63, 0.0  ;;  %v247_v14 = vadd.f32 %v3664_v1, %v4102_v40  ;;  %v650_v27 = vrot.slane %v4139_v2, 1 }
  0xec   :  { %v238_v4 = vpop.f32.mrf.mxu0  ;;  %vm719_vm12 = vcmp.lt.s32.totalorder %v4216_v56, 8 }
  0xed   :  { %v1379_v11 = vrot.slane %v4141_v3, 2  ;;  %v239_v13 = vadd.f32 %v4102_v40, %v238_v4  ;;  %v648_v19 = vrot.slane %v4141_v3, 1  ;;  %v4191_v50 = vmax.f32 %v247_v14, 0.0 }
  0xee   :  { %v3665_v17 = vpop.f32.mrf.mxu0  ;;  %v639_v52 = vpack.c.bf16 %v4141_v3, %v4130_v62  ;;  %v676_v58 = vsel %vm5781_vm15, %v649_v20, %v650_v27 }
  0xef   :  { %v4161_v24 = vsel %vm5750_vm14, %v1379_v11, %v5753_v9  ;;  %v4167_v25 = vsel %vm5750_vm14, %v5752_v10, %v1379_v11  ;;  %v4169_v26 = vmax.f32 %v239_v13, 0.0  ;;  %v677_v32 = vsel %vm5781_vm15, %v648_v19, %v649_v20 }
  0xf0   :  { %v241_v31 = vpop.f32.mrf.mxu0  ;;  %v678_v33 = vsel %vm5781_vm15, %v5751_v18, %v648_v19  ;;  %v4213_v11 = vadd.s32 1, %v4185_v36  ;;  %v250_v57 = vadd.f32 %v3665_v17, %v4102_v40  ;;  %v5754_v14 = vrot.slane %v4191_v50, 1  ;;  %v3814_v19 = vld [vmem:[#allocation2 + $0x254] ss:$8 sps:$4 sm:$0xff]  }
  0xf1   :  { %v242_v37 = vadd.f32 %v4102_v40, %v241_v31  ;;  %v3149_v39 = vpack.c.bf16 %v677_v32, %v678_v33  ;;  %v651_v48 = vrot.slane %v4169_v26, 1  ;;  %v4225_v20 = vadd.s32 4294967295, %v4105_v41 }
  0xf2   :  { %v3668_v51 = vpop.f32.mrf.mxu0  ;;  %v4231_v31 = vadd.s32 4294967294, %v4105_v41  ;;  %v4234_v17 = vadd.s32 4294967294, %v4107_v42  ;;  %v4237_v32 = vadd.s32 4294967295, %v4109_v43  ;;  %vm718_vm11 = vcmp.lt.s32.totalorder %v4213_v11, 8 }
  0xf3   :  { %v4195_v54 = vmax.f32 %v242_v37, 0.0  ;;  %3150 = vmatprep.mubr.msk.bf16.mxu1 %vm4180_vm5, %v3149_v39  ;;  %v675_v55 = vsel %vm5781_vm15, %v650_v27, %v651_v48  ;;  %v4228_v27 = vadd.s32 4294967295, %v4107_v42  ;;  %vm503_vm1 = vcmp.ge.s32.totalorder %v4225_v20, 0  ;;  %vm4357_vm2 = vmpackc.low %vm719_vm12, %vm718_vm11 }
  0xf4   :  { %1025 = vmatmul.mubr.bf16.vlgmr.msra.gmra.mxu1 %v639_v52  ;;  %v254_v63 = vpop.f32.mrf.mxu0  ;;  %v3152_v1 = vpack.c.bf16 %v675_v55, %v676_v58  ;;  %v4248_v52 = vadd.s32 4294967295, %v4111_v44  ;;  %v4253_v55 = vadd.s32 4294967294, %v4109_v43  ;;  %v4255_v58 = vmax.f32 %v250_v57, 0.0 }
  0xf5   :  { %1628 = vmatpush1.bf16.msra.mxu1 %v3794_v47  ;;  %v255_v4 = vadd.f32 %v4102_v40, %v254_v63  ;;  %v652_v8 = vrot.slane %v4195_v54, 1  ;;  %vm351_vm14 = vcmp.ge.s32.totalorder %v4234_v17, 0  ;;  %v4283_v57 = vadd.s32 4294967295, %v4143_v5 }
  0xf6   :  { %v4219_v13 = vpop.f32.mrf.mxu0  ;;  %3153 = vmatprep.mubr.msk.bf16.mxu1 %vm4205_vm6, %v3152_v1  ;;  %1629 = vmatprep.subr.bf16.mxu1 %v3805_v53  ;;  %v3812_v53 = vld [vmem:[#allocation2 + $0x250] ss:$8 sps:$4 sm:$0xff]   ;;  %v640_v1 = vpack.c.bf16 %v4139_v2, %v4128_v61  ;;  %v263_v18 = vadd.f32 %v3668_v51, %v4102_v40  ;;  %v4296_v9 = vadd.s32 4294967294, %v4145_v6  ;;  %v4301_v51 = vadd.s32 1, %v4072_v22 }
  0xf7   :  { %v4239_v33 = vmax.f32 %v255_v4, 0.0  ;;  %v673_v39 = vsel %vm5781_vm15, %v652_v8, %v5754_v14  ;;  %v674_v47 = vsel %vm5781_vm15, %v651_v48, %v652_v8  ;;  %v5889_v48 = vmov 0  ;;  %v3820_v4 = vld [vmem:[#allocation2 + $0x244] ss:$8 sps:$4 sm:$0xff]   ;;  %v3818_v14 = vld [vmem:[#allocation2 + $0x240] ss:$8 sps:$4 sm:$0xff]  }
  0xf8   :  { %v257_v37 = vpop.f32.mrf.mxu0  ;;  %v5890_v48 = vsel %vm4263_vm0, 4294967295, %v5889_v48  ;;  %v4273_v8 = vadd.s32 4294967294, %v4111_v44  ;;  %v3155_v35 = vpack.c.bf16 %v673_v39, %v674_v47  ;;  %v4293_v47 = vadd.s32 4294967294, %v4143_v5 }
  0xf9   :  { %1630 = vmatpush1.bf16.msra.mxu1 %v3803_v7  ;;  %5891 = vst [vmem:[#allocation29_spill] sm:$0xff] %v5890_v48  ;;  %v4270_v7 = vadd.s32 1, %v4060_v15  ;;  %v4307_v39 = vadd.s32 4294967295, %v4185_v36  ;;  %v258_v34 = vadd.f32 %v4102_v40, %v257_v37  ;;  %v654_v48 = vrot.slane %v4255_v58, 1 }
  0xfa   :  { %v4257_v63 = vpop.f32.mrf.mxu0  ;;  %1631 = vmatprep.subr.bf16.mxu1 %v3814_v19  ;;  %v4286_v19 = vadd.s32 4294967295, %v4145_v6  ;;  %v4325_v37 = vadd.s32 1, %v4084_v29  ;;  %v4331_v6 = vmax.f32 %v263_v18, 0.0  ;;  %v5892_v49 = vrot.slane %v4239_v33, 1 }
  0xfb   :  { %v455_v5 = vrot.slane %v4141_v3, 7  ;;  %v301_v44 = vrot.slane %v4130_v62, 6  ;;  %v454_v42 = vrot.slane %v4130_v62, 7  ;;  %v266_v18 = vadd.f32 %v4219_v13, %v4102_v40  ;;  %v3826_v13 = vld [vmem:[#allocation2 + $0x224] ss:$8 sps:$4 sm:$0xff]  }
  0xfc   :  { %1035 = vmatmul.mubr.bf16.gmra.mxu1 %v640_v1  ;;  %v270_v10 = vpop.f32.mrf.mxu0  ;;  %v4304_v1 = vadd.s32 1, %v4074_v23  ;;  %v4345_v29 = vmax.f32 %v258_v34, 0.0  ;;  %vm5901_vm12 = vcmp.ge.s32.totalorder %v4231_v31, 0  ;;  %v5907_v17 = vmov 0 }
  0xfd   :  { %3156 = vmatprep.mubr.msk.bf16.mxu1 %vm4263_vm0, %v3155_v35  ;;  %1632 = vmatpush1.bf16.msra.mxu1 %v3812_v53  ;;  %v3823_v53 = vld [vmem:[#allocation2 + $0x234] ss:$8 sps:$4 sm:$0xff]   ;;  %v4315_v35 = vadd.s32 4294967294, %v4185_v36  ;;  %v302_v36 = vrot.slane %v4141_v3, 6  ;;  %v5893_v3 = vrot.slane %v4191_v50, 1  ;;  %v271_v34 = vadd.f32 %v4102_v40, %v270_v10  ;;  %vm4399_vm9 = vmpackc.low %vm351_vm14, %vm5901_vm12 }
  0xfe   :  { %v3673_v0 = vpop.f32.mrf.mxu0  ;;  %1633 = vmatprep.subr.bf16.mxu1 %v3820_v4  ;;  %v4328_v4 = vadd.s32 1, %v4086_v30  ;;  %v3821_v30 = vld [vmem:[#allocation2 + $0x230] ss:$8 sps:$4 sm:$0xff]   ;;  %v485_v56 = vsel %vm5785_vm8, %v454_v42, %v455_v5  ;;  %v657_v10 = vrot.slane %v4331_v6, 1  ;;  %vm5905_vm14 = vcmp.ge.s32.totalorder %v4237_v32, 0 }
  0xff   :  { %v282_v28 = vadd.f32 %v3673_v0, %v4102_v40  ;;  %v671_v0 = vsel %vm5781_vm15, %v654_v48, %v5892_v49  ;;  %v641_v49 = vpack.c.bf16 %v4195_v54, %v4169_v26  ;;  %v332_v11 = vsel %vm5784_vm3, %v301_v44, %v302_v36 }
 0x100   :  { %v5911_v32 = vrot.slane %v4239_v33, 1 }
 0x101   :  { %v4339_v43 = vmax.f32 %v282_v28, 0.0  ;;  %1634 = vmatpush1.bf16.msra.mxu1 %v3818_v14  ;;  %v672_v28 = vsel %vm5781_vm15, %v5893_v3, %v654_v48  ;;  %v5894_v14 = vmov 0  ;;  %v656_v48 = vrot.slane %v4345_v29, 1 }
 0x102   :  { %v5895_v14 = vsel %vm4357_vm2, 4294967295, %v5894_v14  ;;  %1635 = vmatprep.subr.bf16.mxu1 %v3823_v53  ;;  %v3158_v23 = vpack.c.bf16 %v671_v0, %v672_v28  ;;  %vm5897_vm15 = vcmp.ge.s32.totalorder %v4228_v27, 0  ;;  %v484_v3 = vsel %vm5785_vm8, %v455_v5, %v456_v21  ;;  %v3829_v5 = vld [vmem:[#allocation2 + $0x214] ss:$8 sps:$4 sm:$0xff]  }
 0x103   :  { %5896 = vst [vmem:[#allocation30_spill] sm:$0xff] %v5895_v14  ;;  %v5782_v41 = vrot.slane %v4339_v43, 6  ;;  %v5783_v22 = vrot.slane %v4339_v43, 7  ;;  %vm4388_vm11 = vmpackc.low %vm5897_vm15, %vm503_vm1  ;;  %v303_v27 = vrot.slane %v4128_v61, 6  ;;  %vm5906_vm15 = vcmp.ge.s32.totalorder %v4248_v52, 0 }
 0x104   :  { %1045 = vmatmul.mubr.bf16.gmra.mxu1 %v641_v49  ;;  %v5898_v49 = vmov 0  ;;  %vm4417_vm1 = vmpackc.low %vm5906_vm15, %vm5905_vm14  ;;  %vm5913_vm15 = vcmp.lt.s32.totalorder %v4056_v12, 2 }
 0x105   :  { %v333_v53 = vsel %vm5784_vm3, %v5782_v41, %v301_v44  ;;  %3159 = vmatprep.mubr.msk.bf16.mxu1 %vm4357_vm2, %v3158_v23  ;;  %v486_v0 = vsel %vm5785_vm8, %v5783_v22, %v454_v42  ;;  %v5899_v49 = vsel %vm4388_vm11, 4294967295, %v5898_v49  ;;  %v304_v44 = vrot.slane %v4139_v2, 6  ;;  %1636 = vmatpush1.bf16.msra.mxu1 %v3821_v30  ;;  %v3824_v23 = vld [vmem:[#allocation2 + $0x220] ss:$8 sps:$4 sm:$0xff]   ;;  %vm5914_vm3 = vmmov %vm5913_vm15 }
 0x106   :  { %5900 = vst [vmem:[#allocation31_spill] sm:$0xff] %v5899_v49  ;;  %v3205_v28 = vpack.c.bf16 %v485_v56, %v486_v0  ;;  %v3208_v20 = vpack.c.bf16 %v332_v11, %v333_v53  ;;  %v5786_v41 = vrot.slane %v4195_v54, 7  ;;  %1637 = vmatprep.subr.bf16.mxu1 %v3826_v13  ;;  %v4405_v22 = vmax.f32 %v266_v18, 0.0 }
 0x107   :  { %v4407_v30 = vmax.f32 %v271_v34, 0.0  ;;  %v5904_v56 = vrot.slane %v4139_v2, 7  ;;  %v5908_v17 = vsel %vm4417_vm1, 4294967295, %v5907_v17  ;;  %v1381_v18 = vrot.slane %v4139_v2, 2 }
 0x108   :  { %5909 = vst [vmem:[#allocation32_spill] sm:$0xff] %v5908_v17  ;;  %3206 = vmatprep.mubr.msk.bf16.mxu0 %vm4388_vm11, %v3205_v28  ;;  %v458_v34 = vrot.slane %v4169_v26, 7  ;;  %v279_v11 = vadd.f32 %v4257_v63, %v4102_v40  ;;  %v330_v53 = vsel %vm5913_vm15, %v303_v27, %v304_v44  ;;  %v331_v0 = vsel %vm5914_vm3, %v302_v36, %v303_v27  ;;  %v3827_v28 = vld [vmem:[#allocation2 + $0x210] ss:$8 sps:$4 sm:$0xff]  }
 0x109   :  { %v483_v31 = vsel %vm5785_vm8, %v456_v21, %v5904_v56  ;;  %vm5910_vm8 = vcmp.lt.s32.totalorder %v4056_v12, 7  ;;  %3209 = vmatmul.mubr.msk.bf16.vlgmr.msra.gmra.mxu0 %vm4399_vm9, %v3208_v20  ;;  %1638 = vmatpush1.bf16.msra.mxu1 %v3824_v23  ;;  %v273_v56 = vpop.f32.mrf.mxu0  ;;  %v642_v63 = vpack.c.bf16 %v4255_v58, %v4191_v50  ;;  %vm5916_vm9 = vcmp.lt.s32.totalorder %v4280_v60, 8  ;;  %v3832_v20 = vld [vmem:[#allocation2 + $0x204] ss:$8 sps:$4 sm:$0xff]  }
 0x10a   :  { %v3211_v13 = vpack.c.bf16 %v483_v31, %v484_v3  ;;  %v669_v21 = vsel %vm5910_vm8, %v656_v48, %v657_v10  ;;  %vm5912_vm14 = vmmov %vm5910_vm8  ;;  %v306_v3 = vrot.slane %v4195_v54, 6  ;;  %vm5915_vm8 = vcmp.lt.s32.totalorder %v4270_v7, 8  ;;  %1639 = vmatprep.subr.bf16.mxu1 %v3829_v5 }
 0x10b   :  { %v670_v52 = vsel %vm5912_vm14, %v5911_v32, %v656_v48  ;;  %vm4452_vm14 = vmpackc.low %vm5916_vm9, %vm5915_vm8  ;;  %v5917_v48 = vmov 0  ;;  %vm5920_vm3 = vcmp.lt.s32.totalorder %v4056_v12, 1  ;;  %v305_v23 = vrot.slane %v4169_v26, 6  ;;  %v3830_v32 = vld [vmem:[#allocation2 + $0x200] ss:$8 sps:$4 sm:$0xff]  }
 0x10c   :  { %3212 = vmatprep.mubr.msk.bf16.mxu0 %vm4417_vm1, %v3211_v13  ;;  %v5918_v48 = vsel %vm4452_vm14, 4294967295, %v5917_v48  ;;  %v481_v36 = vsel %vm5920_vm3, %v458_v34, %v5786_v41  ;;  %v460_v42 = vrot.slane %v4191_v50, 7  ;;  %v3161_v27 = vpack.c.bf16 %v669_v21, %v670_v52  ;;  %1055 = vmatmul.mubr.bf16.gmra.mxu1 %v642_v63  ;;  %vm5922_vm9 = vmmov %vm5913_vm15 }
 0x10d   :  { %5919 = vst [vmem:[#allocation33_spill] sm:$0xff] %v5918_v48  ;;  %v658_v7 = vrot.slane %v4405_v22, 1  ;;  %v659_v60 = vrot.slane %v4407_v30, 1  ;;  %v461_v31 = vrot.slane %v4255_v58, 7  ;;  %v3214_v13 = vpack.c.bf16 %v330_v53, %v331_v0  ;;  %1640 = vmatpush1.bf16.msra.mxu1 %v3827_v28  ;;  %vm5927_vm1 = vmmov %vm5922_vm9 }
 0x10e   :  { %v4470_v5 = vadd.s32 4294967295, %v4060_v15  ;;  %v4473_v21 = vadd.s32 4294967295, %v4062_v16  ;;  %v4477_v52 = vmax.f32 %v279_v11, 0.0  ;;  %v274_v41 = vadd.f32 %v4102_v40, %v273_v56  ;;  %3162 = vmatprep.mubr.msk.bf16.mxu1 %vm4452_vm14, %v3161_v27  ;;  %1641 = vmatprep.subr.bf16.mxu1 %v3832_v20 }
 0x10f   :  { %v5921_v53 = vrot.slane %v4139_v2, 7  ;;  %v4490_v63 = vsel %vm5922_vm9, %v305_v23, %v306_v3  ;;  %vm5923_vm8 = vcmp.ge.s32.totalorder %v4253_v55, 0  ;;  %vm5924_vm15 = vcmp.ge.s32.totalorder %v4273_v8, 0 }
 0x110   :  { %vm4496_vm12 = vmpackc.low %vm5924_vm15, %vm5923_vm8  ;;  %v1382_v11 = vrot.slane %v4169_v26, 2  ;;  %v5928_v56 = vrot.slane %v4128_v61, 2  ;;  %vm5929_vm9 = vcmp.lt.s32.totalorder %v4056_v12, 6  ;;  %vm5931_vm15 = vcmp.ge.s32.totalorder %v4286_v19, 0 }
 0x111   :  { %v482_v0 = vsel %vm5920_vm3, %v5921_v53, %v458_v34  ;;  %v329_v34 = vsel %vm5927_vm1, %v304_v44, %v305_v23  ;;  %vm5930_vm3 = vcmp.ge.s32.totalorder %v4283_v57, 0  ;;  %v5932_v55 = vmov 0  ;;  %3215 = vmatmul.mubr.msk.bf16.gmra.mxu0 %vm4496_vm12, %v3214_v13  ;;  %1642 = vmatpush1.bf16.msra.mxu1 %v3830_v32 }
 0x112   :  { %v3217_v2 = vpack.c.bf16 %v481_v36, %v482_v0  ;;  %v4507_v28 = vsel %vm5929_vm9, %v5928_v56, %v1381_v18  ;;  %vm4513_vm8 = vmpackc.low %vm5931_vm15, %vm5930_vm3  ;;  %v643_v8 = vpack.c.bf16 %v4345_v29, %v4239_v33  ;;  %vm5935_vm1 = vcmp.lt.s32.totalorder %v4056_v12, 7 }
 0x113   :  { %v5933_v55 = vsel %vm4513_vm8, 4294967295, %v5932_v55  ;;  %v667_v61 = vsel %vm5935_vm1, %v658_v7, %v659_v60  ;;  %vm5936_vm9 = vmmov %vm5935_vm1  ;;  %vm5937_vm3 = vcmp.lt.s32.totalorder %v4056_v12, 1  ;;  %v3220_v19 = vpack.c.bf16 %v4490_v63, %v329_v34 }
 0x114   :  { %5934 = vst [vmem:[#allocation34_spill] sm:$0xff] %v5933_v55  ;;  %v668_v26 = vsel %vm5936_vm9, %v657_v10, %v658_v7  ;;  %v479_v57 = vsel %vm5937_vm3, %v460_v42, %v461_v31  ;;  %v5938_v44 = vrot.slane %v4195_v54, 7  ;;  %vm5939_vm1 = vmmov %vm5937_vm3  ;;  %v644_v23 = vpack.c.bf16 %v4405_v22, %v4331_v6  ;;  %3218 = vmatprep.mubr.msk.bf16.mxu0 %vm4513_vm8, %v3217_v2 }
 0x115   :  { %vm5940_vm9 = vcmp.lt.s32.totalorder %v4056_v12, 6  ;;  %v4544_v20 = vmax.f32 %v274_v41, 0.0  ;;  %v661_v27 = vrot.slane %v4477_v52, 1  ;;  %vm5941_vm3 = vcmp.lt.s32.totalorder %v4301_v51, 8  ;;  %1065 = vmatmul.mubr.bf16.gmra.mxu1 %v643_v8 }
 0x116   :  { %v480_v36 = vsel %vm5939_vm1, %v5938_v44, %v460_v42  ;;  %v4542_v10 = vsel %vm5940_vm9, %v1381_v18, %v1382_v11  ;;  %v1383_v42 = vrot.slane %v4195_v54, 2  ;;  %vm5942_vm1 = vcmp.lt.s32.totalorder %v4304_v1, 8 }
 0x117   :  { %v3272_v7 = vpack.c.bf16 %v4542_v10, %v4507_v28  ;;  %vm4558_vm9 = vmpackc.low %vm5942_vm1, %vm5941_vm3  ;;  %v5943_v41 = vmov 0  ;;  %v3164_v18 = vpack.c.bf16 %v667_v61, %v668_v26  ;;  %v1384_v13 = vrot.slane %v4191_v50, 2  ;;  %v6024_v28 = vld [vmem:[#allocation27_spill] sm:$0xff] }
 0x118   :  { %v5944_v41 = vsel %vm4558_vm9, 4294967295, %v5943_v41  ;;  %v1385_v32 = vrot.slane %v4255_v58, 2  ;;  %v1386_v53 = vrot.slane %v4239_v33, 2  ;;  %v660_v0 = vrot.slane %v4544_v20, 1 }
 0x119   :  { %5945 = vst [vmem:[#allocation35_spill] sm:$0xff] %v5944_v41  ;;  %vm5946_vm15 = vcmp.lt.s32.totalorder %v4056_v12, 6  ;;  %v1387_v1 = vrot.slane %v4345_v29, 2  ;;  %v1388_v63 = vrot.slane %v4331_v6, 2  ;;  %3165 = vmatprep.mubr.msk.bf16.mxu1 %vm4558_vm9, %v3164_v18  ;;  %v1418_v10 = vadd.s32 2, %v6024_v28 }
 0x11a   :  { %v4570_v51 = vsel %vm5946_vm15, %v1382_v11, %v1383_v42  ;;  %vm5947_vm3 = vmmov %vm5946_vm15  ;;  %v1389_v11 = vrot.slane %v4405_v22, 2 }
 0x11b   :  { %v4576_v40 = vsel %vm5947_vm3, %v1383_v42, %v1384_v13  ;;  %vm5948_vm1 = vmmov %vm5947_vm3  ;;  %v1390_v42 = vrot.slane %v4407_v30, 2 }
 0x11c   :  { %v4580_v2 = vsel %vm5948_vm1, %v1385_v32, %v1386_v53  ;;  %vm5949_vm12 = vmmov %vm5948_vm1  ;;  %v3275_v56 = vpack.c.bf16 %v4576_v40, %v4570_v51 }
 0x11d   :  { %v4584_v34 = vsel %vm5949_vm12, %v1384_v13, %v1385_v32  ;;  %vm5950_vm15 = vmmov %vm5948_vm1  ;;  %vm5952_vm12 = vcmp.ge.s32.totalorder %v4293_v47, 0  ;;  %v1391_v13 = vrot.slane %v4544_v20, 2  ;;  %v5957_v47 = vmov 0  ;;  %1075 = vmatmul.mubr.bf16.gmra.mxu1 %v644_v23  ;;  %v5979_v23 = vld [vmem:[#allocation13_spill] sm:$0xff] }
 0x11e   :  { %v4595_v61 = vsel %vm5950_vm15, %v1387_v1, %v1388_v63  ;;  %vm5951_vm3 = vmmov %vm5948_vm1  ;;  %vm5953_vm1 = vcmp.ge.s32.totalorder %v4296_v9, 0  ;;  %vm5955_vm15 = vcmp.ge.s32.totalorder %v4307_v39, 0  ;;  %v3223_v9 = vpack.c.bf16 %v479_v57, %v480_v36 }
 0x11f   :  { %v4599_v26 = vsel %vm5951_vm3, %v1386_v53, %v1387_v1  ;;  %vm3219_vm11 = vmpackc.low %vm5953_vm1, %vm5952_vm12  ;;  %v463_v32 = vrot.slane %v4345_v29, 7  ;;  %v1392_v53 = vrot.slane %v4477_v52, 2  ;;  %v1393_v1 = vrot.slane %v4339_v43, 2 }
 0x120   :  { %vm5954_vm8 = vmmov %vm5951_vm3  ;;  %vm5956_vm3 = vcmp.ge.s32.totalorder %v4310_v59, 0  ;;  %vm5962_vm1 = vcmp.lt.s32.totalorder %v4056_v12, 6  ;;  %3221 = vmatmul.mubr.msk.bf16.gmra.mxu0 %vm3219_vm11, %v3220_v19  ;;  %vm5968_vm11 = vcmp.lt.s32.totalorder %v4325_v37, 8  ;;  %v5970_v19 = vmov 0 }
 0x121   :  { %v4610_v18 = vsel %vm5954_vm8, %v1388_v63, %v1389_v11  ;;  %vm4617_vm9 = vmpackc.low %vm5956_vm3, %vm5955_vm15  ;;  %vm5960_vm8 = vcmp.lt.s32.totalorder %v4056_v12, 7  ;;  %v4634_v39 = vsel %vm5962_vm1, %v1389_v11, %v1390_v42  ;;  %v307_v11 = vrot.slane %v4191_v50, 6 }
 0x122   :  { %v5958_v47 = vsel %vm4617_vm9, 4294967295, %v5957_v47  ;;  %v665_v63 = vsel %vm5960_vm8, %v660_v0, %v661_v27  ;;  %vm5961_vm12 = vmmov %vm5960_vm8  ;;  %v3284_v36 = vpack.c.bf16 %v4634_v39, %v4610_v18  ;;  %3224 = vmatprep.mubr.msk.bf16.mxu0 %vm4617_vm9, %v3223_v9  ;;  %v462_v9 = vrot.slane %v4239_v33, 7  ;;  %v3841_v18 = vld [vmem:[#allocation5 + $0x158] sm:$0xff]  }
 0x123   :  { %5959 = vst [vmem:[#allocation36_spill] sm:$0xff] %v5958_v47  ;;  %v666_v59 = vsel %vm5961_vm12, %v659_v60, %v660_v0  ;;  %vm5963_vm15 = vmmov %vm5962_vm1  ;;  %v5966_v60 = vrot.slane %v4130_v62, 2  ;;  %v694_v37 = vadd.s32 1, %v4113_v45  ;;  %vm5976_vm9 = vcmp.ge.s32.totalorder %v4315_v35, 0  ;;  %v3842_v39 = vld [vmem:[#allocation5 + $0x118] sm:$0xff]  }
 0x124   :  { %v4638_v57 = vsel %vm5963_vm15, %v1390_v42, %v1391_v13  ;;  %vm5964_vm3 = vmmov %vm5962_vm1  ;;  %v308_v42 = vrot.slane %v4255_v58, 6  ;;  %v5984_v35 = vrot.slane %v4130_v62, 1  ;;  %v309_v62 = vrot.slane %v4239_v33, 6 }
 0x125   :  { %v4644_v44 = vsel %vm5964_vm3, %v1391_v13, %v1392_v53  ;;  %vm5965_vm8 = vmmov %vm5962_vm1  ;;  %vm5973_vm3 = vcmp.lt.s32.totalorder %v4056_v12, 2  ;;  %v5980_v13 = vmov 0  ;;  %v6026_v51 = vpack.c.bf16 %v4595_v61, %v4599_v26  ;;  %v3840_v61 = vld [vmem:[#allocation5 + $0x120] sm:$0xff]  }
 0x126   :  { %v4648_v8 = vsel %vm5965_vm8, %v1392_v53, %v1393_v1  ;;  %vm5967_vm12 = vmmov %vm5962_vm1  ;;  %vm5969_vm1 = vcmp.lt.s32.totalorder %v4328_v4, 8  ;;  %v695_v4 = vadd.s32 1, %v4115_v46  ;;  %v327_v50 = vsel %vm5973_vm3, %v306_v3, %v307_v11 }
 0x127   :  { %v4654_v0 = vsel %vm5967_vm12, %v1393_v1, %v5966_v60  ;;  %vm4662_vm15 = vmpackc.low %vm5969_vm1, %vm5968_vm11  ;;  %v3167_v1 = vpack.c.bf16 %v665_v63, %v666_v59  ;;  %vm511_vm8 = vcmp.ge.s32.totalorder %v4470_v5, 0  ;;  %vm512_vm12 = vcmp.ge.s32.totalorder %v4473_v21, 0  ;;  %v5978_v5 = vld [vmem:[#allocation12_spill] sm:$0xff] }
 0x128   :  { %v5971_v19 = vsel %vm4662_vm15, 4294967295, %v5970_v19  ;;  %v662_v60 = vrot.slane %v4339_v43, 1  ;;  %vm5974_vm11 = vcmp.lt.s32.totalorder %v4056_v12, 1  ;;  %v342_v59 = vadd.s32 4294967294, %v4060_v15  ;;  %vm5975_vm1 = vmmov %vm5973_vm3 }
 0x129   :  { %5972 = vst [vmem:[#allocation37_spill] sm:$0xff] %v5971_v19  ;;  %3168 = vmatprep.mubr.msk.bf16.mxu1 %vm4662_vm15, %v3167_v1  ;;  %v477_v63 = vsel %vm5974_vm11, %v462_v9, %v463_v32  ;;  %v326_v54 = vsel %vm5975_vm1, %v307_v11, %v308_v42  ;;  %vm5977_vm3 = vcmp.ge.s32.totalorder %v4318_v38, 0  ;;  %v343_v3 = vadd.s32 4294967294, %v4062_v16  ;;  %vm4700_vm15 = vmpackc.low %vm512_vm12, %vm511_vm8 }
 0x12a   :  { %vm3225_vm14 = vmpackc.low %vm5977_vm3, %vm5976_vm9  ;;  %v497_v21 = vadd.s32 4294967295, %v5978_v5  ;;  %v498_v53 = vadd.s32 4294967295, %v5979_v23  ;;  %v3226_v1 = vpack.c.bf16 %v326_v54, %v327_v50  ;;  %v478_v15 = vsel %vm5974_vm11, %v461_v31, %v462_v9 }
 0x12b   :  { %v5981_v13 = vsel %vm4700_vm15, 4294967295, %v5980_v13  ;;  %vm726_vm1 = vcmp.lt.s32.totalorder %v694_v37, 8  ;;  %vm727_vm2 = vcmp.lt.s32.totalorder %v695_v4, 8  ;;  %v3229_v38 = vpack.c.bf16 %v477_v63, %v478_v15 }
 0x12c   :  { %5982 = vst [vmem:[#allocation12_spill] sm:$0xff] %v5981_v13  ;;  %vm5983_vm9 = vcmp.lt.s32.totalorder %v4056_v12, 7  ;;  %v310_v11 = vrot.slane %v4345_v29, 6  ;;  %3227 = vmatmul.mubr.msk.bf16.gmra.mxu0 %vm3225_vm14, %v3226_v1  ;;  %v464_v31 = vrot.slane %v4331_v6, 7  ;;  %v465_v9 = vrot.slane %v4405_v22, 7  ;;  %vm4719_vm8 = vmpackc.low %vm727_vm2, %vm726_vm1 }
 0x12d   :  { %v664_v16 = vsel %vm5983_vm9, %v661_v27, %v662_v60  ;;  %vm5985_vm3 = vmmov %vm5983_vm9  ;;  %3230 = vmatprep.mubr.msk.bf16.mxu0 %vm4700_vm15, %v3229_v38  ;;  %v645_v37 = vpack.c.bf16 %v4544_v20, %v4407_v30  ;;  %v5986_v27 = vmov 0  ;;  %vm358_vm12 = vcmp.ge.s32.totalorder %v342_v59, 0  ;;  %v5997_v38 = vld [vmem:[#allocation16_spill] sm:$0xff] }
 0x12e   :  { %v679_v58 = vsel %vm5985_vm3, %v662_v60, %v5984_v35  ;;  %v5987_v27 = vsel %vm4719_vm8, 4294967295, %v5986_v27  ;;  %vm359_vm11 = vcmp.ge.s32.totalorder %v343_v3, 0  ;;  %vm5989_vm14 = vcmp.lt.s32.totalorder %v4056_v12, 2  ;;  %v5996_v3 = vld [vmem:[#allocation15_spill] sm:$0xff]  ;;  %v5998_v35 = vld [vmem:[#allocation18_spill] sm:$0xff] }
 0x12f   :  { %5988 = vst [vmem:[#allocation13_spill] sm:$0xff] %v5987_v27  ;;  %v3170_v4 = vpack.c.bf16 %v679_v58, %v664_v16  ;;  %1085 = vmatmul.mubr.bf16.gmra.mxu1 %v645_v37  ;;  %v324_v29 = vsel %vm5989_vm14, %v309_v62, %v310_v11  ;;  %vm513_vm9 = vcmp.ge.s32.totalorder %v497_v21, 0  ;;  %vm514_vm3 = vcmp.ge.s32.totalorder %v498_v53, 0  ;;  %vm5992_vm1 = vmmov %vm5989_vm14  ;;  %v5999_v58 = vld [vmem:[#allocation19_spill] sm:$0xff] }
 0x130   :  { %vm5990_vm15 = vcmp.lt.s32.totalorder %v4056_v12, 1  ;;  %v325_v33 = vsel %vm5992_vm1, %v308_v42, %v309_v62  ;;  %vm3231_vm0 = vmpackc.low %vm359_vm11, %vm358_vm12  ;;  %v5993_v59 = vmov 0  ;;  %v344_v53 = vadd.s32 4294967294, %v5978_v5 }
 0x131   :  { %3171 = vmatprep.mubr.msk.bf16.mxu1 %vm4719_vm8, %v3170_v4  ;;  %v475_v50 = vsel %vm5990_vm15, %v464_v31, %v465_v9  ;;  %vm5991_vm2 = vmmov %vm5990_vm15  ;;  %v3232_v63 = vpack.c.bf16 %v324_v29, %v325_v33  ;;  %v345_v54 = vadd.s32 4294967294, %v5979_v23  ;;  %v499_v21 = vadd.s32 4294967295, %v5996_v3 }
 0x132   :  { %v476_v60 = vsel %vm5991_vm2, %v463_v32, %v464_v31  ;;  %vm4734_vm6 = vmpackc.low %vm514_vm3, %vm513_vm9  ;;  %v311_v15 = vrot.slane %v4331_v6, 6  ;;  %v312_v32 = vrot.slane %v4405_v22, 6  ;;  %v500_v16 = vadd.s32 4294967295, %v5997_v38 }
 0x133   :  { %v5994_v59 = vsel %vm4734_vm6, 4294967295, %v5993_v59  ;;  %v3235_v1 = vpack.c.bf16 %v475_v50, %v476_v60  ;;  %v467_v42 = vrot.slane %v4544_v20, 7  ;;  %v646_v5 = vpack.c.bf16 %v4339_v43, %v4477_v52  ;;  %vm6000_vm11 = vmmov %vm5992_vm1 }
 0x134   :  { %5995 = vst [vmem:[#allocation38_spill] sm:$0xff] %v5994_v59  ;;  %3233 = vmatmul.mubr.msk.bf16.gmra.mxu0 %vm3231_vm0, %v3232_v63  ;;  %v1411_v23 = vadd.s32 2, %v5998_v35  ;;  %v1412_v31 = vadd.s32 2, %v5999_v58  ;;  %vm360_vm15 = vcmp.ge.s32.totalorder %v344_v53, 0  ;;  %vm361_vm12 = vcmp.ge.s32.totalorder %v345_v54, 0  ;;  %vm6001_vm0 = vmmov %vm5992_vm1 }
 0x135   :  { %3236 = vmatprep.mubr.msk.bf16.mxu0 %vm4734_vm6, %v3235_v1  ;;  %v466_v6 = vrot.slane %v4407_v30, 7  ;;  %v322_v22 = vsel %vm6000_vm11, %v311_v15, %v312_v32  ;;  %v323_v37 = vsel %vm6001_vm0, %v310_v11, %v311_v15  ;;  %vm515_vm14 = vcmp.ge.s32.totalorder %v499_v21, 0  ;;  %vm6002_vm3 = vmmov %vm5991_vm2  ;;  %v6007_v15 = vld [vmem:[#allocation20_spill] sm:$0xff]  ;;  %v1772_v59 = vld [vmem:[%s5744_s4] sm:$0x3] }
 0x136   :  { %vm516_vm9 = vcmp.ge.s32.totalorder %v500_v16, 0  ;;  %v3961_v4 = vmov 0   ;;  %vm3237_vm2 = vmpackc.low %vm361_vm12, %vm360_vm15  ;;  %vm1443_vm1 = vcmp.lt.s32.totalorder %v1411_v23, 8  ;;  %vm1444_vm6 = vcmp.lt.s32.totalorder %v1412_v31, 8  ;;  %v6008_v16 = vld [vmem:[#allocation21_spill] sm:$0xff] }
 0x137   :  { %1095 = vmatmul.mubr.bf16.gmra.mxu1 %v646_v5  ;;  %v473_v62 = vsel %vm6002_vm3, %v466_v6, %v467_v42  ;;  %v3238_v29 = vpack.c.bf16 %v322_v22, %v323_v37  ;;  %vm6003_vm8 = vmmov %vm6002_vm3  ;;  %v6004_v60 = vmov 0  ;;  %v346_v11 = vadd.s32 4294967294, %v5996_v3 }
 0x138   :  { %1659 = vmatprep.mubr.bf16.mxu1 %v3961_v4  ;;  %v474_v50 = vsel %vm6003_vm8, %v465_v9, %v466_v6  ;;  %vm4761_vm5 = vmpackc.low %vm516_vm9, %vm515_vm14  ;;  %v347_v33 = vadd.s32 4294967294, %v5997_v38  ;;  %v314_v53 = vrot.slane %v4544_v20, 6  ;;  %v501_v54 = vadd.s32 4294967295, %v4113_v45 }
 0x139   :  { %v6005_v60 = vsel %vm4761_vm5, 4294967295, %v6004_v60  ;;  %v3241_v63 = vpack.c.bf16 %v473_v62, %v474_v50  ;;  %v502_v21 = vadd.s32 4294967295, %v4115_v46  ;;  %vm3268_vm15 = vmpackc.low %vm1444_vm6, %vm1443_vm1  ;;  %v468_v1 = vrot.slane %v4477_v52, 7  ;;  %v6019_v62 = vld [vmem:[#allocation24_spill] sm:$0xff] }
 0x13a   :  { %6006 = vst [vmem:[#allocation15_spill] sm:$0xff] %v6005_v60  ;;  %v313_v9 = vrot.slane %v4407_v30, 6  ;;  %v1413_v3 = vadd.s32 2, %v6007_v15  ;;  %v1414_v38 = vadd.s32 2, %v6008_v16  ;;  %vm362_vm8 = vcmp.ge.s32.totalorder %v346_v11, 0  ;;  %vm6010_vm11 = vmmov %vm6001_vm0  ;;  %v6023_v11 = vld [vmem:[#allocation26_spill] sm:$0xff] }
 0x13b   :  { %vm363_vm12 = vcmp.ge.s32.totalorder %v347_v33, 0  ;;  %v6009_v20 = vpack.c.bf16 %v4161_v24, %v4167_v25  ;;  %vm517_vm6 = vcmp.ge.s32.totalorder %v501_v54, 0  ;;  %vm518_vm0 = vcmp.ge.s32.totalorder %v502_v21, 0  ;;  %vm6012_vm14 = vmmov %vm6002_vm3  ;;  %v3836_v54 = vld [vmem:[#allocation5 + $0x130] sm:$0xff]   ;;  %v3838_v21 = vld [vmem:[#allocation5 + $0x128] sm:$0xff]  }
 0x13c   :  { %3239 = vmatmul.mubr.msk.bf16.gmra.mxu0 %vm3237_vm2, %v3238_v29  ;;  %v320_v5 = vsel %vm6010_vm11, %v313_v9, %v314_v53  ;;  %v6011_v35 = vrot.slane %v4339_v43, 7  ;;  %vm6013_vm9 = vmmov %vm6002_vm3  ;;  %vm1445_vm1 = vcmp.lt.s32.totalorder %v1413_v3, 8  ;;  %v6015_v25 = vmov 0  ;;  %v3843_v15 = vld [vmem:[#allocation5 + $0x150] sm:$0xff]   ;;  %v3848_v16 = vld [vmem:[#allocation5 + $0x100] sm:$0xff]  }
 0x13d   :  { %3242 = vmatprep.mubr.msk.bf16.mxu0 %vm4761_vm5, %v3241_v63  ;;  %v472_v23 = vsel %vm6013_vm9, %v467_v42, %v468_v1  ;;  %vm6014_vm3 = vmmov %vm6010_vm11  ;;  %v348_v31 = vadd.s32 4294967294, %v4113_v45  ;;  %v349_v6 = vadd.s32 4294967294, %v4115_v46  ;;  %v315_v42 = vrot.slane %v4477_v52, 6  ;;  %v3844_v3 = vld [vmem:[#allocation5 + $0x110] sm:$0xff]  }
 0x13e   :  { %v471_v30 = vsel %vm6012_vm14, %v468_v1, %v6011_v35  ;;  %v321_v58 = vsel %vm6014_vm3, %v312_v32, %v313_v9  ;;  %vm3243_vm2 = vmpackc.low %vm363_vm12, %vm362_vm8  ;;  %v6018_v32 = vld [vmem:[#allocation23_spill] sm:$0xff]  ;;  %v1416_v29 = vadd.s32 2, %v6019_v62  ;;  %v6020_v45 = vrot.slane %v4339_v43, 6  ;;  %v3833_v43 = vld [vmem:[#allocation5 + $0x178] sm:$0xff]  }
 0x13f   :  { %3270 = vmatmul.mubr.msk.bf16.vlgmr.msra.gmra.mxu1 %vm3268_vm15, %v6009_v20  ;;  %vm1446_vm15 = vcmp.lt.s32.totalorder %v1414_v38, 8  ;;  %v3244_v24 = vpack.c.bf16 %v320_v5, %v321_v58  ;;  %vm4790_vm11 = vmpackc.low %vm518_vm0, %vm517_vm6  ;;  %v3247_v22 = vpack.c.bf16 %v471_v30, %v472_v23  ;;  %v1415_v37 = vadd.s32 2, %v6018_v32  ;;  %3455 = vmatprep.subr.bf16.mxu0 %v3833_v43  ;;  %v3849_v38 = vld [vmem:[#allocation5 + $0x78] sm:$0xff]   ;;  %v3854_v5 = vld [vmem:[#allocation5 + $0x30] sm:$0xff]  }
 0x140   :  { %1669 = vmatprep.mubr.bf16.mxu1 %v3961_v4  ;;  %v6016_v25 = vsel %vm4790_vm11, 4294967295, %v6015_v25  ;;  %vm3271_vm14 = vmpackc.low %vm1446_vm15, %vm1445_vm1  ;;  %vm364_vm8 = vcmp.ge.s32.totalorder %v348_v31, 0  ;;  %vm365_vm12 = vcmp.ge.s32.totalorder %v349_v6, 0  ;;  %v1417_v33 = vadd.s32 2, %v6023_v11  ;;  %v3850_v20 = vld [vmem:[#allocation5 + $0x38] sm:$0xff]   ;;  %3519 = vmatprep.subr.bf16.mxu1 %v3849_v38  ;;  %v3857_v35 = vld [vmem:[#allocation5 + $0x68] sm:$0xff]  }
 0x141   :  { %6017 = vst [vmem:[#allocation16_spill] sm:$0xff] %v6016_v25  ;;  %vm6021_vm6 = vmmov %vm6014_vm3  ;;  %v6025_v63 = vpack.c.bf16 %v4580_v2, %v4584_v34  ;;  %v3839_v34 = vld [vmem:[#allocation5 + $0x160] sm:$0xff]   ;;  %v6029_v26 = vpack.c.bf16 %v4644_v44, %v4638_v57  ;;  %v3845_v44 = vld [vmem:[#allocation5 + $0x148] sm:$0xff]   ;;  %3520 = vmatpush3.bf16.msra.mxu1 %v3850_v20  ;;  %v1776_v25 = vsub.s32 0, %v4056_v12  ;;  %v1780_v13 = vsub.s32 1, %v4056_v12 }
 0x142   :  { %v318_v46 = vsel %vm6021_vm6, %v315_v42, %v6020_v45  ;;  %vm6022_vm0 = vmmov %vm6014_vm3  ;;  %vm1447_vm3 = vcmp.lt.s32.totalorder %v1415_v37, 8  ;;  %vm1449_vm15 = vcmp.lt.s32.totalorder %v1417_v33, 8  ;;  %v3846_v57 = vld [vmem:[#allocation5 + $0x108] sm:$0xff]   ;;  %v3861_v23 = vld [vmem:[#allocation5 + $0x60] sm:$0xff]  }
 0x143   :  { %v319_v52 = vsel %vm6022_vm0, %v314_v53, %v315_v42  ;;  %vm3249_vm9 = vmpackc.low %vm365_vm12, %vm364_vm8  ;;  %v3835_v53 = vld [vmem:[#allocation5 + $0x170] sm:$0xff]   ;;  %v3858_v30 = vld [vmem:[#allocation5 + $0x28] sm:$0xff]   ;;  %v4910_v27 = vrot.slane %v1772_v59, %v1776_v25  ;;  %v4912_v41 = vrot.slane %v1772_v59, %v1780_v13 }
 0x144   :  { %3245 = vmatmul.mubr.msk.bf16.gmra.mxu0 %vm3243_vm2, %v3244_v24  ;;  %vm1448_vm2 = vcmp.lt.s32.totalorder %v1416_v29, 8  ;;  %v3250_v50 = vpack.c.bf16 %v318_v46, %v319_v52  ;;  %v3862_v58 = vld [vmem:[#allocation5 + $0x20] sm:$0xff]   ;;  %v3865_v24 = vld [vmem:[#allocation5 + $0x58] sm:$0xff]   ;;  %v3869_v37 = vld [vmem:[#allocation5 + $0x50] sm:$0xff]  }
 0x145   :  { %3248 = vmatprep.mubr.msk.bf16.mxu0 %vm4790_vm11, %v3247_v22  ;;  %vm3274_vm1 = vmpackc.low %vm1448_vm2, %vm1447_vm3  ;;  %v3866_v31 = vld [vmem:[#allocation5 + $0x18] sm:$0xff]   ;;  %v3870_v62 = vld [vmem:[#allocation5 + $0x10] sm:$0xff]  }
 0x146   :  { %v3873_v29 = vld [vmem:[#allocation5 + $0x48] sm:$0xff]   ;;  %v3878_v33 = vld [vmem:[#allocation5] sm:$0xff]  }
 0x147   :  { %3273 = vmatmul.mubr.msk.bf16.gmra.mxu1 %vm3271_vm14, %v3272_v7  ;;  %vm1450_vm14 = vcmp.lt.s32.totalorder %v1418_v10, 8  ;;  %v3834_v7 = vld [vmem:[#allocation5 + $0x138] sm:$0xff]   ;;  %v3874_v46 = vld [vmem:[#allocation5 + $0x8] sm:$0xff]  }
 0x148   :  { %1679 = vmatprep.mubr.bf16.mxu1 %v3961_v4  ;;  %vm3277_vm6 = vmpackc.low %vm1450_vm14, %vm1449_vm15  ;;  %3456 = vmatpush3.bf16.msra.mxu0 %v3834_v7 }
 0x149   :  { %3457 = vmatprep.subr.bf16.mxu0 %v3835_v53 }
 0x14c   :  { %3251 = vmatmul.mubr.msk.bf16.gmra.mxu0 %vm3249_vm9, %v3250_v50  ;;  %v3876_v50 = vld [vmem:[#allocation5 + $0x40] sm:$0xff]  }
 0x14d   :  { %3458 = vmatpush3.bf16.msra.mxu0 %v3836_v54 }
 0x14f   :  { %3276 = vmatmul.mubr.msk.bf16.gmra.mxu1 %vm3274_vm1, %v3275_v56  ;;  %v3837_v56 = vld [vmem:[#allocation5 + $0x168] sm:$0xff]  }
 0x150   :  { %1689 = vmatprep.mubr.bf16.mxu1 %v3961_v4  ;;  %3459 = vmatprep.subr.bf16.mxu0 %v3837_v56 }
 0x151   :  { %3460 = vmatpush3.bf16.msra.mxu0 %v3838_v21 }
 0x152   :  { %3461 = vmatprep.subr.bf16.mxu0 %v3839_v34 }
 0x155   :  { %3462 = vmatpush3.bf16.msra.mxu0 %v3840_v61 }
 0x156   :  { %3463 = vmatprep.subr.bf16.mxu0 %v3841_v18 }
 0x157   :  { %3279 = vmatmul.mubr.msk.bf16.gmra.mxu1 %vm3277_vm6, %v6025_v63 }
 0x158   :  { %1699 = vmatprep.mubr.bf16.mxu1 %v3961_v4 }
 0x159   :  { %3464 = vmatpush3.bf16.msra.mxu0 %v3842_v39 }
 0x15a   :  { %3465 = vmatprep.subr.bf16.mxu0 %v3843_v15 }
 0x15d   :  { %3466 = vmatpush3.bf16.msra.mxu0 %v3844_v3 }
 0x15e   :  { %3467 = vmatprep.subr.bf16.mxu0 %v3845_v44 }
 0x15f   :  { %3282 = vmatmul.mubr.msk.bf16.gmra.mxu1 %vm4068_vm4, %v6026_v51  ;;  %vm6038_vm4 = vcmp.lt.s32.totalorder %v4056_v12, 1 }
 0x160   :  { %1709 = vmatprep.mubr.bf16.mxu1 %v3961_v4  ;;  %vm6051_vm0 = vmmov %vm6038_vm4 }
 0x161   :  { %3468 = vmatpush3.bf16.msra.mxu0 %v3846_v57  ;;  %vm6058_vm1 = vmmov %vm6051_vm0 }
 0x162   :  { %vm6059_vm15 = vmmov %vm6051_vm0 }
 0x167   :  { %3285 = vmatmul.mubr.msk.bf16.gmra.mxu1 %vm4080_vm7, %v3284_v36  ;;  %v6031_v36 = vpack.c.bf16 %v4654_v0, %v4648_v8  ;;  %v3851_v8 = vld [vmem:[#allocation5 + $0xf8] sm:$0xff]   ;;  %v3853_v0 = vld [vmem:[#allocation5 + $0x70] sm:$0xff]   ;;  %vm6039_vm7 = vcmp.lt.s32.totalorder %v4056_v12, 7 }
 0x168   :  { %1719 = vmatprep.mubr.bf16.mxu1 %v3961_v4  ;;  %3521 = vmatprep.subr.bf16.mxu1 %v3853_v0  ;;  %vm6046_vm8 = vmmov %vm6039_vm7  ;;  %v3881_v12 = vld [vmem:[%s5747_s7 + $0x38] sm:$0xff]  }
 0x169   :  { %3522 = vmatpush3.bf16.msra.mxu1 %v3854_v5  ;;  %vm6050_vm12 = vmmov %vm6039_vm7 }
 0x16a   :  { %3523 = vmatprep.subr.bf16.mxu1 %v3857_v35  ;;  %vm6052_vm9 = vmmov %vm6039_vm7 }
 0x16b   :  { %vm6057_vm2 = vmmov %vm6039_vm7 }
 0x16c   :  { %vm6060_vm14 = vmmov %vm6057_vm2 }
 0x16d   :  { %3524 = vmatpush3.bf16.msra.mxu1 %v3858_v30  ;;  %vm6062_vm6 = vmmov %vm6057_vm2 }
 0x16e   :  { %3525 = vmatprep.subr.bf16.mxu1 %v3861_v23 }
 0x16f   :  { %3288 = vmatmul.mubr.msk.bf16.gmra.mxu1 %vm4095_vm10, %v6029_v26  ;;  %vm6044_vm10 = vmmov %vm6039_vm7 }
 0x170   :  { %1729 = vmatprep.mubr.bf16.mxu1 %v3961_v4  ;;  %v3847_v4 = vld [vmem:[#allocation5 + $0x140] sm:$0xff]  }
 0x171   :  { %3469 = vmatprep.subr.bf16.mxu0 %v3847_v4  ;;  %3526 = vmatpush3.bf16.msra.mxu1 %v3862_v58 }
 0x172   :  { %3470 = vmatpush3.bf16.msra.mxu0 %v3848_v16  ;;  %3527 = vmatprep.subr.bf16.mxu1 %v3865_v24 }
 0x173   :  { %3583 = vmatprep.subr.bf16.mxu0 %v3851_v8 }
 0x175   :  { %3528 = vmatpush3.bf16.msra.mxu1 %v3866_v31 }
 0x176   :  { %3529 = vmatprep.subr.bf16.mxu1 %v3869_v37 }
 0x177   :  { %3291 = vmatmul.mubr.msk.bf16.gmra.mxu1 %vm4133_vm13, %v6031_v36  ;;  %vm6045_vm13 = vmmov %vm6038_vm4 }
 0x179   :  { %3530 = vmatpush3.bf16.msra.mxu1 %v3870_v62 }
 0x17a   :  { %3531 = vmatprep.subr.bf16.mxu1 %v3873_v29 }
 0x17d   :  { %3532 = vmatpush3.bf16.msra.mxu1 %v3874_v46 }
 0x17e   :  { %3533 = vmatprep.subr.bf16.mxu1 %v3876_v50 }
 0x181   :  { %3534 = vmatpush3.bf16.msra.mxu1 %v3878_v33 }
 0x1b4   :  { %v4844_v6 = vpop.f32.mrf.mxu1 }
 0x1b6   :  { %v4846_v22 = vpop.f32.mrf.mxu1 }
 0x1b8   :  { %v4848_v42 = vpop.f32.mrf.mxu1 }
 0x1ba   :  { %v4850_v32 = vpop.f32.mrf.mxu1 }
 0x1bc   :  { %v4852_v45 = vpop.f32.mrf.mxu1 }
 0x1be   :  { %v4854_v52 = vpop.f32.mrf.mxu1 }
 0x1c0   :  { %v4856_v11 = vpop.f32.mrf.mxu1 }
 0x1c2   :  { %v4858_v28 = vpop.f32.mrf.mxu1 }
 0x1c4   :  { %v4860_v10 = vpop.f32.mrf.mxu1 }
 0x1c6   :  { %v4862_v43 = vpop.f32.mrf.mxu1 }
 0x1c8   :  { %v4864_v7 = vpop.f32.mrf.mxu1 }
 0x1c9   :  { %v1299_v63 = vpop.f32.mrf.mxu0 }
 0x1ca   :  { %v4866_v53 = vpop.f32.mrf.mxu1  ;;  %v1300_v17 = vadd.f32 %v1299_v63, %v4844_v6 }
 0x1cb   :  { %v1301_v54 = vpop.f32.mrf.mxu0 }
 0x1cc   :  { %v4868_v51 = vpop.f32.mrf.mxu1  ;;  %v1302_v48 = vadd.f32 %v1301_v54, %v4846_v22 }
 0x1cd   :  { %v1303_v40 = vpop.f32.mrf.mxu0 }
 0x1ce   :  { %v4870_v56 = vpop.f32.mrf.mxu1  ;;  %v1304_v14 = vadd.f32 %v1303_v40, %v4848_v42 }
 0x1cf   :  { %v1305_v21 = vpop.f32.mrf.mxu0 }
 0x1d0   :  { %v4872_v2 = vpop.f32.mrf.mxu1 }
 0x1d1   :  { %v1309_v34 = vpop.f32.mrf.mxu0 }
 0x1d2   :  { %v4874_v61 = vpop.f32.mrf.mxu1 }
 0x1d3   :  { %v1311_v26 = vpop.f32.mrf.mxu0 }
 0x1d5   :  { %v4876_v1 = vpop.f32.mrf.mxu1  ;;  %v1313_v18 = vpop.f32.mrf.mxu0 }
 0x1d6   :  { %v1314_v6 = vadd.f32 %v1313_v18, %v4856_v11 }
 0x1d7   :  { %v4878_v39 = vpop.f32.mrf.mxu1  ;;  %v1315_v36 = vpop.f32.mrf.mxu0 }
 0x1d8   :  { %v4921_v25 = vadd.f32 %v1315_v36, %v4858_v28 }
 0x1d9   :  { %v4880_v9 = vpop.f32.mrf.mxu1 }
 0x1db   :  { %v4882_v3 = vpop.f32.mrf.mxu1 }
 0x1dd   :  { %v1076_v57 = vpop.f32.mrf.mxu1 }
 0x1df   :  { %v4884_v16 = vpop.f32.mrf.mxu1 }
 0x1e0   :  { %v1319_v15 = vpop.f32.mrf.mxu0 }
 0x1e1   :  { %v4886_v20 = vpop.f32.mrf.mxu1  ;;  %v4924_v13 = vadd.f32 %v1319_v15, %v4860_v10 }
 0x1e2   :  { %v1321_v44 = vpop.f32.mrf.mxu0 }
 0x1e3   :  { %v1082_v0 = vpop.f32.mrf.mxu1  ;;  %v4927_v59 = vadd.f32 %v1321_v44, %v4862_v43 }
 0x1e4   :  { %v1323_v4 = vpop.f32.mrf.mxu0 }
 0x1e5   :  { %v4931_v42 = vadd.f32 %v1323_v4, %v4864_v7 }
 0x1e6   :  { %v1325_v38 = vpop.f32.mrf.mxu0 }
 0x1ec   :  { %v1329_v8 = vpop.f32.mrf.mxu0 }
 0x1ee   :  { %v1331_v5 = vpop.f32.mrf.mxu0 }
 0x1ef   :  { %v4888_v35 = vpop.f32.mrf.mxu1 }
 0x1f0   :  { %v1333_v30 = vpop.f32.mrf.mxu0 }
 0x1f1   :  { %v4890_v23 = vpop.f32.mrf.mxu1  ;;  %v4943_v28 = vadd.f32 %v1333_v30, %v4872_v2 }
 0x1f2   :  { %v1335_v58 = vpop.f32.mrf.mxu0 }
 0x1f3   :  { %v4892_v24 = vpop.f32.mrf.mxu1  ;;  %v4949_v54 = vadd.f32 %v1335_v58, %v4874_v61 }
 0x1f4   :  { %v1339_v31 = vpop.f32.mrf.mxu0 }
 0x1f5   :  { %v4894_v37 = vpop.f32.mrf.mxu1 }
 0x1f6   :  { %6033 = vst [vmem:[#allocation18_spill] sm:$0xff] %v4894_v37  ;;  %v1341_v62 = vpop.f32.mrf.mxu0  ;;  %v1310_v37 = vadd.f32 %v1309_v34, %v4852_v45  ;;  %v4937_v45 = vadd.f32 %v1329_v8, %v4868_v51 }
 0x1f7   :  { %v4896_v29 = vpop.f32.mrf.mxu1  ;;  %v4955_v51 = vadd.f32 %v1341_v62, %v4878_v39 }
 0x1f8   :  { %6034 = vst [vmem:[#allocation19_spill] sm:$0xff] %v4896_v29  ;;  %v1343_v46 = vpop.f32.mrf.mxu0 }
 0x1f9   :  { %v4898_v50 = vpop.f32.mrf.mxu1  ;;  %v4958_v40 = vadd.f32 %v1343_v46, %v4880_v9 }
 0x1fa   :  { %6035 = vst [vmem:[#allocation20_spill] sm:$0xff] %v4898_v50  ;;  %v1345_v33 = vpop.f32.mrf.mxu0 }
 0x1fb   :  { %v4901_v60 = vpop.f32.mrf.mxu1 }
 0x1fc   :  { %6036 = vst [vmem:[#allocation21_spill] sm:$0xff] %v4901_v60  ;;  %v1349_v47 = vpop.f32.mrf.mxu0  ;;  %v1306_v60 = vadd.f32 %v1305_v21, %v4850_v32  ;;  %v4934_v32 = vadd.f32 %v1325_v38, %v4866_v53  ;;  %v4952_v53 = vadd.f32 %v1339_v31, %v4876_v1  ;;  %v4961_v21 = vadd.f32 %v1345_v33, %v4882_v3 }
 0x1fd   :  { %v4907_v55 = vpop.f32.mrf.mxu1  ;;  %v4963_v2 = vadd.f32 %v1349_v47, %v1076_v57 }
 0x1fe   :  { %6037 = vst [vmem:[#allocation23_spill] sm:$0xff] %v4907_v55  ;;  %v1351_v49 = vpop.f32.mrf.mxu0  ;;  %v1312_v55 = vadd.f32 %v1311_v26, %v4854_v52  ;;  %v4940_v52 = vadd.f32 %v1331_v5, %v4870_v56 }
 0x1ff   :  { %v1661_v19 = vpop.f32.mrf.mxu1  ;;  %v4969_v26 = vadd.f32 %v1351_v49, %v4884_v16 }
 0x200   :  { %v1740_v50 = vadd.f32 %v1661_v19, %v1300_v17  ;;  %v1353_v29 = vpop.f32.mrf.mxu0 }
 0x201   :  { %v1663_v63 = vpop.f32.mrf.mxu1  ;;  %v4972_v1 = vadd.f32 %v1353_v29, %v4886_v20 }
 0x202   :  { %v1784_v22 = vadd.f32 %v4910_v27, %v1740_v50  ;;  %v1741_v17 = vadd.f32 %v1663_v63, %v1302_v48  ;;  %v1355_v19 = vpop.f32.mrf.mxu0  ;;  %v6041_v63 = vld [vmem:[#allocation18_spill] sm:$0xff] }
 0x203   :  { %v1665_v11 = vpop.f32.mrf.mxu1  ;;  %v4974_v18 = vadd.f32 %v1355_v19, %v1082_v0 }
 0x204   :  { %v4945_v10 = vmax.f32 %v1784_v22, 0.0  ;;  %v1785_v48 = vadd.f32 %v4912_v41, %v1741_v17  ;;  %v1742_v43 = vadd.f32 %v1665_v11, %v1304_v14  ;;  %v1359_v7 = vpop.f32.mrf.mxu0 }
 0x205   :  { %v1667_v56 = vpop.f32.mrf.mxu1  ;;  %v4980_v47 = vadd.f32 %v1359_v7, %v4888_v35 }
 0x206   :  { %v4965_v14 = vmax.f32 %v1785_v48, 0.0  ;;  %v1786_v34 = vadd.f32 %v4910_v27, %v1742_v43  ;;  %v1361_v61 = vpop.f32.mrf.mxu0  ;;  %v1743_v39 = vadd.f32 %v1667_v56, %v1306_v60  ;;  %v5844_v9 = vrot.slane %v4945_v10, 7  ;;  %v6042_v48 = vld [vmem:[#allocation19_spill] sm:$0xff] }
 0x207   :  { %v1671_v36 = vpop.f32.mrf.mxu1  ;;  %v5843_v57 = vrot.slane %v4945_v10, 1  ;;  %v4986_v16 = vadd.f32 %v1361_v61, %v4890_v23 }
 0x208   :  { %v4977_v15 = vmax.f32 %v1786_v34, 0.0  ;;  %v1744_v3 = vadd.f32 %v1671_v36, %v1310_v37  ;;  %v1363_v44 = vpop.f32.mrf.mxu0  ;;  %v5841_v49 = vrot.slane %v4965_v14, 7  ;;  %v1787_v4 = vadd.f32 %v4912_v41, %v1743_v39 }
 0x209   :  { %v1673_v60 = vpop.f32.mrf.mxu1  ;;  %v5842_v35 = vrot.slane %v4965_v14, 1  ;;  %v4997_v58 = vadd.f32 %v1363_v44, %v4892_v24 }
 0x20a   :  { %v1850_v38 = vrot.slane %v4977_v15, 7  ;;  %v2042_v8 = vrot.slane %v4977_v15, 1  ;;  %v1788_v0 = vadd.f32 %v4910_v27, %v1744_v3  ;;  %v1365_v5 = vpop.f32.mrf.mxu0  ;;  %v4994_v30 = vmax.f32 %v1787_v4, 0.0 }
 0x20b   :  { %v1745_v23 = vadd.f32 %v1673_v60, %v1312_v55  ;;  %v1675_v31 = vpop.f32.mrf.mxu1  ;;  %v5019_v22 = vadd.f32 %v1365_v5, %v6041_v63 }
 0x20c   :  { %v5005_v37 = vsel %vm6038_vm4, %v5844_v9, %v1850_v38  ;;  %v5011_v62 = vsel %vm6039_vm7, %v5843_v57, %v2042_v8  ;;  %v5013_v29 = vmax.f32 %v1788_v0, 0.0  ;;  %v1746_v24 = vadd.f32 %v1675_v31, %v1314_v6  ;;  %v1369_v46 = vpop.f32.mrf.mxu0  ;;  %v6047_v31 = vld [vmem:[#allocation20_spill] sm:$0xff]  ;;  %vm6063_vm4 = vmmov %vm6051_vm0 }
 0x20d   :  { %v1851_v55 = vrot.slane %v4994_v30, 7  ;;  %v2043_v50 = vrot.slane %v4994_v30, 1  ;;  %v1789_v33 = vadd.f32 %v4912_v41, %v1745_v23  ;;  %v1677_v17 = vpop.f32.mrf.mxu1  ;;  %v5024_v43 = vadd.f32 %v1369_v46, %v6042_v48  ;;  %v3856_v57 = vld [vmem:[#allocation5 + $0xb0] sm:$0xff]   ;;  %vm6064_vm7 = vmmov %vm6051_vm0 }
 0x20e   :  { %6040 = vst [vmem:[#allocation24_spill] sm:$0xff] %v5013_v29  ;;  %v2044_v19 = vrot.slane %v5013_v29, 1  ;;  %v1790_v11 = vadd.f32 %v4910_v27, %v1746_v24  ;;  %v1747_v6 = vadd.f32 %v1677_v17, %v4921_v25  ;;  %v1371_v7 = vpop.f32.mrf.mxu0  ;;  %v1852_v56 = vrot.slane %v5013_v29, 7  ;;  %v6049_v17 = vld [vmem:[#allocation21_spill] sm:$0xff] }
 0x20f   :  { %v5028_v34 = vmax.f32 %v1789_v33, 0.0  ;;  %v1681_v61 = vpop.f32.mrf.mxu1  ;;  %v2101_v39 = vsel %vm6044_vm10, %v5842_v35, %v2043_v50  ;;  %v5038_v36 = vsel %vm6045_vm13, %v5841_v49, %v1851_v55  ;;  %v5050_v24 = vadd.f32 %v1371_v7, %v6047_v31  ;;  %v6053_v49 = vld [vmem:[#allocation23_spill] sm:$0xff]  ;;  %vm6066_vm10 = vmmov %vm6057_vm2 }
 0x210   :  { %v2098_v25 = vsel %vm6046_vm8, %v2042_v8, %v2044_v19  ;;  %v5042_v3 = vmax.f32 %v1790_v11, 0.0  ;;  %v1791_v44 = vadd.f32 %v4912_v41, %v1747_v6  ;;  %v1748_v4 = vadd.f32 %v1681_v61, %v4924_v13  ;;  %v1373_v60 = vpop.f32.mrf.mxu0  ;;  %vm6070_vm8 = vmmov %vm6057_vm2 }
 0x211   :  { %6043 = vst [vmem:[#allocation26_spill] sm:$0xff] %v5028_v34  ;;  %v3312_v0 = vpack.c.bf16 %v2098_v25, %v5011_v62  ;;  %v1853_v5 = vrot.slane %v5028_v34, 7  ;;  %v2045_v23 = vrot.slane %v5028_v34, 1  ;;  %v1683_v46 = vpop.f32.mrf.mxu1  ;;  %v5057_v11 = vadd.f32 %v1373_v60, %v6049_v17  ;;  %v3852_v17 = vld [vmem:[#allocation5 + $0xb8] sm:$0xff]  }
 0x212   :  { %v2046_v33 = vrot.slane %v5042_v3, 1  ;;  %v5053_v8 = vmax.f32 %v1791_v44, 0.0  ;;  %v1792_v63 = vadd.f32 %v4910_v27, %v1748_v4  ;;  %v5845_v13 = vrot.slane %v5042_v3, 7  ;;  %v1375_v48 = vpop.f32.mrf.mxu0 }
 0x213   :  { %v1749_v62 = vadd.f32 %v1683_v46, %v4927_v59  ;;  %v1685_v6 = vpop.f32.mrf.mxu1  ;;  %v2099_v7 = vsel %vm6050_vm12, %v2043_v50, %v2045_v23  ;;  %v5065_v61 = vsel %vm6051_vm0, %v1851_v55, %v1853_v5  ;;  %v5079_v35 = vadd.f32 %v1375_v48, %v6053_v49  ;;  %vm6072_vm12 = vmmov %vm6051_vm0 }
 0x214   :  { %6048 = vst [vmem:[#allocation27_spill] sm:$0xff] %v5053_v8  ;;  %v1855_v25 = vrot.slane %v5053_v8, 7  ;;  %v2047_v44 = vrot.slane %v5053_v8, 1  ;;  %v5069_v4 = vmax.f32 %v1792_v63, 0.0  ;;  %v1750_v60 = vadd.f32 %v1685_v6, %v4931_v42  ;;  %v3855_v6 = vld [vmem:[#allocation5 + $0xf0] sm:$0xff]   ;;  %vm6073_vm0 = vmmov %vm6057_vm2  ;;  %v3868_v8 = vld [vmem:[#allocation5 + $0x98] sm:$0xff]  }
 0x215   :  { %v1793_v31 = vadd.f32 %v4912_v41, %v1749_v62  ;;  %v1687_v59 = vpop.f32.mrf.mxu1  ;;  %v3309_v46 = vpack.c.bf16 %v2099_v7, %v2101_v39  ;;  %v2096_v50 = vsel %vm6052_vm9, %v2044_v19, %v2046_v33  ;;  %v6055_v39 = vld [vmem:[#allocation25_spill] sm:$0xff]  ;;  %vm6074_vm9 = vmmov %vm6073_vm0 }
 0x216   :  { %v2048_v20 = vrot.slane %v5069_v4, 1  ;;  %v1794_v63 = vadd.f32 %v4910_v27, %v1750_v60  ;;  %v1751_v42 = vadd.f32 %v1687_v59, %v4934_v32  ;;  %vm6056_vm3 = vnez %v6055_v39 }
 0x217   :  { %v5083_v62 = vmax.f32 %v1793_v31, 0.0  ;;  %3310 = vmatprep.mubr.msk.bf16.mxu0 %vm6056_vm3, %v3309_v46  ;;  %v1691_v7 = vpop.f32.mrf.mxu1  ;;  %v2097_v19 = vsel %vm6057_vm2, %v2045_v23, %v2047_v44  ;;  %v5091_v55 = vsel %vm6058_vm1, %v1853_v5, %v1855_v25  ;;  %v5099_v32 = vsel %vm6059_vm15, %v1852_v56, %v5845_v13  ;;  %vm6077_vm2 = vmmov %vm6058_vm1 }
 0x218   :  { %v5101_v49 = vmax.f32 %v1794_v63, 0.0  ;;  %v1795_v48 = vadd.f32 %v4912_v41, %v1751_v42  ;;  %3313 = vmatmul.mubr.msk.bf16.vlgmr.msra.gmra.mxu0 %vm6056_vm3, %v3312_v0  ;;  %v1752_v23 = vadd.f32 %v1691_v7, %v4937_v45  ;;  %v2094_v5 = vsel %vm6060_vm14, %v2046_v33, %v2048_v20  ;;  %v3859_v33 = vld [vmem:[#allocation5 + $0xe8] sm:$0xff]   ;;  %vm6075_vm3 = vmmov %vm6058_vm1 }
 0x219   :  { %6054 = vst [vmem:[#allocation11_spill] sm:$0xff] %v5083_v62  ;;  %v1857_v60 = vrot.slane %v5083_v62, 7  ;;  %v2049_v31 = vrot.slane %v5083_v62, 1  ;;  %3584 = vmatpush3.bf16.msra.mxu0 %v3852_v17  ;;  %v1693_v59 = vpop.f32.mrf.mxu1  ;;  %v3318_v46 = vpack.c.bf16 %v2094_v5, %v2096_v50  ;;  %v1856_v42 = vrot.slane %v5069_v4, 7  ;;  %vm6078_vm1 = vmmov %vm6073_vm0 }
 0x21a   :  { %v2050_v0 = vrot.slane %v5101_v49, 1  ;;  %v5115_v39 = vmax.f32 %v1795_v48, 0.0  ;;  %v1796_v45 = vadd.f32 %v4910_v27, %v1752_v23  ;;  %3585 = vmatprep.subr.bf16.mxu0 %v3855_v6  ;;  %v1753_v7 = vadd.f32 %v1693_v59, %v4940_v52  ;;  %vm6081_vm14 = vmmov %vm6073_vm0 }
 0x21b   :  { %v1695_v9 = vpop.f32.mrf.mxu1  ;;  %v2095_v17 = vsel %vm6062_vm6, %v2047_v44, %v2049_v31  ;;  %v5127_v50 = vsel %vm6063_vm4, %v1850_v38, %v1852_v56  ;;  %v5131_v48 = vsel %vm6064_vm7, %v1855_v25, %v1857_v60  ;;  %v3860_v56 = vld [vmem:[#allocation5 + $0xa8] sm:$0xff]   ;;  %v5847_v13 = vrot.slane %v5101_v49, 7  ;;  %vm6083_vm6 = vmmov %vm6077_vm2 }
 0x21c   :  { %6061 = vst [vmem:[#allocation14_spill] sm:$0xff] %v5115_v39  ;;  %v2051_v52 = vrot.slane %v5115_v39, 1  ;;  %v5135_v23 = vmax.f32 %v1796_v45, 0.0  ;;  %v1754_v44 = vadd.f32 %v1695_v9, %v4943_v28  ;;  %v1797_v5 = vadd.f32 %v4912_v41, %v1753_v7  ;;  %v3863_v9 = vld [vmem:[#allocation5 + $0xe0] sm:$0xff]   ;;  %vm6085_vm4 = vmmov %vm6077_vm2 }
 0x21d   :  { %v1697_v59 = vpop.f32.mrf.mxu1  ;;  %v3315_v63 = vpack.c.bf16 %v2095_v17, %v2097_v19  ;;  %3586 = vmatpush3.bf16.msra.mxu0 %v3856_v57  ;;  %v5141_v38 = vsel %vm6066_vm10, %v2048_v20, %v2050_v0  ;;  %v6068_v57 = vld [vmem:[#allocation28_spill] sm:$0xff]  ;;  %v6071_v17 = vrot.slane %v5115_v39, 7  ;;  %vm6087_vm7 = vmmov %vm6073_vm0 }
 0x21e   :  { %6065 = vst [vmem:[#allocation17_spill] sm:$0xff] %v5135_v23  ;;  %v2052_v45 = vrot.slane %v5135_v23, 1  ;;  %v1798_v6 = vadd.f32 %v4910_v27, %v1754_v44  ;;  %v1755_v28 = vadd.f32 %v1697_v59, %v4949_v54  ;;  %3587 = vmatprep.subr.bf16.mxu0 %v3859_v33  ;;  %v5149_v19 = vmax.f32 %v1797_v5, 0.0  ;;  %vm6088_vm10 = vmmov %vm6073_vm0 }
 0x21f   :  { %vm6069_vm13 = vnez %v6068_v57  ;;  %v1701_v20 = vpop.f32.mrf.mxu1  ;;  %v2093_v7 = vsel %vm6070_vm8, %v2049_v31, %v2051_v52  ;;  %v5159_v25 = vsel %vm6072_vm12, %v1857_v60, %v6071_v17  ;;  %vm6092_vm8 = vmmov %vm6077_vm2 }
 0x220   :  { %6067 = vst [vmem:[#allocation22_spill] sm:$0xff] %v5149_v19  ;;  %3316 = vmatprep.mubr.msk.bf16.mxu0 %vm6069_vm13, %v3315_v63  ;;  %v5163_v33 = vmax.f32 %v1798_v6, 0.0  ;;  %v1799_v44 = vadd.f32 %v4912_v41, %v1755_v28  ;;  %v1756_v63 = vadd.f32 %v1701_v20, %v4952_v53  ;;  %v2090_v31 = vsel %vm6073_vm0, %v2050_v0, %v2052_v45  ;;  %v3864_v6 = vld [vmem:[#allocation5 + $0xa0] sm:$0xff]   ;;  %v3867_v20 = vld [vmem:[#allocation5 + $0xd8] sm:$0xff]  }
 0x221   :  { %3319 = vmatmul.mubr.msk.bf16.gmra.mxu0 %vm6069_vm13, %v3318_v46  ;;  %v2053_v60 = vrot.slane %v5149_v19, 1  ;;  %v1703_v59 = vpop.f32.mrf.mxu1  ;;  %v3324_v17 = vpack.c.bf16 %v2090_v31, %v5141_v38  ;;  %v1861_v57 = vrot.slane %v5149_v19, 7  ;;  %v6076_v31 = vrot.slane %v5042_v3, 7  ;;  %vm6089_vm13 = vmmov %vm6073_vm0 }
 0x222   :  { %3588 = vmatpush3.bf16.msra.mxu0 %v3860_v56  ;;  %v2054_v46 = vrot.slane %v5163_v33, 1  ;;  %v5178_v53 = vmax.f32 %v1799_v44, 0.0  ;;  %v1800_v0 = vadd.f32 %v4910_v27, %v1756_v63  ;;  %v1757_v54 = vadd.f32 %v1703_v59, %v4955_v51 }
 0x223   :  { %3589 = vmatprep.subr.bf16.mxu0 %v3863_v9  ;;  %v1705_v5 = vpop.f32.mrf.mxu1  ;;  %v2091_v38 = vsel %vm6074_vm9, %v2051_v52, %v2053_v60  ;;  %v5188_v56 = vsel %vm6075_vm3, %v1856_v42, %v5847_v13  ;;  %v5194_v44 = vsel %vm6077_vm2, %v6076_v31, %v1856_v42  ;;  %v6090_v29 = vrot.slane %v5163_v33, 7  ;;  %vm6096_vm9 = vmmov %vm6077_vm2 }
 0x224   :  { %v2055_v51 = vrot.slane %v5178_v53, 1  ;;  %v5198_v63 = vmax.f32 %v1800_v0, 0.0  ;;  %v1758_v52 = vadd.f32 %v1705_v5, %v4958_v40  ;;  %v1801_v59 = vadd.f32 %v4912_v41, %v1757_v54  ;;  %v3871_v54 = vld [vmem:[#allocation5 + $0xd0] sm:$0xff]   ;;  %v6079_v5 = vld [vmem:[#allocation29_spill] sm:$0xff]  ;;  %vm6099_vm3 = vmmov %vm6077_vm2 }
 0x225   :  { %v1707_v28 = vpop.f32.mrf.mxu1  ;;  %v3321_v34 = vpack.c.bf16 %v2091_v38, %v2093_v7  ;;  %v5204_v13 = vsel %vm6078_vm1, %v2052_v45, %v2054_v46  ;;  %vm6080_vm15 = vnez %v6079_v5  ;;  %v6082_v38 = vrot.slane %v5178_v53, 7  ;;  %vm6100_vm2 = vmmov %vm6073_vm0 }
 0x226   :  { %3590 = vmatpush3.bf16.msra.mxu0 %v3864_v6  ;;  %v2056_v0 = vrot.slane %v5198_v63, 1  ;;  %v1802_v9 = vadd.f32 %v4910_v27, %v1758_v52  ;;  %v1759_v40 = vadd.f32 %v1707_v28, %v4961_v21  ;;  %v5212_v7 = vmax.f32 %v1801_v59, 0.0  ;;  %vm6101_vm1 = vmmov %vm6073_vm0 }
 0x227   :  { %3591 = vmatprep.subr.bf16.mxu0 %v3867_v20  ;;  %3322 = vmatprep.mubr.msk.bf16.mxu0 %vm6080_vm15, %v3321_v34  ;;  %v1711_v45 = vpop.f32.mrf.mxu1  ;;  %v2089_v6 = vsel %vm6081_vm14, %v2053_v60, %v2055_v51  ;;  %v5222_v42 = vsel %vm6083_vm6, %v1861_v57, %v6082_v38  ;;  %v6084_v52 = vrot.slane %v5115_v39, 7  ;;  %vm6104_vm14 = vmmov %vm6073_vm0 }
 0x228   :  { %v5230_v28 = vmax.f32 %v1802_v9, 0.0  ;;  %v1803_v34 = vadd.f32 %v4912_v41, %v1759_v40  ;;  %v1760_v60 = vadd.f32 %v1711_v45, %v4963_v2  ;;  %v2086_v20 = vsel %vm6087_vm7, %v2054_v46, %v2056_v0  ;;  %v3872_v9 = vld [vmem:[#allocation5 + $0x90] sm:$0xff]   ;;  %v3875_v45 = vld [vmem:[#allocation5 + $0xc8] sm:$0xff]   ;;  %vm6110_vm7 = vmmov %vm6099_vm3 }
 0x229   :  { %v5228_v21 = vsel %vm6085_vm4, %v6084_v52, %v1861_v57  ;;  %3325 = vmatmul.mubr.msk.bf16.gmra.mxu0 %vm6080_vm15, %v3324_v17  ;;  %v2057_v38 = vrot.slane %v5212_v7, 1  ;;  %v1713_v31 = vpop.f32.mrf.mxu1  ;;  %v3330_v57 = vpack.c.bf16 %v2086_v20, %v5204_v13  ;;  %v1865_v5 = vrot.slane %v5212_v7, 7  ;;  %v3877_v13 = vld [vmem:[#allocation5 + $0x88] sm:$0xff]   ;;  %vm6103_vm15 = vmmov %vm6099_vm3 }
 0x22a   :  { %6086 = vst [vmem:[#allocation18_spill] sm:$0xff] %v5228_v21  ;;  %3592 = vmatpush3.bf16.msra.mxu0 %v3868_v8  ;;  %v2058_v17 = vrot.slane %v5230_v28, 1  ;;  %v5245_v2 = vmax.f32 %v1803_v34, 0.0  ;;  %v1804_v46 = vadd.f32 %v4910_v27, %v1760_v60  ;;  %v1761_v52 = vadd.f32 %v1713_v31, %v4969_v26  ;;  %vm6107_vm4 = vmmov %vm6073_vm0 }
 0x22b   :  { %3593 = vmatprep.subr.bf16.mxu0 %v3871_v54  ;;  %v1715_v59 = vpop.f32.mrf.mxu1  ;;  %v2087_v8 = vsel %vm6088_vm10, %v2055_v51, %v2057_v38  ;;  %v6091_v20 = vrot.slane %v5135_v23, 7  ;;  %vm6112_vm10 = vmmov %vm6073_vm0  ;;  %v6143_v23 = vrot.slane %v4965_v14, 1 }
 0x22c   :  { %v2059_v34 = vrot.slane %v5245_v2, 1  ;;  %v5257_v21 = vmax.f32 %v1804_v46, 0.0  ;;  %v1762_v54 = vadd.f32 %v1715_v59, %v4972_v1  ;;  %v1805_v26 = vadd.f32 %v4912_v41, %v1761_v52  ;;  %v6093_v52 = vld [vmem:[#allocation30_spill] sm:$0xff] }
 0x22d   :  { %v1717_v31 = vpop.f32.mrf.mxu1  ;;  %v3327_v60 = vpack.c.bf16 %v2087_v8, %v2089_v6  ;;  %v2084_v51 = vsel %vm6089_vm13, %v2056_v0, %v2058_v17  ;;  %v5269_v40 = vsel %vm6092_vm8, %v6091_v20, %v6090_v29  ;;  %v3879_v0 = vld [vmem:[#allocation5 + $0xc0] sm:$0xff]   ;;  %vm6094_vm12 = vnez %v6093_v52  ;;  %vm6115_vm13 = vmmov %vm6099_vm3 }
 0x22e   :  { %3594 = vmatpush3.bf16.msra.mxu0 %v3872_v9  ;;  %v2060_v1 = vrot.slane %v5257_v21, 1  ;;  %v1806_v59 = vadd.f32 %v4910_v27, %v1762_v54  ;;  %v1763_v6 = vadd.f32 %v1717_v31, %v4974_v18  ;;  %v5275_v9 = vmax.f32 %v1805_v26, 0.0  ;;  %vm6117_vm8 = vmmov %vm6073_vm0 }
 0x22f   :  { %3595 = vmatprep.subr.bf16.mxu0 %v3875_v45  ;;  %3328 = vmatprep.mubr.msk.bf16.mxu0 %vm6094_vm12, %v3327_v60  ;;  %v1721_v8 = vpop.f32.mrf.mxu1  ;;  %v2085_v29 = vsel %vm6073_vm0, %v2057_v38, %v2059_v34  ;;  %v6095_v46 = vrot.slane %v5101_v49, 7  ;;  %v6098_v18 = vrot.slane %v5245_v2, 7 }
 0x230   :  { %v5295_v26 = vmax.f32 %v1806_v59, 0.0  ;;  %v1807_v31 = vadd.f32 %v4912_v41, %v1763_v6  ;;  %v1764_v38 = vadd.f32 %v1721_v8, %v4980_v47  ;;  %v2082_v60 = vsel %vm6100_vm2, %v2058_v17, %v2060_v1  ;;  %vm6124_vm2 = vmmov %vm6073_vm0 }
 0x231   :  { %v5287_v54 = vsel %vm6096_vm9, %v6095_v46, %v6091_v20  ;;  %v5293_v45 = vsel %vm6099_vm3, %v1865_v5, %v6098_v18  ;;  %3331 = vmatmul.mubr.msk.bf16.gmra.mxu0 %vm6094_vm12, %v3330_v57  ;;  %v2061_v20 = vrot.slane %v5275_v9, 1  ;;  %v1723_v62 = vpop.f32.mrf.mxu1  ;;  %v3336_v39 = vpack.c.bf16 %v2082_v60, %v2084_v51  ;;  %v3880_v18 = vld [vmem:[#allocation5 + $0x80] sm:$0xff]   ;;  %vm6119_vm12 = vmmov %vm6099_vm3 }
 0x232   :  { %6097 = vst [vmem:[#allocation19_spill] sm:$0xff] %v5287_v54  ;;  %3596 = vmatpush3.bf16.msra.mxu0 %v3877_v13  ;;  %v1869_v6 = vrot.slane %v5275_v9, 7  ;;  %v2062_v57 = vrot.slane %v5295_v26, 1  ;;  %v5309_v52 = vmax.f32 %v1807_v31, 0.0  ;;  %v1808_v47 = vadd.f32 %v4910_v27, %v1764_v38  ;;  %vm6121_vm9 = vmmov %vm6099_vm3 }
 0x233   :  { %3597 = vmatprep.subr.bf16.mxu0 %v3879_v0  ;;  %v1765_v17 = vadd.f32 %v1723_v62, %v4986_v16  ;;  %v1725_v8 = vpop.f32.mrf.mxu1  ;;  %v2083_v51 = vsel %vm6101_vm1, %v2059_v34, %v2061_v20  ;;  %v6102_v13 = vrot.slane %v5178_v53, 7  ;;  %vm6125_vm1 = vmmov %vm6073_vm0 }
 0x234   :  { %v2063_v38 = vrot.slane %v5309_v52, 1  ;;  %v5325_v0 = vmax.f32 %v1808_v47, 0.0  ;;  %v1766_v16 = vadd.f32 %v1725_v8, %v4997_v58  ;;  %v3333_v46 = vpack.c.bf16 %v2083_v51, %v2085_v29 }
 0x235   :  { %v5319_v60 = vsel %vm6103_vm15, %v6102_v13, %v1865_v5  ;;  %v1809_v62 = vadd.f32 %v4912_v41, %v1765_v17  ;;  %v1727_v34 = vpop.f32.mrf.mxu1  ;;  %v2080_v54 = vsel %vm6104_vm14, %v2060_v1, %v2062_v57  ;;  %v6105_v17 = vld [vmem:[#allocation33_spill] sm:$0xff]  ;;  %v6108_v8 = vrot.slane %v5230_v28, 7  ;;  %vm6128_vm15 = vmmov %vm6110_vm7 }
 0x236   :  { %3598 = vmatpush3.bf16.msra.mxu0 %v3880_v18  ;;  %v2064_v59 = vrot.slane %v5325_v0, 1  ;;  %v1810_v47 = vadd.f32 %v4910_v27, %v1766_v16  ;;  %v1767_v31 = vadd.f32 %v1727_v34, %v5019_v22  ;;  %vm6106_vm6 = vnez %v6105_v17  ;;  %vm6131_vm14 = vmmov %vm6110_vm7 }
 0x237   :  { %v5337_v58 = vmax.f32 %v1809_v62, 0.0  ;;  %3334 = vmatprep.mubr.msk.bf16.mxu0 %vm6106_vm6, %v3333_v46  ;;  %v1731_v29 = vpop.f32.mrf.mxu1  ;;  %v2081_v1 = vsel %vm6107_vm4, %v2061_v20, %v2063_v38  ;;  %v6109_v51 = vrot.slane %v5198_v63, 7  ;;  %vm6133_vm4 = vmmov %vm6110_vm7 }
 0x238   :  { %v5353_v22 = vmax.f32 %v1810_v47, 0.0  ;;  %v1811_v62 = vadd.f32 %v4912_v41, %v1767_v31  ;;  %v1768_v46 = vadd.f32 %v1731_v29, %v5024_v43  ;;  %v2078_v20 = vsel %vm6112_vm10, %v2062_v57, %v2064_v59  ;;  %vm6137_vm10 = vmmov %vm6133_vm4 }
 0x239   :  { %v5351_v16 = vsel %vm6110_vm7, %v6109_v51, %v6108_v8  ;;  %3337 = vmatmul.mubr.msk.bf16.gmra.mxu0 %vm6106_vm6, %v3336_v39  ;;  %v2065_v18 = vrot.slane %v5337_v58, 1  ;;  %v1733_v5 = vpop.f32.mrf.mxu1  ;;  %v3342_v13 = vpack.c.bf16 %v2078_v20, %v2080_v54  ;;  %v6113_v8 = vmov %v6109_v51  ;;  %vm6132_vm6 = vmmov %vm6073_vm0 }
 0x23a   :  { %6111 = vst [vmem:[#allocation20_spill] sm:$0xff] %v5351_v16  ;;  %v6114_v47 = vrot.slane %v5163_v33, 7  ;;  %v1873_v39 = vrot.slane %v5337_v58, 7  ;;  %v2066_v43 = vrot.slane %v5353_v22, 1  ;;  %v5373_v17 = vmax.f32 %v1811_v62, 0.0  ;;  %vm6135_vm7 = vmmov %vm6133_vm4 }
 0x23b   :  { %v1812_v57 = vadd.f32 %v4910_v27, %v1768_v46  ;;  %v1769_v29 = vadd.f32 %v1733_v5, %v5050_v24  ;;  %v1735_v51 = vpop.f32.mrf.mxu1  ;;  %v2079_v54 = vsel %vm6117_vm8, %v2063_v38, %v2065_v18  ;;  %vm6140_vm8 = vmmov %vm6073_vm0 }
 0x23c   :  { %v5369_v31 = vsel %vm6115_vm13, %v6114_v47, %v6113_v8  ;;  %v6118_v8 = vrot.slane %v5309_v52, 7  ;;  %v2067_v34 = vrot.slane %v5373_v17, 1  ;;  %v1770_v24 = vadd.f32 %v1735_v51, %v5057_v11  ;;  %vm6138_vm13 = vmmov %vm6073_vm0 }
 0x23d   :  { %6116 = vst [vmem:[#allocation21_spill] sm:$0xff] %v5369_v31  ;;  %v5389_v46 = vmax.f32 %v1812_v57, 0.0  ;;  %v1813_v5 = vadd.f32 %v4912_v41, %v1769_v29  ;;  %v1737_v38 = vpop.f32.mrf.mxu1  ;;  %v3339_v19 = vpack.c.bf16 %v2079_v54, %v2081_v1  ;;  %v2076_v20 = vsel %vm6073_vm0, %v2064_v59, %v2066_v43  ;;  %v6122_v1 = vld [vmem:[#allocation35_spill] sm:$0xff] }
 0x23e   :  { %v5385_v47 = vsel %vm6119_vm12, %v1869_v6, %v6118_v8  ;;  %v6120_v31 = vrot.slane %v5245_v2, 7  ;;  %v5857_v62 = vrot.slane %v5373_v17, 7  ;;  %v1814_v16 = vadd.f32 %v4910_v27, %v1770_v24 }
 0x23f   :  { %v2068_v57 = vrot.slane %v5389_v46, 1  ;;  %v1771_v11 = vadd.f32 %v1737_v38, %v5079_v35  ;;  %v5405_v29 = vmax.f32 %v1813_v5, 0.0  ;;  %vm6123_vm3 = vnez %v6122_v1 }
 0x240   :  { %v5399_v8 = vsel %vm6121_vm9, %v6120_v31, %v1869_v6  ;;  %3340 = vmatprep.mubr.msk.bf16.mxu0 %vm6123_vm3, %v3339_v19  ;;  %v2077_v59 = vsel %vm6124_vm2, %v2065_v18, %v2067_v34  ;;  %v5415_v51 = vmax.f32 %v1814_v16, 0.0  ;;  %v1969_v19 = vpack.c.bf16 %v5245_v2, %v5212_v7  ;;  %v6141_v6 = vld [vmem:[#allocation37_spill] sm:$0xff]  ;;  %vm6144_vm9 = vmmov %vm6073_vm0 }
 0x241   :  { %v1815_v27 = vadd.f32 %v4912_v41, %v1771_v11  ;;  %3343 = vmatmul.mubr.msk.bf16.gmra.mxu0 %vm6123_vm3, %v3342_v13  ;;  %v2074_v35 = vsel %vm6125_vm1, %v2066_v43, %v2068_v57  ;;  %v1876_v18 = vrot.slane %v5389_v46, 7  ;;  %v2069_v54 = vrot.slane %v5405_v29, 1  ;;  %vm6146_vm3 = vmmov %vm6133_vm4 }
 0x242   :  { %v3348_v24 = vpack.c.bf16 %v2074_v35, %v2076_v20  ;;  %v6126_v5 = vrot.slane %v5295_v26, 7  ;;  %v6127_v16 = vrot.slane %v5257_v21, 7  ;;  %v1878_v13 = vrot.slane %v5415_v51, 7  ;;  %vm6149_vm2 = vmmov %vm6146_vm3 }
 0x243   :  { %v2070_v38 = vrot.slane %v5415_v51, 1  ;;  %v5434_v43 = vmax.f32 %v1815_v27, 0.0  ;;  %v6130_v2 = vrot.slane %v5230_v28, 7  ;;  %v2075_v11 = vsel %vm6132_vm6, %v2067_v34, %v2069_v54  ;;  %vm6152_vm1 = vmmov %vm6149_vm2 }
 0x244   :  { %v1888_v41 = vsel %vm6128_vm15, %v6127_v16, %v6126_v5  ;;  %v6129_v7 = vmov %v6127_v16  ;;  %v1885_v35 = vsel %vm6133_vm4, %v1873_v39, %v5857_v62  ;;  %v6134_v5 = vrot.slane %v5309_v52, 7  ;;  %vm6157_vm6 = vmmov %vm6152_vm1 }
 0x245   :  { %v1890_v20 = vsel %vm6131_vm14, %v6130_v2, %v6129_v7  ;;  %v6136_v16 = vrot.slane %v4945_v10, 7  ;;  %v1879_v7 = vrot.slane %v5434_v43, 7  ;;  %v2071_v34 = vrot.slane %v5434_v43, 1  ;;  %vm6159_vm4 = vmmov %vm6152_vm1 }
 0x246   :  { %v3422_v1 = vpack.c.bf16 %v1888_v41, %v1890_v20  ;;  %v1887_v27 = vsel %vm6135_vm7, %v6134_v5, %v1873_v39  ;;  %v3345_v41 = vpack.c.bf16 %v2075_v11, %v2077_v59  ;;  %v2072_v20 = vsel %vm6138_vm13, %v2068_v57, %v2070_v38 }
 0x247   :  { %v1910_v31 = vsel %vm6137_vm10, %v1878_v13, %v6136_v16  ;;  %v6139_v62 = vrot.slane %v4945_v10, 1  ;;  %v3425_v5 = vpack.c.bf16 %v1885_v35, %v1887_v27  ;;  %vm6142_vm12 = vnez %v6141_v6 }
 0x248   :  { %v3392_v2 = vpack.c.bf16 %v5005_v37, %v1910_v31  ;;  %3346 = vmatprep.mubr.msk.bf16.mxu0 %vm6142_vm12, %v3345_v41  ;;  %v2073_v16 = vsel %vm6073_vm0, %v2069_v54, %v2071_v34  ;;  %v2103_v37 = vsel %vm6144_vm9, %v2071_v34, %v6143_v23  ;;  %v6145_v59 = vrot.slane %v4965_v14, 7  ;;  %vm6199_vm0 = vmmov %vm6152_vm1 }
 0x249   :  { %v2102_v39 = vsel %vm6140_vm8, %v2070_v38, %v6139_v62  ;;  %v3351_v11 = vpack.c.bf16 %v2103_v37, %v2073_v16  ;;  %v1968_v38 = vpack.c.bf16 %v5230_v28, %v5198_v63  ;;  %v1971_v54 = vpack.c.bf16 %v5309_v52, %v5275_v9  ;;  %3349 = vmatmul.mubr.msk.bf16.gmra.mxu0 %vm6142_vm12, %v3348_v24  ;;  %v6153_v28 = vld [vmem:[#allocation13_spill] sm:$0xff]  ;;  %v6155_v9 = vld [vmem:[#allocation31_spill] sm:$0xff]  ;;  %vm6201_vm9 = vmmov %vm6199_vm0 }
 0x24a   :  { %v1911_v57 = vsel %vm6146_vm3, %v1879_v7, %v6145_v59  ;;  %v3354_v31 = vpack.c.bf16 %v2102_v39, %v2072_v20  ;;  %v6147_v23 = vrot.slane %v5353_v22, 7  ;;  %v6148_v35 = vrot.slane %v5325_v0, 7  ;;  %v6182_v59 = vld [vmem:[#allocation19_spill] sm:$0xff] }
 0x24b   :  { %v3389_v62 = vpack.c.bf16 %v5038_v36, %v1911_v57  ;;  %v6151_v36 = vrot.slane %v5295_v26, 7  ;;  %vm6154_vm15 = vnez %v6153_v28  ;;  %vm6156_vm14 = vnez %v6155_v9  ;;  %v6188_v57 = vld [vmem:[#allocation22_spill] sm:$0xff] }
 0x24c   :  { %v1884_v27 = vsel %vm6149_vm2, %v6148_v35, %v6147_v23  ;;  %v6150_v34 = vmov %v6148_v35  ;;  %3352 = vmatprep.mubr.msk.bf16.mxu0 %vm6154_vm15, %v3351_v11  ;;  %v1970_v6 = vpack.c.bf16 %v5295_v26, %v5257_v21  ;;  %v1973_v24 = vpack.c.bf16 %v5373_v17, %v5337_v58  ;;  %v6161_v26 = vld [vmem:[#allocation32_spill] sm:$0xff] }
 0x24d   :  { %v1886_v63 = vsel %vm6152_vm1, %v6151_v36, %v6150_v34  ;;  %3390 = vmatprep.mubr.msk.bf16.mxu1 %vm6156_vm14, %v3389_v62  ;;  %v1880_v41 = vsel %vm6157_vm6, %v1876_v18, %v1878_v13  ;;  %v6158_v20 = vmov %v6147_v23  ;;  %v1972_v16 = vpack.c.bf16 %v5353_v22, %v5325_v0  ;;  %v6166_v0 = vld [vmem:[#allocation34_spill] sm:$0xff]  ;;  %v6190_v11 = vld [vmem:[#allocation20_spill] sm:$0xff]  ;;  %v6191_v62 = vld [vmem:[#allocation21_spill] sm:$0xff] }
 0x24e   :  { %v3428_v52 = vpack.c.bf16 %v1884_v27, %v1886_v63  ;;  %3393 = vmatmul.mubr.msk.bf16.vlgmr.msra.gmra.mxu1 %vm6156_vm14, %v3392_v2  ;;  %v1882_v39 = vsel %vm6159_vm4, %v6158_v20, %v1876_v18  ;;  %v6160_v21 = vpack.c.bf16 %v5091_v55, %v5065_v61  ;;  %vm6162_vm7 = vnez %v6161_v26  ;;  %v6196_v23 = vld [vmem:[#allocation17_spill] sm:$0xff] }
 0x24f   :  { %v3434_v2 = vpack.c.bf16 %v1880_v41, %v1882_v39  ;;  %v1975_v58 = vpack.c.bf16 %v5434_v43, %v5405_v29  ;;  %v1974_v13 = vpack.c.bf16 %v5415_v51, %v5389_v46  ;;  %v6163_v18 = vpack.c.bf16 %v4994_v30, %v4965_v14  ;;  %v6169_v46 = vld [vmem:[#allocation27_spill] sm:$0xff]  ;;  %v6170_v51 = vld [vmem:[#allocation26_spill] sm:$0xff] }
 0x250   :  { %3396 = vmatprep.mubr.msk.bf16.mxu1 %vm6162_vm7, %v6160_v21  ;;  %v6164_v61 = vpack.c.bf16 %v5099_v32, %v5127_v50  ;;  %v6165_v55 = vpack.c.bf16 %v5159_v25, %v5131_v48  ;;  %vm6167_vm10 = vnez %v6166_v0  ;;  %v6168_v22 = vpack.c.bf16 %v4977_v15, %v4945_v10  ;;  %v6173_v32 = vld [vmem:[#allocation18_spill] sm:$0xff]  ;;  %v6175_v48 = vld [vmem:[#allocation36_spill] sm:$0xff]  ;;  %v6180_v43 = vld [vmem:[#allocation11_spill] sm:$0xff] }
 0x251   :  { %3355 = vmatmul.mubr.msk.bf16.gmra.mxu0 %vm6154_vm15, %v3354_v31  ;;  %v6171_v14 = vpack.c.bf16 %v6169_v46, %v6170_v51  ;;  %v6172_v30 = vpack.c.bf16 %v5188_v56, %v5194_v44  ;;  %v6174_v50 = vpack.c.bf16 %v5222_v42, %v6173_v32  ;;  %vm6176_vm13 = vnez %v6175_v48  ;;  %v6177_v25 = vld [vmem:[#allocation24_spill] sm:$0xff]  ;;  %v6179_v15 = vld [vmem:[#allocation14_spill] sm:$0xff] }
 0x252   :  { %2698 = vmatprep.mubr.bf16.mxu0 %v6163_v18  ;;  %v6178_v10 = vpack.c.bf16 %v5042_v3, %v6177_v25  ;;  %v6181_v37 = vpack.c.bf16 %v6179_v15, %v6180_v43  ;;  %v6183_v56 = vpack.c.bf16 %v5269_v40, %v6182_v59  ;;  %v6184_v44 = vpack.c.bf16 %v5293_v45, %v5319_v60  ;;  %v6185_v42 = vld [vmem:[#allocation12_spill] sm:$0xff]  ;;  %v6194_v60 = vld [vmem:[#allocation38_spill] sm:$0xff] }
 0x253   :  { %vm6186_vm8 = vnez %v6185_v42  ;;  %v6187_v3 = vpack.c.bf16 %v5101_v49, %v5069_v4  ;;  %v6189_v31 = vpack.c.bf16 %v5178_v53, %v6188_v57  ;;  %v6192_v40 = vpack.c.bf16 %v6190_v11, %v6191_v62  ;;  %v3884_v39 = vld [vmem:[%s5747_s7 + $0x20] sm:$0xff]   ;;  %v3886_v0 = vld [vmem:[%s5747_s7 + $0x10] sm:$0xff]  }
 0x254   :  { %v6193_v45 = vpack.c.bf16 %v5385_v47, %v5399_v8  ;;  %vm6195_vm12 = vnez %v6194_v60  ;;  %v6197_v4 = vpack.c.bf16 %v5163_v33, %v6196_v23  ;;  %v1877_v53 = vrot.slane %v5405_v29, 7  ;;  %v3888_v48 = vld [vmem:[%s5747_s7] sm:$0xff]  }
 0x255   :  { %v6200_v47 = vrot.slane %v5373_v17, 7  ;;  %v3962_v17 = vmov 0.0   ;;  %vm2980_vm3 = vcmask 1042434   ;;  %vm2982_vm2 = vcmask 1043459  }
 0x256   :  { %3399 = vmatmul.mubr.msk.bf16.gmra.mxu1 %vm6162_vm7, %v6164_v61  ;;  %v1881_v35 = vsel %vm6199_vm0, %v1877_v53, %v1879_v7  ;;  %3674 = vmatprep.subr.bf16.mxu1 %v3962_v17  ;;  %v3885_v61 = vld [vmem:[%s5747_s7 + $0x18] sm:$0xff]   ;;  %vm2984_vm1 = vcmask 1044484   ;;  %vm2986_vm15 = vcmask 1045509   ;;  %vm2988_vm14 = vcmask 1046534  }
 0x257   :  { %3402 = vmatprep.mubr.msk.bf16.mxu1 %vm6167_vm10, %v6165_v55  ;;  %v1883_v8 = vsel %vm6201_vm9, %v6200_v47, %v1877_v53  ;;  %3675 = vmatpush3.bf16.msra.mxu1 %v3881_v12  ;;  %vm2990_vm6 = vcmask 1047559  }
 0x258   :  { %v3431_v33 = vpack.c.bf16 %v1881_v35, %v1883_v8  ;;  %3676 = vmatprep.subr.bf16.mxu1 %v3962_v17 }
 0x259   :  { %2699 = vmatmul.mubr.bf16.vlgmr.msra.gmra.mxu0 %v6168_v22 }
 0x25a   :  { %2706 = vmatprep.mubr.bf16.mxu0 %v6171_v14  ;;  %v3887_v14 = vld [vmem:[%s5747_s7 + $0x8] sm:$0xff]  }
 0x25e   :  { %3405 = vmatmul.mubr.msk.bf16.gmra.mxu1 %vm6167_vm10, %v6172_v30 }
 0x25f   :  { %3408 = vmatprep.mubr.msk.bf16.mxu1 %vm6176_vm13, %v6174_v50 }
 0x261   :  { %2707 = vmatmul.mubr.bf16.gmra.mxu0 %v6178_v10 }
 0x262   :  { %2714 = vmatprep.mubr.bf16.mxu0 %v6181_v37 }
 0x266   :  { %3411 = vmatmul.mubr.msk.bf16.gmra.mxu1 %vm6176_vm13, %v6183_v56 }
 0x267   :  { %3414 = vmatprep.mubr.msk.bf16.mxu1 %vm6186_vm8, %v6184_v44 }
 0x269   :  { %2715 = vmatmul.mubr.bf16.gmra.mxu0 %v6187_v3 }
 0x26a   :  { %2722 = vmatprep.mubr.bf16.mxu0 %v6189_v31 }
 0x26e   :  { %3417 = vmatmul.mubr.msk.bf16.gmra.mxu1 %vm6186_vm8, %v6192_v40 }
 0x26f   :  { %3420 = vmatprep.mubr.msk.bf16.mxu1 %vm6195_vm12, %v6193_v45 }
 0x271   :  { %2723 = vmatmul.mubr.bf16.gmra.mxu0 %v6197_v4 }
 0x272   :  { %2730 = vmatprep.mubr.bf16.mxu0 %v1969_v19 }
 0x276   :  { %3423 = vmatmul.mubr.msk.bf16.gmra.mxu1 %vm6195_vm12, %v3422_v1 }
 0x277   :  { %3426 = vmatprep.mubr.msk.bf16.mxu1 %vm4761_vm5, %v3425_v5 }
 0x279   :  { %2731 = vmatmul.mubr.bf16.gmra.mxu0 %v1968_v38 }
 0x27a   :  { %2738 = vmatprep.mubr.bf16.mxu0 %v1971_v54  ;;  %v3882_v54 = vld [vmem:[%s5747_s7 + $0x30] sm:$0xff]  }
 0x27b   :  { %3677 = vmatpush3.bf16.msra.mxu1 %v3882_v54 }
 0x27c   :  { %3678 = vmatprep.subr.bf16.mxu1 %v3962_v17 }
 0x27e   :  { %3429 = vmatmul.mubr.msk.bf16.gmra.mxu1 %vm4761_vm5, %v3428_v52  ;;  %v3883_v52 = vld [vmem:[%s5747_s7 + $0x28] sm:$0xff]   ;;  %vm3963_vm5 = vmmov 0  }
 0x27f   :  { %3432 = vmatprep.mubr.msk.bf16.mxu1 %vm4790_vm11, %v3431_v33  ;;  %3679 = vmatpush3.bf16.msra.mxu1 %v3883_v52 }
 0x280   :  { %3680 = vmatprep.subr.bf16.mxu1 %v3962_v17 }
 0x281   :  { %2739 = vmatmul.mubr.bf16.gmra.mxu0 %v1970_v6 }
 0x282   :  { %2746 = vmatprep.mubr.bf16.mxu0 %v1973_v24 }
 0x283   :  { %3681 = vmatpush3.bf16.msra.mxu1 %v3884_v39 }
 0x284   :  { %3682 = vmatprep.subr.bf16.mxu1 %v3962_v17 }
 0x286   :  { %3435 = vmatmul.mubr.msk.bf16.gmra.mxu1 %vm4790_vm11, %v3434_v2  ;;  %vm2978_vm11 = vcmask 1041409  }
 0x287   :  { %3690 = vmatprep.mubr.msk.bf16.mxu1 %vm3963_vm5, %v3962_v17  ;;  %3683 = vmatpush3.bf16.msra.mxu1 %v3885_v61 }
 0x288   :  { %3684 = vmatprep.subr.bf16.mxu1 %v3962_v17 }
 0x289   :  { %2747 = vmatmul.mubr.bf16.gmra.mxu0 %v1972_v16 }
 0x28a   :  { %2754 = vmatprep.mubr.bf16.mxu0 %v1975_v58 }
 0x28b   :  { %3685 = vmatpush3.bf16.msra.mxu1 %v3886_v0 }
 0x28c   :  { %3686 = vmatprep.subr.bf16.mxu1 %v3962_v17 }
 0x28f   :  { %3687 = vmatpush3.bf16.msra.mxu1 %v3887_v14 }
 0x290   :  { %3688 = vmatprep.subr.bf16.mxu1 %v3962_v17 }
 0x291   :  { %2755 = vmatmul.mubr.bf16.gmra.mxu0 %v1974_v13 }
 0x293   :  { %3689 = vmatpush3.bf16.msra.mxu1 %v3888_v48 }
 0x2d8   :  { %v3471_v29 = vpop.f32.mrf.mxu0 }
 0x2da   :  { %v3472_v1 = vpop.f32.mrf.mxu0 }
 0x2db   :  { %v5609_v7 = vadd.f32 %v3472_v1, %v3471_v29 }
 0x2dc   :  { %v3474_v5 = vpop.f32.mrf.mxu0 }
 0x2de   :  { %v3475_v38 = vpop.f32.mrf.mxu0 }
 0x2df   :  { %v5614_v27 = vadd.f32 %v3475_v38, %v3474_v5 }
 0x2e1   :  { %v3477_v34 = vpop.f32.mrf.mxu0 }
 0x2e3   :  { %v3478_v36 = vpop.f32.mrf.mxu0 }
 0x2e4   :  { %v5616_v63 = vadd.f32 %v3478_v36, %v3477_v34 }
 0x2e5   :  { %v3480_v28 = vpop.f32.mrf.mxu0 }
 0x2e7   :  { %v3481_v9 = vpop.f32.mrf.mxu0 }
 0x2e8   :  { %v5621_v6 = vadd.f32 %v3481_v9, %v3480_v28 }
 0x2e9   :  { %v3483_v24 = vpop.f32.mrf.mxu0 }
 0x2eb   :  { %v3484_v41 = vpop.f32.mrf.mxu0 }
 0x2ec   :  { %v5623_v20 = vadd.f32 %v3484_v41, %v3483_v24 }
 0x2ed   :  { %v3486_v16 = vpop.f32.mrf.mxu0 }
 0x2ef   :  { %v3487_v21 = vpop.f32.mrf.mxu0 }
 0x2f0   :  { %v5628_v26 = vadd.f32 %v3487_v21, %v3486_v16  ;;  %v5669_v16 = vld [vmem:[%s5746_s6] ss:$0 sm:$0xff] }
 0x2f1   :  { %v3489_v2 = vpop.f32.mrf.mxu0 }
 0x2f3   :  { %v3490_v58 = vpop.f32.mrf.mxu0 }
 0x2f4   :  { %v5630_v13 = vadd.f32 %v3490_v58, %v3489_v2 }
 0x2f5   :  { %v3492_v18 = vpop.f32.mrf.mxu0 }
 0x2f7   :  { %v3493_v55 = vpop.f32.mrf.mxu0 }
 0x2f8   :  { %v5638_v22 = vadd.f32 %v3493_v55, %v3492_v18 }
 0x2f9   :  { %v3495_v46 = vpop.f32.mrf.mxu0 }
 0x2fb   :  { %v3496_v51 = vpop.f32.mrf.mxu0 }
 0x2fc   :  { %v5643_v30 = vadd.f32 %v3496_v51, %v3495_v46 }
 0x2fd   :  { %v3498_v32 = vpop.f32.mrf.mxu0 }
 0x2ff   :  { %v3499_v50 = vpop.f32.mrf.mxu0 }
 0x300   :  { %v5648_v25 = vadd.f32 %v3499_v50, %v3498_v32 }
 0x301   :  { %v3501_v10 = vpop.f32.mrf.mxu0 }
 0x303   :  { %v3502_v15 = vpop.f32.mrf.mxu0 }
 0x304   :  { %v5650_v43 = vadd.f32 %v3502_v15, %v3501_v10 }
 0x305   :  { %v3504_v37 = vpop.f32.mrf.mxu0 }
 0x307   :  { %v3505_v59 = vpop.f32.mrf.mxu0 }
 0x308   :  { %v5652_v56 = vadd.f32 %v3505_v59, %v3504_v37 }
 0x309   :  { %v3507_v44 = vpop.f32.mrf.mxu0 }
 0x30b   :  { %v3508_v42 = vpop.f32.mrf.mxu0 }
 0x30c   :  { %v5654_v57 = vadd.f32 %v3508_v42, %v3507_v44 }
 0x30d   :  { %v3510_v31 = vpop.f32.mrf.mxu0 }
 0x30e   :  { %v3535_v3 = vpop.f32.mrf.mxu1 }
 0x30f   :  { %v3511_v62 = vpop.f32.mrf.mxu0 }
 0x310   :  { %v3536_v11 = vpop.f32.mrf.mxu1  ;;  %v5656_v45 = vadd.f32 %v3511_v62, %v3510_v31 }
 0x311   :  { %v3513_v60 = vpop.f32.mrf.mxu0  ;;  %v3537_v17 = vadd.f32 %v3536_v11, %v3535_v3 }
 0x312   :  { %v3538_v40 = vpop.f32.mrf.mxu1 }
 0x313   :  { %v3514_v4 = vpop.f32.mrf.mxu0  ;;  %v2604_v36 = vadd.f32 %v3537_v17, %v5609_v7 }
 0x314   :  { %v3539_v23 = vpop.f32.mrf.mxu1  ;;  %v5658_v53 = vadd.f32 %v3514_v4, %v3513_v60 }
 0x315   :  { %v5660_v35 = vpop.f32.mrf.mxu0  ;;  %v3540_v38 = vadd.f32 %v3539_v23, %v3538_v40 }
 0x316   :  { %v3541_v49 = vpop.f32.mrf.mxu1 }
 0x317   :  { %v5662_v8 = vpop.f32.mrf.mxu0  ;;  %v2607_v39 = vadd.f32 %v3540_v38, %v5614_v27 }
 0x318   :  { %v3542_v47 = vpop.f32.mrf.mxu1 }
 0x319   :  { %v3599_v19 = vpop.f32.mrf.mxu0  ;;  %v3543_v52 = vadd.f32 %v3542_v47, %v3541_v49 }
 0x31a   :  { %v3544_v33 = vpop.f32.mrf.mxu1 }
 0x31b   :  { %v3600_v29 = vpop.f32.mrf.mxu0  ;;  %v2612_v55 = vadd.f32 %v3543_v52, %v5616_v63 }
 0x31c   :  { %v3545_v12 = vpop.f32.mrf.mxu1  ;;  %v3601_v5 = vadd.f32 %v3600_v29, %v3599_v19 }
 0x31d   :  { %v3602_v54 = vpop.f32.mrf.mxu0  ;;  %v3546_v46 = vadd.f32 %v3545_v12, %v3544_v33 }
 0x31e   :  { %v3547_v1 = vpop.f32.mrf.mxu1  ;;  %v2701_v24 = vadd.f32 %v3601_v5, %v2604_v36 }
 0x31f   :  { %v3603_v28 = vpop.f32.mrf.mxu0  ;;  %v2615_v37 = vadd.f32 %v3546_v46, %v5621_v6 }
 0x320   :  { %v3548_v34 = vpop.f32.mrf.mxu1  ;;  %v3604_v41 = vadd.f32 %v3603_v28, %v3602_v54  ;;  %v2770_v7 = vadd.f32 %v5669_v16, %v2701_v24 }
 0x321   :  { %v3605_v21 = vpop.f32.mrf.mxu0  ;;  %v3549_v59 = vadd.f32 %v3548_v34, %v3547_v1 }
 0x322   :  { %v3550_v9 = vpop.f32.mrf.mxu1  ;;  %v2704_v58 = vadd.f32 %v3604_v41, %v2607_v39  ;;  %v2786_v10 = vmax.f32 %v2770_v7, 0.0 }
 0x323   :  { %v3606_v18 = vpop.f32.mrf.mxu0  ;;  %v2620_v23 = vadd.f32 %v3549_v59, %v5623_v20 }
 0x324   :  { %v3551_v2 = vpop.f32.mrf.mxu1  ;;  %v3607_v0 = vadd.f32 %v3606_v18, %v3605_v21  ;;  %v2771_v27 = vadd.f32 %v5669_v16, %v2704_v58  ;;  %v2802_v40 = vrot.slane %v2786_v10, 4 }
 0x325   :  { %v3608_v51 = vpop.f32.mrf.mxu0  ;;  %v3552_v4 = vadd.f32 %v3551_v2, %v3550_v9 }
 0x326   :  { %v3553_v61 = vpop.f32.mrf.mxu1  ;;  %v2709_v32 = vadd.f32 %v3607_v0, %v2612_v55  ;;  %v2787_v3 = vmax.f32 %v2771_v27, 0.0  ;;  %v2803_v5 = vadd.f32 %v2802_v40, %v2786_v10 }
 0x327   :  { %v3609_v50 = vpop.f32.mrf.mxu0  ;;  %v2623_v54 = vadd.f32 %v3552_v4, %v5628_v26 }
 0x328   :  { %v3554_v14 = vpop.f32.mrf.mxu1  ;;  %v2772_v15 = vadd.f32 %v5669_v16, %v2709_v32  ;;  %v3610_v44 = vadd.f32 %v3609_v50, %v3608_v51  ;;  %v2808_v12 = vrot.slane %v2787_v3, 4  ;;  %v2804_v58 = vrot.slane %v2803_v5, 2 }
 0x329   :  { %v3611_v42 = vpop.f32.mrf.mxu0  ;;  %v3555_v24 = vadd.f32 %v3554_v14, %v3553_v61 }
 0x32a   :  { %v3556_v48 = vpop.f32.mrf.mxu1  ;;  %v2712_v31 = vadd.f32 %v3610_v44, %v2615_v37  ;;  %v2788_v60 = vmax.f32 %v2772_v15, 0.0  ;;  %v2809_v52 = vadd.f32 %v2808_v12, %v2787_v3  ;;  %v2805_v15 = vadd.f32 %v2804_v58, %v2803_v5 }
 0x32b   :  { %v3612_v11 = vpop.f32.mrf.mxu0  ;;  %v2628_v32 = vadd.f32 %v3555_v24, %v5630_v13 }
 0x32c   :  { %v3557_v63 = vpop.f32.mrf.mxu1  ;;  %v2773_v49 = vadd.f32 %v5669_v16, %v2712_v31  ;;  %v3613_v47 = vadd.f32 %v3612_v11, %v3611_v42  ;;  %v2814_v38 = vrot.slane %v2788_v60, 4  ;;  %v2810_v26 = vrot.slane %v2809_v52, 2 }
 0x32d   :  { %v3614_v33 = vpop.f32.mrf.mxu0  ;;  %v3558_v11 = vadd.f32 %v3557_v63, %v3556_v48  ;;  %v2806_v4 = vrot.slane %v2805_v15, 1 }
 0x32e   :  { %v3559_v62 = vpop.f32.mrf.mxu1  ;;  %v2789_v6 = vmax.f32 %v2773_v49, 0.0  ;;  %v2717_v17 = vadd.f32 %v3613_v47, %v2620_v23  ;;  %v2815_v18 = vadd.f32 %v2814_v38, %v2788_v60  ;;  %v2811_v31 = vadd.f32 %v2810_v26, %v2809_v52 }
 0x32f   :  { %v3615_v29 = vpop.f32.mrf.mxu0 }
 0x330   :  { %v3560_v19 = vpop.f32.mrf.mxu1  ;;  %v2774_v34 = vadd.f32 %v5669_v16, %v2717_v17  ;;  %v3616_v36 = vadd.f32 %v3615_v29, %v3614_v33  ;;  %v2820_v9 = vrot.slane %v2789_v6, 4  ;;  %v2816_v61 = vrot.slane %v2815_v18, 2 }
 0x331   :  { %v3617_v28 = vpop.f32.mrf.mxu0  ;;  %v3561_v14 = vadd.f32 %v3560_v19, %v3559_v62  ;;  %v2812_v38 = vrot.slane %v2811_v31, 1 }
 0x332   :  { %v3562_v1 = vpop.f32.mrf.mxu1  ;;  %v2790_v41 = vmax.f32 %v2774_v34, 0.0  ;;  %v2720_v39 = vadd.f32 %v3616_v36, %v2623_v54  ;;  %v2821_v46 = vadd.f32 %v2820_v9, %v2789_v6  ;;  %v2817_v49 = vadd.f32 %v2816_v61, %v2815_v18 }
 0x333   :  { %v3618_v21 = vpop.f32.mrf.mxu0  ;;  %v2636_v13 = vadd.f32 %v3561_v14, %v5643_v30  ;;  %v2807_v34 = vadd.f32 %v2806_v4, %v2805_v15 }
 0x334   :  { %v3563_v20 = vpop.f32.mrf.mxu1  ;;  %v3619_v55 = vadd.f32 %v3618_v21, %v3617_v28  ;;  %v2826_v51 = vrot.slane %v2790_v41, 4  ;;  %v2775_v27 = vadd.f32 %v5669_v16, %v2720_v39  ;;  %v2822_v42 = vrot.slane %v2821_v46, 2 }
 0x335   :  { %v3620_v7 = vpop.f32.mrf.mxu0  ;;  %v3564_v33 = vadd.f32 %v3563_v20, %v3562_v1  ;;  %v2818_v36 = vrot.slane %v2817_v49, 1  ;;  %v2631_v28 = vadd.f32 %v3558_v11, %v5638_v22  ;;  %v5691_v26 = vmul.f32 0.125, %v2807_v34 }
 0x336   :  { %v3565_v2 = vpop.f32.mrf.mxu1  ;;  %v2725_v37 = vadd.f32 %v3619_v55, %v2628_v32  ;;  %v2827_v3 = vadd.f32 %v2826_v51, %v2790_v41  ;;  %v2791_v40 = vmax.f32 %v2775_v27, 0.0  ;;  %v2823_v19 = vadd.f32 %v2822_v42, %v2821_v46 }
 0x337   :  { %v3621_v50 = vpop.f32.mrf.mxu0  ;;  %v2639_v1 = vadd.f32 %v3564_v33, %v5648_v25  ;;  %v5689_v55 = vadd.f32 %v5662_v8, %v5660_v35  ;;  %v2819_v25 = vadd.f32 %v2818_v36, %v2817_v49 }
 0x338   :  { %v3566_v0 = vpop.f32.mrf.mxu1  ;;  %v2776_v12 = vadd.f32 %v5669_v16, %v2725_v37  ;;  %v2828_v17 = vrot.slane %v2827_v3, 2  ;;  %v3622_v29 = vadd.f32 %v3621_v50, %v3620_v7  ;;  %v2832_v54 = vrot.slane %v2791_v40, 4 }
 0x339   :  { %v3623_v59 = vpop.f32.mrf.mxu0  ;;  %v3567_v9 = vadd.f32 %v3566_v0, %v3565_v2  ;;  %v2824_v39 = vrot.slane %v2823_v19, 1  ;;  %v2813_v7 = vadd.f32 %v2812_v38, %v2811_v31  ;;  %v5700_v11 = vmul.f32 0.125, %v2819_v25 }
 0x33a   :  { %v3568_v10 = vpop.f32.mrf.mxu1  ;;  %v2792_v20 = vmax.f32 %v2776_v12, 0.0  ;;  %v2829_v21 = vadd.f32 %v2828_v17, %v2827_v3  ;;  %v2728_v58 = vadd.f32 %v3622_v29, %v2631_v28  ;;  %v2833_v46 = vadd.f32 %v2832_v54, %v2791_v40 }
 0x33b   :  { %v3624_v60 = vpop.f32.mrf.mxu0  ;;  %v2644_v50 = vadd.f32 %v3567_v9, %v5650_v43  ;;  %v2825_v37 = vadd.f32 %v2824_v39, %v2823_v19  ;;  %v5698_v42 = vmul.f32 0.125, %v2813_v7 }
 0x33c   :  { %v3569_v44 = vpop.f32.mrf.mxu1  ;;  %v3625_v47 = vadd.f32 %v3624_v60, %v3623_v59  ;;  %v2838_v27 = vrot.slane %v2792_v20, 4  ;;  %v2830_v35 = vrot.slane %v2829_v21, 1  ;;  %v5696_v8 = vadd.f32 %v5669_v16, %v2728_v58 }
 0x33d   :  { %v3626_v6 = vpop.f32.mrf.mxu0  ;;  %v3570_v32 = vadd.f32 %v3569_v44, %v3568_v10  ;;  %v2834_v3 = vrot.slane %v2833_v46, 2 }
 0x33e   :  { %v3571_v23 = vpop.f32.mrf.mxu1  ;;  %v2733_v5 = vadd.f32 %v3625_v47, %v2636_v13  ;;  %v2839_v49 = vadd.f32 %v2838_v27, %v2792_v20  ;;  %v2831_v19 = vadd.f32 %v2830_v35, %v2829_v21  ;;  %v2793_v17 = vmax.f32 %v5696_v8, 0.0 }
 0x33f   :  { %v3627_v48 = vpop.f32.mrf.mxu0  ;;  %v2647_v43 = vadd.f32 %v3570_v32, %v5652_v56 }
 0x340   :  { %v3572_v62 = vpop.f32.mrf.mxu1  ;;  %v2778_v30 = vadd.f32 %v5669_v16, %v2733_v5  ;;  %v3628_v52 = vadd.f32 %v3627_v48, %v3626_v6  ;;  %v5704_v6 = vmul.f32 0.125, %v2825_v37  ;;  %v5707_v5 = vadd.f32 %v2834_v3, %v2833_v46 }
 0x341   :  { %v3629_v24 = vpop.f32.mrf.mxu0  ;;  %v3573_v60 = vadd.f32 %v3572_v62, %v3571_v23 }
 0x342   :  { %v3574_v63 = vpop.f32.mrf.mxu1  ;;  %v2794_v18 = vmax.f32 %v2778_v30, 0.0  ;;  %v2736_v22 = vadd.f32 %v3628_v52, %v2639_v1  ;;  %v2840_v30 = vrot.slane %v2839_v49, 2 }
 0x343   :  { %v3630_v51 = vpop.f32.mrf.mxu0  ;;  %v2652_v62 = vadd.f32 %v3573_v60, %v5654_v57 }
 0x344   :  { %v3575_v41 = vpop.f32.mrf.mxu1  ;;  %v2850_v2 = vrot.slane %v2794_v18, 4  ;;  %v2779_v15 = vadd.f32 %v5669_v16, %v2736_v22  ;;  %v3631_v61 = vadd.f32 %v3630_v51, %v3629_v24  ;;  %v2844_v24 = vrot.slane %v2793_v17, 4 }
 0x345   :  { %v3632_v14 = vpop.f32.mrf.mxu0  ;;  %v3576_v34 = vadd.f32 %v3575_v41, %v3574_v63  ;;  %v5719_v60 = vadd.f32 %v2840_v30, %v2839_v49 }
 0x346   :  { %v3577_v0 = vpop.f32.mrf.mxu1  ;;  %v2851_v59 = vadd.f32 %v2850_v2, %v2794_v18  ;;  %v2795_v31 = vmax.f32 %v2779_v15, 0.0  ;;  %v2741_v10 = vadd.f32 %v3631_v61, %v2644_v50  ;;  %v5711_v18 = vmul.f32 0.125, %v2831_v19 }
 0x347   :  { %v3633_v44 = vpop.f32.mrf.mxu0  ;;  %v2655_v63 = vadd.f32 %v3576_v34, %v5656_v45  ;;  %v2836_v2 = vrot.slane %v5707_v5, 1 }
 0x348   :  { %v2852_v40 = vrot.slane %v2851_v59, 2  ;;  %v3578_v4 = vpop.f32.mrf.mxu1  ;;  %v2856_v13 = vrot.slane %v2795_v31, 4  ;;  %v2780_v47 = vadd.f32 %v5669_v16, %v2741_v10  ;;  %v3634_v33 = vadd.f32 %v3633_v44, %v3632_v14 }
 0x349   :  { %v3635_v12 = vpop.f32.mrf.mxu0  ;;  %v3579_v21 = vadd.f32 %v3578_v4, %v3577_v0 }
 0x34a   :  { %v2853_v29 = vadd.f32 %v2852_v40, %v2851_v59  ;;  %v2857_v38 = vadd.f32 %v2856_v13, %v2795_v31  ;;  %v2796_v54 = vmax.f32 %v2780_v47, 0.0  ;;  %v2744_v56 = vadd.f32 %v3634_v33, %v2647_v43  ;;  %v3580_v36 = vpop.f32.mrf.mxu1 }
 0x34b   :  { %v3636_v48 = vpop.f32.mrf.mxu0  ;;  %v2660_v14 = vadd.f32 %v3579_v21, %v5658_v53  ;;  %v2845_v53 = vadd.f32 %v2844_v24, %v2793_v17 }
 0x34c   :  { %v2854_v23 = vrot.slane %v2853_v29, 1  ;;  %v3637_v28 = vadd.f32 %v3636_v48, %v3635_v12  ;;  %v2858_v1 = vrot.slane %v2857_v38, 2  ;;  %v2862_v20 = vrot.slane %v2796_v54, 4  ;;  %v3581_v41 = vpop.f32.mrf.mxu1 }
 0x34d   :  { %v2781_v9 = vadd.f32 %v5669_v16, %v2744_v56  ;;  %v3638_v52 = vpop.f32.mrf.mxu0  ;;  %v3582_v45 = vadd.f32 %v3581_v41, %v3580_v36  ;;  %v2837_v41 = vadd.f32 %v2836_v2, %v5707_v5 }
 0x34e   :  { %v2855_v39 = vadd.f32 %v2854_v23, %v2853_v29  ;;  %v2749_v58 = vadd.f32 %v3637_v28, %v2652_v62  ;;  %v2859_v7 = vadd.f32 %v2858_v1, %v2857_v38  ;;  %v2863_v46 = vadd.f32 %v2862_v20, %v2796_v54 }
 0x34f   :  { %v2797_v22 = vmax.f32 %v2781_v9, 0.0  ;;  %v3639_v51 = vpop.f32.mrf.mxu0  ;;  %v2663_v56 = vadd.f32 %v3582_v45, %v5689_v55  ;;  %v2846_v1 = vrot.slane %v2845_v53, 2 }
 0x350   :  { %v2907_v57 = vmul.f32 0.125, %v2855_v39  ;;  %v2782_v25 = vadd.f32 %v5669_v16, %v2749_v58  ;;  %v3640_v32 = vadd.f32 %v3639_v51, %v3638_v52  ;;  %v2860_v27 = vrot.slane %v2859_v7, 1 }
 0x351   :  { %v2864_v50 = vrot.slane %v2863_v46, 2  ;;  %v2868_v15 = vrot.slane %v2797_v22, 4  ;;  %v3641_v0 = vpop.f32.mrf.mxu0 }
 0x352   :  { %v2915_v61 = vadd.f32 %v2907_v57, %v5691_v26  ;;  %v2798_v37 = vmax.f32 %v2782_v25, 0.0  ;;  %v2752_v35 = vadd.f32 %v3640_v32, %v2655_v63  ;;  %v2861_v8 = vadd.f32 %v2860_v27, %v2859_v7 }
 0x353   :  { %v2865_v59 = vadd.f32 %v2864_v50, %v2863_v46  ;;  %v2869_v3 = vadd.f32 %v2868_v15, %v2797_v22  ;;  %v3642_v31 = vpop.f32.mrf.mxu0 }
 0x354   :  { %v2923_v10 = vmul.f32 0.5, %v2915_v61  ;;  %v2874_v44 = vrot.slane %v2798_v37, 4  ;;  %v2783_v43 = vadd.f32 %v5669_v16, %v2752_v35  ;;  %v3643_v40 = vadd.f32 %v3642_v31, %v3641_v0 }
 0x355   :  { %v2908_v4 = vmul.f32 0.125, %v2861_v8  ;;  %v2866_v13 = vrot.slane %v2865_v59, 1  ;;  %v2870_v26 = vrot.slane %v2869_v3, 2  ;;  %v3644_v47 = vpop.f32.mrf.mxu0  ;;  %v2842_v61 = vrot.slane %v5719_v60, 1 }
 0x356   :  { %v2875_v33 = vadd.f32 %v2874_v44, %v2798_v37  ;;  %v2799_v12 = vmax.f32 %v2783_v43, 0.0  ;;  %v2757_v19 = vadd.f32 %v3643_v40, %v2660_v14  ;;  %v2931_v23 = vpack.c.bf16 %v2923_v10, %v2923_v10 }
 0x357   :  { %v2916_v29 = vadd.f32 %v2908_v4, %v5698_v42  ;;  %v2867_v38 = vadd.f32 %v2866_v13, %v2865_v59  ;;  %v2871_v54 = vadd.f32 %v2870_v26, %v2869_v3  ;;  %v3645_v48 = vpop.f32.mrf.mxu0  ;;  %v2847_v8 = vadd.f32 %v2846_v1, %v2845_v53 }
 0x358   :  { %v2876_v62 = vrot.slane %v2875_v33, 2  ;;  %v2880_v49 = vrot.slane %v2799_v12, 4  ;;  %v2784_v34 = vadd.f32 %v5669_v16, %v2757_v19  ;;  %v3646_v17 = vadd.f32 %v3645_v48, %v3644_v47 }
 0x359   :  { %v2924_v36 = vmul.f32 0.5, %v2916_v29  ;;  %v2909_v28 = vmul.f32 0.125, %v2867_v38  ;;  %v2872_v30 = vrot.slane %v2871_v54, 1  ;;  %v2970_v21 = vunpack.c.l.b16 %v2931_v23 }
 0x35a   :  { %v2877_v20 = vadd.f32 %v2876_v62, %v2875_v33  ;;  %v2881_v9 = vadd.f32 %v2880_v49, %v2799_v12  ;;  %v2800_v52 = vmax.f32 %v2784_v34, 0.0  ;;  %v2760_v55 = vadd.f32 %v3646_v17, %v2663_v56 }
 0x35b   :  { %v2932_v42 = vpack.c.bf16 %v2924_v36, %v2924_v36  ;;  %v2917_v24 = vadd.f32 %v2909_v28, %v5700_v11  ;;  %v2873_v39 = vadd.f32 %v2872_v30, %v2871_v54  ;;  %v2904_v31 = vmul.f32 0.125, %v2837_v41 }
 0x35c   :  { %v2878_v58 = vrot.slane %v2877_v20, 1  ;;  %v2882_v7 = vrot.slane %v2881_v9, 2  ;;  %v2886_v46 = vrot.slane %v2800_v52, 4  ;;  %v2785_v63 = vadd.f32 %v5669_v16, %v2760_v55 }
 0x35d   :  { %v2971_v22 = vunpack.c.l.b16 %v2932_v42  ;;  %v2925_v51 = vmul.f32 0.5, %v2917_v24  ;;  %v2910_v57 = vmul.f32 0.125, %v2873_v39  ;;  %v2843_v43 = vadd.f32 %v2842_v61, %v5719_v60 }
 0x35e   :  { %v2879_v25 = vadd.f32 %v2878_v58, %v2877_v20  ;;  %v2883_v32 = vadd.f32 %v2882_v7, %v2881_v9  ;;  %v2887_v27 = vadd.f32 %v2886_v46, %v2800_v52  ;;  %v2801_v0 = vmax.f32 %v2785_v63, 0.0  ;;  %v3437_v46 = vld [vmem:[%s5748_s8] ss:$0 sm:$0xff] }
 0x35f   :  { %v2979_v50 = vsel %vm2978_vm11, %v2971_v22, %v2970_v21  ;;  %v2933_v15 = vpack.c.bf16 %v2925_v51, %v2925_v51  ;;  %v2918_v11 = vadd.f32 %v2910_v57, %v5704_v6  ;;  %v2848_v26 = vrot.slane %v2847_v8, 1 }
 0x360   :  { %v2911_v14 = vmul.f32 0.125, %v2879_v25  ;;  %v2884_v37 = vrot.slane %v2883_v32, 1  ;;  %v2888_v35 = vrot.slane %v2887_v27, 2  ;;  %v2892_v16 = vrot.slane %v2801_v0, 4 }
 0x361   :  { %v2972_v59 = vunpack.c.l.b16 %v2933_v15  ;;  %v2926_v3 = vmul.f32 0.5, %v2918_v11  ;;  %v2905_v38 = vmul.f32 0.125, %v2843_v43  ;;  %v2849_v23 = vadd.f32 %v2848_v26, %v2847_v8 }
 0x362   :  { %v2919_v5 = vadd.f32 %v2911_v14, %v5711_v18  ;;  %v2885_v2 = vadd.f32 %v2884_v37, %v2883_v32  ;;  %v2889_v45 = vadd.f32 %v2888_v35, %v2887_v27  ;;  %v2893_v6 = vadd.f32 %v2892_v16, %v2801_v0 }
 0x363   :  { %v2981_v10 = vsel %vm2980_vm3, %v2972_v59, %v2979_v50  ;;  %v2934_v44 = vpack.c.bf16 %v2926_v3, %v2926_v3  ;;  %v2906_v17 = vmul.f32 0.125, %v2849_v23 }
 0x364   :  { %v2927_v40 = vmul.f32 0.5, %v2919_v5  ;;  %v2912_v4 = vmul.f32 0.125, %v2885_v2  ;;  %v2890_v13 = vrot.slane %v2889_v45, 1  ;;  %v2894_v53 = vrot.slane %v2893_v6, 2 }
 0x365   :  { %v2973_v47 = vunpack.c.l.b16 %v2934_v44 }
 0x366   :  { %v2935_v33 = vpack.c.bf16 %v2927_v40, %v2927_v40  ;;  %v2920_v12 = vadd.f32 %v2912_v4, %v2904_v31  ;;  %v2891_v19 = vadd.f32 %v2890_v13, %v2889_v45  ;;  %v2895_v29 = vadd.f32 %v2894_v53, %v2893_v6 }
 0x367   :  { %v2983_v18 = vsel %vm2982_vm2, %v2973_v47, %v2981_v10 }
 0x368   :  { %v2974_v54 = vunpack.c.l.b16 %v2935_v33  ;;  %v2928_v56 = vmul.f32 0.5, %v2920_v12  ;;  %v2913_v48 = vmul.f32 0.125, %v2891_v19  ;;  %v2896_v62 = vrot.slane %v2895_v29, 1 }
 0x36a   :  { %v2936_v60 = vpack.c.bf16 %v2928_v56, %v2928_v56  ;;  %v2921_v49 = vadd.f32 %v2913_v48, %v2905_v38  ;;  %v2985_v34 = vsel %vm2984_vm1, %v2974_v54, %v2983_v18  ;;  %v2897_v36 = vadd.f32 %v2896_v62, %v2895_v29 }
 0x36c   :  { %v2975_v28 = vunpack.c.l.b16 %v2936_v60  ;;  %v2929_v30 = vmul.f32 0.5, %v2921_v49  ;;  %v2914_v1 = vmul.f32 0.125, %v2897_v36 }
 0x36e   :  { %v2937_v20 = vpack.c.bf16 %v2929_v30, %v2929_v30  ;;  %v2987_v9 = vsel %vm2986_vm15, %v2975_v28, %v2985_v34  ;;  %v2922_v52 = vadd.f32 %v2914_v1, %v2906_v17 }
 0x370   :  { %v2976_v42 = vunpack.c.l.b16 %v2937_v20  ;;  %v2930_v24 = vmul.f32 0.5, %v2922_v52 }
 0x372   :  { %v2989_v39 = vsel %vm2988_vm14, %v2976_v42, %v2987_v9  ;;  %v2938_v55 = vpack.c.bf16 %v2930_v24, %v2930_v24 }
 0x374   :  { %v2977_v21 = vunpack.c.l.b16 %v2938_v55 }
 0x376   :  { %v2991_v58 = vsel %vm2990_vm6, %v2977_v21, %v2989_v39 }
 0x377   :  { %v2992_v7 = vpack.c.b16 %v2991_v58, %v2991_v58 }
 0x379   :  { %3691 = vmatmul.mubr.bf16.vlgmr.msra.gmra.mxu1 %v2992_v7 }
 0x439   :  { %v3076_v22 = vpop.f32.mrf.mxu1 }
 0x43a   :  { %v3077_v51 = vadd.f32 %v3437_v46, %v3076_v22 }
 0x43b   :  { %v3692_v57 = vpop.f32.mrf.mxu1 }
 0x43c   :  { %3082 = vst [vmem:[#allocation7] sm:$0xff] %v3077_v51 }
 0x43d   :  { %v3079_v63 = vpop.f32.mrf.mxu1 }
 0x43e   :  { %3940 = shalt.err (!%p3937_p0)
}
 0x43f   :  { %3092 = dma.vmem_to_hbm [thread:$0]  %s3090_s13, 128, %s5749_s9, [#allocation4]   ;;  %v3693_v41 = vpop.f32.mrf.mxu1 }
 0x440   :  { %3953 = dma.done.wait [#allocation4], 128  }
 0x441   :  { %3954 = vsyncadd [#allocation4], 4294967168 }
 0x442   :  { %3096 = vsyncpa [#allocation3], 1 }
 0x443   :  { %3097 = vsyncpa [#allocation6], 1 }
 0x444   :  { %3098 = vsyncpa [#allocation4], 1 }

</bundles_post_ra>
